<compile_context>
chip_gen: v5e
topology: v5e:2x2
jax: 0.10.0
libtpu: 0.0.40
codegen_flags: <defaults>
</compile_context>

<pallas_src>
import jax
import jax.numpy as jnp
import numpy as np
from jax.experimental import pallas as pl

F_DIM = 16      # in_size == out_size == mid_channels
N_NODES = 8     # multiple of 8 -> sublane-friendly tiles
BATCH = 2
K_CHEB = 3
LN_EPS = 1e-5   # nn.LayerNorm default eps
CHEB_EPS = 1e-5  # module's self.eps


# --------------------------------------------------------------------------
# Fused kernel: feat_encoder + message passing + Chebyshev node/edge filters
#               + output head + LayerNorm.  No grid; whole problem in VMEM.
# --------------------------------------------------------------------------
def _fused_kernel(z_ref, ef_ref, ew_ref, c1_ref, lap_ref, g_ref,
                  wz_ref, bz_ref, wf2_ref, bf2_ref,
                  wme_ref, bme_ref, wmg_ref, bmg_ref,
                  wp1_ref, bp1_ref, wp2_ref, bp2_ref,
                  wn_ref, wek_ref,
                  wo1_ref, wo2_ref, wo3_ref, bo_ref,
                  gamma_ref, beta_ref,
                  out_ref, eout_ref):
    z = z_ref[...]          # (B*N, 2F)
    ef = ef_ref[...]        # (B*N*N, F)   edge_fts, row = (b, j, i)
    ew = ew_ref[...]        # (B*N, N*F)   edge_fts, lane-dense per source node
    c1 = c1_ref[...]        # (B*N, N*F)   cheb_lap broadcast over F lanes
    lap = lap_ref[...]      # (B*N, B*N)   block-diagonal cheb_lap
    g = g_ref[...]          # (B, F)

    BN, F2 = z.shape
    F = F2 // 2
    NF = ew.shape[1]
    N = NF // F
    B = BN // N

    dot = lambda a, b: jnp.dot(a, b, preferred_element_type=jnp.float32)

    # ---- fused z projections: [m_1 | m_2 | feat_encoder.0] in one matmul ----
    zc = dot(z, wz_ref[...]) + bz_ref[...]                      # (B*N, 3F)
    msg1 = zc[:, :F]                                            # (B*N, F)
    msg2 = zc[:, F:2 * F]                                       # (B*N, F)
    h = dot(jnp.maximum(zc[:, 2 * F:], 0.0), wf2_ref[...]) + bf2_ref[...]

    # ---- messages: all N*N pairs as one (B*N*N, F) slab -------------------
    msge = dot(ef, wme_ref[...]) + bme_ref[...]                 # (B*N*N, F)
    msgg = dot(g, wmg_ref[...]) + bmg_ref[...]                  # (B, F)

    # msgs[b, j, i, f] = msg1[b,i,f] + msg2[b,j,f] + msge[b,j,i,f] + msgg[b,f]
    msgs = (msge.reshape(B, N, N, F)
            + msg1.reshape(B, 1, N, F)
            + msg2.reshape(B, N, 1, F)
            + msgg.reshape(B, 1, 1, F))
    x = jnp.maximum(msgs.reshape(B * N * N, F), 0.0)            # msg_mlp
    x = jnp.maximum(dot(x, wp1_ref[...]) + bp1_ref[...], 0.0)
    x = dot(x, wp2_ref[...]) + bp2_ref[...]                     # (B*N*N, F)
    # amax over j (torch dim=1)
    filt = jnp.max(x.reshape(B, N, N, F), axis=1).reshape(B * N, F)

    # ---- node Chebyshev filtering (block-diag Laplacian -> plain matmuls) --
    t0 = h
    t1 = dot(lap, h)
    t2 = 2.0 * dot(lap, t1) - t0
    fw = dot(filt, wn_ref[...])                                 # (B*N, 3F)
    node_out = t0 * fw[:, :F] + t1 * fw[:, F:2 * F] + t2 * fw[:, 2 * F:]

    # ---- edge Chebyshev filtering: one lane-dense MXU call -----------------
    c2 = 2.0 * c1 * c1 - 1.0
    ecat = jnp.concatenate([ew, c1 * ew, c2 * ew], axis=-1)     # (B*N, 3*N*F)
    eout_ref[...] = dot(ecat, wek_ref[...])                     # (B*N, N*F)

    # ---- output head + LayerNorm -------------------------------------------
    out = (dot(filt, wo1_ref[...]) + dot(node_out, wo2_ref[...])
           + dot(z, wo3_ref[...]) + bo_ref[...])
    mean = jnp.mean(out, axis=-1, keepdims=True)
    var = jnp.mean(jnp.square(out - mean), axis=-1, keepdims=True)
    out = (out - mean) * jax.lax.rsqrt(var + LN_EPS)
    out_ref[...] = out * gamma_ref[...] + beta_ref[...]


# --------------------------------------------------------------------------
# Host glue: Laplacian, spectral norm, layout prep, weight fusion, call
# --------------------------------------------------------------------------
def normalized_laplacian(adj):
    degrees = jnp.sum(adj, axis=1)
    dinv = jnp.where(degrees == 0, 1.0, jax.lax.rsqrt(degrees))
    D = jax.vmap(jnp.diag)(dinv)
    norm_adj = D @ adj @ D
    return jnp.eye(adj.shape[1], dtype=adj.dtype)[None] - norm_adj


@jax.jit
def forward(node_fts, edge_fts, graph_fts, hidden, adj, p):
    B, N, F = node_fts.shape
    z = jnp.concatenate([node_fts, hidden], axis=-1)                 # (B,N,2F)
    lap = normalized_laplacian(adj)
    # TODO(synk): spectral norm (SVD) has no Pallas equivalent; plain JAX here.
    eigval_max = jax.vmap(lambda m: jnp.linalg.norm(m, ord=2))(lap)
    cheb = (2.0 * lap / (eigval_max[:, None, None] + CHEB_EPS)
            - jnp.eye(N, dtype=lap.dtype)[None])

    # Flat / lane-dense input layouts (HBM reshapes, free).
    z_flat = z.reshape(B * N, 2 * F)
    e_flat = edge_fts.reshape(B * N * N, F)
    e_wide = edge_fts.reshape(B * N, N * F)
    c1_wide = jnp.repeat(cheb, F, axis=-1).reshape(B * N, N * F)
    lap_bd = (jnp.eye(B, dtype=cheb.dtype)[:, None, :, None]
              * cheb[:, :, None, :]).reshape(B * N, B * N)

    # Host-side weight fusion.
    W_zcat = jnp.concatenate([p['W_m1'], p['W_m2'], p['W_f1']], axis=1)   # (2F,3F)
    b_zcat = jnp.concatenate([p['b_m1'], p['b_m2'], p['b_f1']], axis=1)   # (1,3F)
    Wn_cat = jnp.concatenate([p['Wn'][0], p['Wn'][1], p['Wn'][2]], axis=1)  # (F,3F)
    eye_n = jnp.eye(N, dtype=jnp.float32)
    We_kron = jnp.concatenate(
        [jnp.kron(eye_n, p['We'][k]) for k in range(K_CHEB)], axis=0)     # (3NF,NF)
    b_o = p['b_o1'] + p['b_o2'] + p['b_o3']

    out_flat, eout_wide = pl.pallas_call(
        _fused_kernel,
        out_shape=(jax.ShapeDtypeStruct((B * N, F), jnp.float32),
                   jax.ShapeDtypeStruct((B * N, N * F), jnp.float32)),
    )(z_flat, e_flat, e_wide, c1_wide, lap_bd, graph_fts,
      W_zcat, b_zcat, p['W_f2'], p['b_f2'],
      p['W_me'], p['b_me'], p['W_mg'], p['b_mg'],
      p['W_p1'], p['b_p1'], p['W_p2'], p['b_p2'],
      Wn_cat, We_kron,
      p['W_o1'], p['W_o2'], p['W_o3'], b_o,
      p['gamma'], p['beta'])

    return out_flat.reshape(B, N, F), eout_wide.reshape(B, N, N, F)


# --------------------------------------------------------------------------
# Pure-JAX reference (mirrors the PyTorch forward exactly)
# --------------------------------------------------------------------------
def reference_forward(node_fts, edge_fts, graph_fts, hidden, adj, p):
    lin = lambda x, w, b: x @ w + b[0]
    z = jnp.concatenate([node_fts, hidden], -1)
    lap = normalized_laplacian(adj)
    eig = jax.vmap(lambda m: jnp.linalg.norm(m, ord=2))(lap)
    n = adj.shape[1]
    cheb = 2.0 * lap / (eig[:, None, None] + CHEB_EPS) - jnp.eye(n)[None]
    h = lin(jnp.maximum(lin(z, p['W_f1'], p['b_f1']), 0), p['W_f2'], p['b_f2'])
    msg1 = lin(z, p['W_m1'], p['b_m1'])
    msg2 = lin(z, p['W_m2'], p['b_m2'])
    msge = lin(edge_fts, p['W_me'], p['b_me'])
    msgg = lin(graph_fts, p['W_mg'], p['b_mg'])
    msgs = msg1[:, None, :, :] + msg2[:, :, None, :] + msge + msgg[:, None, None, :]
    x = jnp.maximum(msgs, 0)
    x = jnp.maximum(x @ p['W_p1'] + p['b_p1'][0], 0)
    x = x @ p['W_p2'] + p['b_p2'][0]
    filt = jnp.max(x, axis=1)
    t = [h, jnp.einsum('bij,bjf->bif', cheb, h)]
    t.append(2.0 * jnp.einsum('bij,bjf->bif', cheb, t[1]) - t[0])
    cn = jnp.stack(t, 1)
    et = [edge_fts, cheb[..., None] * edge_fts]
    et.append(2.0 * cheb[..., None] * et[1] - et[0])
    ce = jnp.stack(et, 1)
    node_out = jnp.einsum('bnij,bnij->bij', cn,
                          jnp.einsum('bij,njk->bnik', filt, p['Wn']))
    edge_out = jnp.einsum('bnijl,nlk->bijk', ce, p['We'])
    out = (lin(filt, p['W_o1'], p['b_o1']) + lin(node_out, p['W_o2'], p['b_o2'])
           + lin(z, p['W_o3'], p['b_o3']))
    mean = out.mean(-1, keepdims=True)
    var = ((out - mean) ** 2).mean(-1, keepdims=True)
    out = (out - mean) / jnp.sqrt(var + LN_EPS) * p['gamma'][0] + p['beta'][0]
    return out, edge_out


if __name__ == "__main__":
    f, n, b = F_DIM, N_NODES, BATCH
    keys = jax.random.split(jax.random.PRNGKey(0), 32)

    def w(k, shape, scale=0.1):
        return (scale * jax.random.normal(k, shape)).astype(jnp.float32)

    params = {
        'W_m1': w(keys[0], (2 * f, f)), 'b_m1': w(keys[1], (1, f)),
        'W_m2': w(keys[2], (2 * f, f)), 'b_m2': w(keys[3], (1, f)),
        'W_me': w(keys[4], (f, f)),     'b_me': w(keys[5], (1, f)),
        'W_mg': w(keys[6], (f, f)),     'b_mg': w(keys[7], (1, f)),
        'W_p1': w(keys[8], (f, f)),     'b_p1': w(keys[9], (1, f)),
        'W_p2': w(keys[10], (f, f)),    'b_p2': w(keys[11], (1, f)),
        'W_f1': w(keys[12], (2 * f, f)), 'b_f1': w(keys[13], (1, f)),
        'W_f2': w(keys[14], (f, f)),    'b_f2': w(keys[15], (1, f)),
        'Wn': w(keys[16], (K_CHEB, f, f)),
        'We': w(keys[17], (K_CHEB, f, f)),
        'W_o1': w(keys[18], (f, f)),    'b_o1': w(keys[19], (1, f)),
        'W_o2': w(keys[20], (f, f)),    'b_o2': w(keys[21], (1, f)),
        'W_o3': w(keys[22], (2 * f, f)), 'b_o3': w(keys[23], (1, f)),
        'gamma': jnp.ones((1, f), jnp.float32),
        'beta': jnp.zeros((1, f), jnp.float32),
    }

    node_fts = w(keys[24], (b, n, f), 1.0)
    hidden = w(keys[25], (b, n, f), 1.0)
    edge_fts = w(keys[26], (b, n, n, f), 1.0)
    graph_fts = w(keys[27], (b, f), 1.0)
    adj = (jax.random.uniform(keys[28], (b, n, n)) > 0.4).astype(jnp.float32)

    out, edge_out = forward(node_fts, edge_fts, graph_fts, hidden, adj, params)
    jax.block_until_ready((out, edge_out))

    ref_out, ref_edge = reference_forward(node_fts, edge_fts, graph_fts, hidden, adj, params)
    assert np.allclose(np.asarray(out), np.asarray(ref_out), rtol=2e-3, atol=2e-3)
    assert np.allclose(np.asarray(edge_out), np.asarray(ref_edge), rtol=2e-3, atol=2e-3)
    print("KERNEL_OK")
</pallas_src>

<mosaic_0001>
module attributes {stable_mosaic.version = 11 : i64} {
  func.func @_fused_kernel(%arg0: memref<16x32xf32, #tpu.memory_space<vmem>>, %arg1: memref<128x16xf32, #tpu.memory_space<vmem>>, %arg2: memref<16x128xf32, #tpu.memory_space<vmem>>, %arg3: memref<16x128xf32, #tpu.memory_space<vmem>>, %arg4: memref<16x16xf32, #tpu.memory_space<vmem>>, %arg5: memref<2x16xf32, #tpu.memory_space<vmem>>, %arg6: memref<32x48xf32, #tpu.memory_space<vmem>>, %arg7: memref<1x48xf32, #tpu.memory_space<vmem>>, %arg8: memref<16x16xf32, #tpu.memory_space<vmem>>, %arg9: memref<1x16xf32, #tpu.memory_space<vmem>>, %arg10: memref<16x16xf32, #tpu.memory_space<vmem>>, %arg11: memref<1x16xf32, #tpu.memory_space<vmem>>, %arg12: memref<16x16xf32, #tpu.memory_space<vmem>>, %arg13: memref<1x16xf32, #tpu.memory_space<vmem>>, %arg14: memref<16x16xf32, #tpu.memory_space<vmem>>, %arg15: memref<1x16xf32, #tpu.memory_space<vmem>>, %arg16: memref<16x16xf32, #tpu.memory_space<vmem>>, %arg17: memref<1x16xf32, #tpu.memory_space<vmem>>, %arg18: memref<16x48xf32, #tpu.memory_space<vmem>>, %arg19: memref<384x128xf32, #tpu.memory_space<vmem>>, %arg20: memref<16x16xf32, #tpu.memory_space<vmem>>, %arg21: memref<16x16xf32, #tpu.memory_space<vmem>>, %arg22: memref<32x16xf32, #tpu.memory_space<vmem>>, %arg23: memref<1x16xf32, #tpu.memory_space<vmem>>, %arg24: memref<1x16xf32, #tpu.memory_space<vmem>>, %arg25: memref<1x16xf32, #tpu.memory_space<vmem>>, %arg26: memref<16x16xf32, #tpu.memory_space<vmem>>, %arg27: memref<16x128xf32, #tpu.memory_space<vmem>>) attributes {dimension_semantics = [], scalar_prefetch = 0 : i64, scratch_operands = 0 : i64, tpu.core_type = #tpu.core_type<tc>} {
    %c0 = arith.constant 0 : index
    %c0_0 = arith.constant 0 : index
    %0 = vector.load %arg0[%c0, %c0_0] : memref<16x32xf32, #tpu.memory_space<vmem>>, vector<16x32xf32>
    %c0_1 = arith.constant 0 : index
    %c0_2 = arith.constant 0 : index
    %1 = vector.load %arg1[%c0_1, %c0_2] : memref<128x16xf32, #tpu.memory_space<vmem>>, vector<128x16xf32>
    %c0_3 = arith.constant 0 : index
    %c0_4 = arith.constant 0 : index
    %2 = vector.load %arg2[%c0_3, %c0_4] : memref<16x128xf32, #tpu.memory_space<vmem>>, vector<16x128xf32>
    %c0_5 = arith.constant 0 : index
    %c0_6 = arith.constant 0 : index
    %3 = vector.load %arg3[%c0_5, %c0_6] : memref<16x128xf32, #tpu.memory_space<vmem>>, vector<16x128xf32>
    %c0_7 = arith.constant 0 : index
    %c0_8 = arith.constant 0 : index
    %4 = vector.load %arg4[%c0_7, %c0_8] : memref<16x16xf32, #tpu.memory_space<vmem>>, vector<16x16xf32>
    %c0_9 = arith.constant 0 : index
    %c0_10 = arith.constant 0 : index
    %5 = vector.load %arg5[%c0_9, %c0_10] : memref<2x16xf32, #tpu.memory_space<vmem>>, vector<2x16xf32>
    %c0_11 = arith.constant 0 : index
    %c0_12 = arith.constant 0 : index
    %6 = vector.load %arg6[%c0_11, %c0_12] : memref<32x48xf32, #tpu.memory_space<vmem>>, vector<32x48xf32>
    %cst = arith.constant dense<0.000000e+00> : vector<16x48xf32>
    %7 = tpu.matmul %0, %6, %cst {dimension_numbers = #tpu.dot_dimension_numbers<[1], [0], [0], [1], [0, 0, 1, 1], [], []>} : vector<16x32xf32>, vector<32x48xf32>, vector<16x48xf32> -> vector<16x48xf32>
    %c0_13 = arith.constant 0 : index
    %c0_14 = arith.constant 0 : index
    %8 = vector.load %arg7[%c0_13, %c0_14] : memref<1x48xf32, #tpu.memory_space<vmem>>, vector<1x48xf32>
    %9 = vector.broadcast %8 : vector<1x48xf32> to vector<16x48xf32>
    %10 = arith.addf %7, %9 : vector<16x48xf32>
    %11 = vector.extract_strided_slice %10 {offsets = [0, 0], sizes = [16, 16], strides = [1, 1]} : vector<16x48xf32> to vector<16x16xf32>
    %12 = vector.extract_strided_slice %10 {offsets = [0, 16], sizes = [16, 16], strides = [1, 1]} : vector<16x48xf32> to vector<16x16xf32>
    %13 = vector.extract_strided_slice %10 {offsets = [0, 32], sizes = [16, 16], strides = [1, 1]} : vector<16x48xf32> to vector<16x16xf32>
    %cst_15 = arith.constant 0.000000e+00 : f32
    %14 = vector.broadcast %cst_15 : f32 to vector<16x16xf32>
    %15 = arith.maximumf %13, %14 : vector<16x16xf32>
    %c0_16 = arith.constant 0 : index
    %c0_17 = arith.constant 0 : index
    %16 = vector.load %arg8[%c0_16, %c0_17] : memref<16x16xf32, #tpu.memory_space<vmem>>, vector<16x16xf32>
    %cst_18 = arith.constant dense<0.000000e+00> : vector<16x16xf32>
    %17 = tpu.matmul %15, %16, %cst_18 {dimension_numbers = #tpu.dot_dimension_numbers<[1], [0], [0], [1], [0, 0, 1, 1], [], []>} : vector<16x16xf32>, vector<16x16xf32>, vector<16x16xf32> -> vector<16x16xf32>
    %c0_19 = arith.constant 0 : index
    %c0_20 = arith.constant 0 : index
    %18 = vector.load %arg9[%c0_19, %c0_20] : memref<1x16xf32, #tpu.memory_space<vmem>>, vector<1x16xf32>
    %19 = vector.broadcast %18 : vector<1x16xf32> to vector<16x16xf32>
    %20 = arith.addf %17, %19 : vector<16x16xf32>
    %c0_21 = arith.constant 0 : index
    %c0_22 = arith.constant 0 : index
    %21 = vector.load %arg10[%c0_21, %c0_22] : memref<16x16xf32, #tpu.memory_space<vmem>>, vector<16x16xf32>
    %cst_23 = arith.constant dense<0.000000e+00> : vector<128x16xf32>
    %22 = tpu.matmul %1, %21, %cst_23 {dimension_numbers = #tpu.dot_dimension_numbers<[1], [0], [0], [1], [0, 0, 1, 1], [], []>} : vector<128x16xf32>, vector<16x16xf32>, vector<128x16xf32> -> vector<128x16xf32>
    %c0_24 = arith.constant 0 : index
    %c0_25 = arith.constant 0 : index
    %23 = vector.load %arg11[%c0_24, %c0_25] : memref<1x16xf32, #tpu.memory_space<vmem>>, vector<1x16xf32>
    %24 = vector.broadcast %23 : vector<1x16xf32> to vector<128x16xf32>
    %25 = arith.addf %22, %24 : vector<128x16xf32>
    %c0_26 = arith.constant 0 : index
    %c0_27 = arith.constant 0 : index
    %26 = vector.load %arg12[%c0_26, %c0_27] : memref<16x16xf32, #tpu.memory_space<vmem>>, vector<16x16xf32>
    %cst_28 = arith.constant dense<0.000000e+00> : vector<2x16xf32>
    %27 = tpu.matmul %5, %26, %cst_28 {dimension_numbers = #tpu.dot_dimension_numbers<[1], [0], [0], [1], [0, 0, 1, 1], [], []>} : vector<2x16xf32>, vector<16x16xf32>, vector<2x16xf32> -> vector<2x16xf32>
    %c0_29 = arith.constant 0 : index
    %c0_30 = arith.constant 0 : index
    %28 = vector.load %arg13[%c0_29, %c0_30] : memref<1x16xf32, #tpu.memory_space<vmem>>, vector<1x16xf32>
    %29 = vector.broadcast %28 : vector<1x16xf32> to vector<2x16xf32>
    %30 = arith.addf %27, %29 : vector<2x16xf32>
    %31 = vector.shape_cast %25 : vector<128x16xf32> to vector<2x8x8x16xf32>
    %32 = vector.shape_cast %11 : vector<16x16xf32> to vector<2x1x8x16xf32>
    %33 = vector.broadcast %32 : vector<2x1x8x16xf32> to vector<2x8x8x16xf32>
    %34 = arith.addf %31, %33 : vector<2x8x8x16xf32>
    %35 = vector.shape_cast %12 : vector<16x16xf32> to vector<2x8x1x16xf32>
    %36 = vector.broadcast %35 : vector<2x8x1x16xf32> to vector<2x8x8x16xf32>
    %37 = arith.addf %34, %36 : vector<2x8x8x16xf32>
    %38 = vector.shape_cast %30 : vector<2x16xf32> to vector<2x1x1x16xf32>
    %39 = vector.broadcast %38 : vector<2x1x1x16xf32> to vector<2x8x8x16xf32>
    %40 = arith.addf %37, %39 : vector<2x8x8x16xf32>
    %41 = vector.shape_cast %40 : vector<2x8x8x16xf32> to vector<128x16xf32>
    %cst_31 = arith.constant 0.000000e+00 : f32
    %42 = vector.broadcast %cst_31 : f32 to vector<128x16xf32>
    %43 = arith.maximumf %41, %42 : vector<128x16xf32>
    %c0_32 = arith.constant 0 : index
    %c0_33 = arith.constant 0 : index
    %44 = vector.load %arg14[%c0_32, %c0_33] : memref<16x16xf32, #tpu.memory_space<vmem>>, vector<16x16xf32>
    %cst_34 = arith.constant dense<0.000000e+00> : vector<128x16xf32>
    %45 = tpu.matmul %43, %44, %cst_34 {dimension_numbers = #tpu.dot_dimension_numbers<[1], [0], [0], [1], [0, 0, 1, 1], [], []>} : vector<128x16xf32>, vector<16x16xf32>, vector<128x16xf32> -> vector<128x16xf32>
    %c0_35 = arith.constant 0 : index
    %c0_36 = arith.constant 0 : index
    %46 = vector.load %arg15[%c0_35, %c0_36] : memref<1x16xf32, #tpu.memory_space<vmem>>, vector<1x16xf32>
    %47 = vector.broadcast %46 : vector<1x16xf32> to vector<128x16xf32>
    %48 = arith.addf %45, %47 : vector<128x16xf32>
    %cst_37 = arith.constant 0.000000e+00 : f32
    %49 = vector.broadcast %cst_37 : f32 to vector<128x16xf32>
    %50 = arith.maximumf %48, %49 : vector<128x16xf32>
    %c0_38 = arith.constant 0 : index
    %c0_39 = arith.constant 0 : index
    %51 = vector.load %arg16[%c0_38, %c0_39] : memref<16x16xf32, #tpu.memory_space<vmem>>, vector<16x16xf32>
    %cst_40 = arith.constant dense<0.000000e+00> : vector<128x16xf32>
    %52 = tpu.matmul %50, %51, %cst_40 {dimension_numbers = #tpu.dot_dimension_numbers<[1], [0], [0], [1], [0, 0, 1, 1], [], []>} : vector<128x16xf32>, vector<16x16xf32>, vector<128x16xf32> -> vector<128x16xf32>
    %c0_41 = arith.constant 0 : index
    %c0_42 = arith.constant 0 : index
    %53 = vector.load %arg17[%c0_41, %c0_42] : memref<1x16xf32, #tpu.memory_space<vmem>>, vector<1x16xf32>
    %54 = vector.broadcast %53 : vector<1x16xf32> to vector<128x16xf32>
    %55 = arith.addf %52, %54 : vector<128x16xf32>
    %56 = vector.shape_cast %55 : vector<128x16xf32> to vector<2x8x8x16xf32>
    %cst_43 = arith.constant dense<0xFF800000> : vector<2x8x16xf32>
    %57 = vector.multi_reduction <maximumf>, %56, %cst_43 [1] : vector<2x8x8x16xf32> to vector<2x8x16xf32>
    %58 = vector.shape_cast %57 : vector<2x8x16xf32> to vector<16x16xf32>
    %cst_44 = arith.constant dense<0.000000e+00> : vector<16x16xf32>
    %59 = tpu.matmul %4, %20, %cst_44 {dimension_numbers = #tpu.dot_dimension_numbers<[1], [0], [0], [1], [0, 0, 1, 1], [], []>} : vector<16x16xf32>, vector<16x16xf32>, vector<16x16xf32> -> vector<16x16xf32>
    %cst_45 = arith.constant dense<0.000000e+00> : vector<16x16xf32>
    %60 = tpu.matmul %4, %59, %cst_45 {dimension_numbers = #tpu.dot_dimension_numbers<[1], [0], [0], [1], [0, 0, 1, 1], [], []>} : vector<16x16xf32>, vector<16x16xf32>, vector<16x16xf32> -> vector<16x16xf32>
    %cst_46 = arith.constant 2.000000e+00 : f32
    %61 = vector.broadcast %cst_46 : f32 to vector<16x16xf32>
    %62 = arith.mulf %61, %60 : vector<16x16xf32>
    %63 = arith.subf %62, %20 : vector<16x16xf32>
    %c0_47 = arith.constant 0 : index
    %c0_48 = arith.constant 0 : index
    %64 = vector.load %arg18[%c0_47, %c0_48] : memref<16x48xf32, #tpu.memory_space<vmem>>, vector<16x48xf32>
    %cst_49 = arith.constant dense<0.000000e+00> : vector<16x48xf32>
    %65 = tpu.matmul %58, %64, %cst_49 {dimension_numbers = #tpu.dot_dimension_numbers<[1], [0], [0], [1], [0, 0, 1, 1], [], []>} : vector<16x16xf32>, vector<16x48xf32>, vector<16x48xf32> -> vector<16x48xf32>
    %66 = vector.extract_strided_slice %65 {offsets = [0, 0], sizes = [16, 16], strides = [1, 1]} : vector<16x48xf32> to vector<16x16xf32>
    %67 = arith.mulf %20, %66 : vector<16x16xf32>
    %68 = vector.extract_strided_slice %65 {offsets = [0, 16], sizes = [16, 16], strides = [1, 1]} : vector<16x48xf32> to vector<16x16xf32>
    %69 = arith.mulf %59, %68 : vector<16x16xf32>
    %70 = arith.addf %67, %69 : vector<16x16xf32>
    %71 = vector.extract_strided_slice %65 {offsets = [0, 32], sizes = [16, 16], strides = [1, 1]} : vector<16x48xf32> to vector<16x16xf32>
    %72 = arith.mulf %63, %71 : vector<16x16xf32>
    %73 = arith.addf %70, %72 : vector<16x16xf32>
    %cst_50 = arith.constant 2.000000e+00 : f32
    %74 = vector.broadcast %cst_50 : f32 to vector<16x128xf32>
    %75 = arith.mulf %74, %3 : vector<16x128xf32>
    %76 = arith.mulf %75, %3 : vector<16x128xf32>
    %cst_51 = arith.constant 1.000000e+00 : f32
    %77 = vector.broadcast %cst_51 : f32 to vector<16x128xf32>
    %78 = arith.subf %76, %77 : vector<16x128xf32>
    %79 = arith.mulf %3, %2 : vector<16x128xf32>
    %80 = arith.mulf %78, %2 : vector<16x128xf32>
    %81 = tpu.concatenate %2, %79, %80 in 1 : vector<16x128xf32>, vector<16x128xf32>, vector<16x128xf32> -> vector<16x384xf32>
    %c0_52 = arith.constant 0 : index
    %c0_53 = arith.constant 0 : index
    %82 = vector.load %arg19[%c0_52, %c0_53] : memref<384x128xf32, #tpu.memory_space<vmem>>, vector<384x128xf32>
    %cst_54 = arith.constant dense<0.000000e+00> : vector<16x128xf32>
    %83 = tpu.matmul %81, %82, %cst_54 {dimension_numbers = #tpu.dot_dimension_numbers<[1], [0], [0], [1], [0, 0, 1, 1], [], []>} : vector<16x384xf32>, vector<384x128xf32>, vector<16x128xf32> -> vector<16x128xf32>
    %c0_55 = arith.constant 0 : index
    %c0_56 = arith.constant 0 : index
    %84 = vector.load %arg27[%c0_55, %c0_56] : memref<16x128xf32, #tpu.memory_space<vmem>>, vector<16x128xf32>
    tpu.vector_store %arg27[%c0_55, %c0_56], %83 {strides = array<i32>} : memref<16x128xf32, #tpu.memory_space<vmem>>, vector<16x128xf32>,
    %c0_57 = arith.constant 0 : index
    %c0_58 = arith.constant 0 : index
    %85 = vector.load %arg20[%c0_57, %c0_58] : memref<16x16xf32, #tpu.memory_space<vmem>>, vector<16x16xf32>
    %cst_59 = arith.constant dense<0.000000e+00> : vector<16x16xf32>
    %86 = tpu.matmul %58, %85, %cst_59 {dimension_numbers = #tpu.dot_dimension_numbers<[1], [0], [0], [1], [0, 0, 1, 1], [], []>} : vector<16x16xf32>, vector<16x16xf32>, vector<16x16xf32> -> vector<16x16xf32>
    %c0_60 = arith.constant 0 : index
    %c0_61 = arith.constant 0 : index
    %87 = vector.load %arg21[%c0_60, %c0_61] : memref<16x16xf32, #tpu.memory_space<vmem>>, vector<16x16xf32>
    %cst_62 = arith.constant dense<0.000000e+00> : vector<16x16xf32>
    %88 = tpu.matmul %73, %87, %cst_62 {dimension_numbers = #tpu.dot_dimension_numbers<[1], [0], [0], [1], [0, 0, 1, 1], [], []>} : vector<16x16xf32>, vector<16x16xf32>, vector<16x16xf32> -> vector<16x16xf32>
    %89 = arith.addf %86, %88 : vector<16x16xf32>
    %c0_63 = arith.constant 0 : index
    %c0_64 = arith.constant 0 : index
    %90 = vector.load %arg22[%c0_63, %c0_64] : memref<32x16xf32, #tpu.memory_space<vmem>>, vector<32x16xf32>
    %cst_65 = arith.constant dense<0.000000e+00> : vector<16x16xf32>
    %91 = tpu.matmul %0, %90, %cst_65 {dimension_numbers = #tpu.dot_dimension_numbers<[1], [0], [0], [1], [0, 0, 1, 1], [], []>} : vector<16x32xf32>, vector<32x16xf32>, vector<16x16xf32> -> vector<16x16xf32>
    %92 = arith.addf %89, %91 : vector<16x16xf32>
    %c0_66 = arith.constant 0 : index
    %c0_67 = arith.constant 0 : index
    %93 = vector.load %arg23[%c0_66, %c0_67] : memref<1x16xf32, #tpu.memory_space<vmem>>, vector<1x16xf32>
    %94 = vector.broadcast %93 : vector<1x16xf32> to vector<16x16xf32>
    %95 = arith.addf %92, %94 : vector<16x16xf32>
    %cst_68 = arith.constant dense<0.000000e+00> : vector<16xf32>
    %96 = vector.multi_reduction <add>, %95, %cst_68 [1] : vector<16x16xf32> to vector<16xf32>
    %97 = vector.shape_cast %96 : vector<16xf32> to vector<16x1xf32>
    %cst_69 = arith.constant 1.600000e+01 : f32
    %98 = vector.broadcast %cst_69 : f32 to vector<16x1xf32>
    %99 = arith.divf %97, %98 : vector<16x1xf32>
    %100 = vector.broadcast %99 : vector<16x1xf32> to vector<16x16xf32>
    %101 = arith.subf %95, %100 : vector<16x16xf32>
    %102 = arith.mulf %101, %101 : vector<16x16xf32>
    %cst_70 = arith.constant dense<0.000000e+00> : vector<16xf32>
    %103 = vector.multi_reduction <add>, %102, %cst_70 [1] : vector<16x16xf32> to vector<16xf32>
    %104 = vector.shape_cast %103 : vector<16xf32> to vector<16x1xf32>
    %cst_71 = arith.constant 1.600000e+01 : f32
    %105 = vector.broadcast %cst_71 : f32 to vector<16x1xf32>
    %106 = arith.divf %104, %105 : vector<16x1xf32>
    %107 = vector.broadcast %99 : vector<16x1xf32> to vector<16x16xf32>
    %108 = arith.subf %95, %107 : vector<16x16xf32>
    %cst_72 = arith.constant 9.99999974E-6 : f32
    %109 = vector.broadcast %cst_72 : f32 to vector<16x1xf32>
    %110 = arith.addf %106, %109 : vector<16x1xf32>
    %111 = math.rsqrt %110 : vector<16x1xf32>
    %112 = vector.broadcast %111 : vector<16x1xf32> to vector<16x16xf32>
    %113 = arith.mulf %108, %112 : vector<16x16xf32>
    %c0_73 = arith.constant 0 : index
    %c0_74 = arith.constant 0 : index
    %114 = vector.load %arg24[%c0_73, %c0_74] : memref<1x16xf32, #tpu.memory_space<vmem>>, vector<1x16xf32>
    %115 = vector.broadcast %114 : vector<1x16xf32> to vector<16x16xf32>
    %116 = arith.mulf %113, %115 : vector<16x16xf32>
    %c0_75 = arith.constant 0 : index
    %c0_76 = arith.constant 0 : index
    %117 = vector.load %arg25[%c0_75, %c0_76] : memref<1x16xf32, #tpu.memory_space<vmem>>, vector<1x16xf32>
    %118 = vector.broadcast %117 : vector<1x16xf32> to vector<16x16xf32>
    %119 = arith.addf %116, %118 : vector<16x16xf32>
    %c0_77 = arith.constant 0 : index
    %c0_78 = arith.constant 0 : index
    %120 = vector.load %arg26[%c0_77, %c0_78] : memref<16x16xf32, #tpu.memory_space<vmem>>, vector<16x16xf32>
    tpu.vector_store %arg26[%c0_77, %c0_78], %119 {strides = array<i32>} : memref<16x16xf32, #tpu.memory_space<vmem>>, vector<16x16xf32>,
    return
  }
}

</mosaic_0001>

<bundles_post_ra>
// kernel: custom-call.48
= control target key start
LH: loop header
LB: loop body
LE: loop exit
PB: predicated region body
PF: predicated region fallthrough
CT: control target
= control target key end

     0   :  { %s828_s9 = smov 0   ;;  %s830_s10 = smov 0   ;;  %s1027_s0 = inlined_call_operand.vmem [shape: f32[2,16,8], index: 0, kind: input, shape index: {}]   ;;  %s1028_s1 = inlined_call_operand.vmem [shape: f32[2,16,8], index: 1, kind: output, shape index: {0}]   ;;  %s1029_s2 = inlined_call_operand.vmem [shape: f32[2,8], index: 2, kind: output, shape index: {1}]  }
   0x1   :  { %s832_s11 = smov 0   ;;  %s834_s12 = smov 0  }
   0x2   :  { %s836_s13 = smov 0  }
   0x3 LB: > { %s28_s14 = sadd.s32 1, %s801_s12  ;;  %s670_s15 = sadd.s32 4294967295, %s805_s13   ;;  %s805_s13 = sphi %s836_s13, %s9_s13   ;;  %s801_s12 = sphi %s834_s12, %s1038_s12   ;;  %s797_s11 = sphi %s832_s11, %s1037_s11   ;;  %s793_s10 = sphi %s830_s10, %s1036_s10   ;;  %s789_s9 = sphi %s828_s9, %s1035_s9  }
   0x4   : > { %p30_p0 = scmp.ge.s32.totalorder %s28_s14, 2  ;;  %s33_s16 = ssub.s32 0, %s801_s12 }
   0x5   : > { %s672_s17 = smin.u32 %s801_s12, %s33_s16  ;;  %p57_p1 = scmp.ne.s32.totalorder %s793_s10, %s789_s9 }
   0x6   : > { %s1040_s14 = smov (%p30_p0, %s28_s14), 0  ;;  %s35_s18 = sshrl.u32 %s672_s17, 3 }
   0x7   : > { %s39_s19 = ssub.s32 0, %s1040_s14  ;;  %p58_p2 = scmp.eq.s32.totalorder %s670_s15, 1 }
   0x8   : > { %s673_s20 = smin.u32 %s39_s19, %s1040_s14  ;;  %s47_s24 = sadd.s32 1, %s793_s10 }
   0x9   : > { %s41_s21 = sshrl.u32 %s673_s20, 3  ;;  %p865_p3 = por %p58_p2, %p57_p1 }
   0xa   : > { %s44_s23 = ssub.s32 %s35_s18, %s41_s21  ;;  %p675_p5 = scmp.ge.s32.totalorder %s805_s13, 2 }
   0xb   : > { %p45_p4 = scmp.eq.s32.totalorder %s44_s23, 0  ;;  %s82_s26 = sand.u32 (!%p675_p5), 1, %s805_s13  }
   0xc   : > { %80 = sbr.rel (%p675_p5) target bundleno = 20 (0x14), region = 16  ;;  %s701_s27 = sshll.u32 (!%p675_p5), %s801_s12, 4 }
   0xd   : > { %s871_s25 = scalar_select %p45_p4, %s793_s10, %s47_s24  }
   0xe   : > { %s676_s28 = sshll.u32 (!%p675_p5), %s82_s26, 4  ;;  %s90_s3 = scalar_lea.vmem (!%p675_p5), %s1027_s0, %s701_s27 }
   0xf   : > { %s84_s4 = scalar_lea.vmem (!%p675_p5), [#allocation0], %s676_s28 }
  0x11   : > { %v121_v0 = vld [vmem:[%s90_s3] sm:$0xff]  ;;  %v123_v1 = vld [vmem:[%s90_s3 + $0x8] sm:$0xff] }
  0x12   : > { %122 = vst [vmem:[%s84_s4] sm:$0xff] %v121_v0 }
  0x13   : > { %124 = vst [vmem:[%s84_s4 + $0x8] sm:$0xff] %v123_v1 }
  0x14 PF: > { %p679_p6 = scmp.ge.s32.totalorder %s805_s13, 1  ;;  %p129_p7 = scmp.lt.s32.totalorder %s805_s13, 3 }
  0x16   : > { %p130_p8 = pnand %p679_p6, %p129_p7 }
  0x18   : > { %133 = sbr.rel (%p130_p8) target bundleno = 343 (0x157), region = 54 }
  0x1d   : > { %s136_s5 = sand.u32 1, %s670_s15   ;;  %s150_s6 = sand.u32 1, %s789_s9   ;;  %v811_v4 = vmov 0.0  }
  0x1e   : > { %s680_s7 = sshll.u32 %s136_s5, 4  ;;  %s884_s8 = sshll.u32 %s150_s6, 1 }
  0x1f   : > { %s161_s16 = sand.u32 7, %s797_s11   ;;  %s138_s17 = scalar_lea.vmem [#allocation0], %s680_s7 }
  0x20   : > { %v163_v2 = vld [vmem:[%s138_s17] sm:$0xff]  ;;  %v683_v3 = vld [vmem:[%s138_s17 + $0x8] sm:$0xff]  ;;  %s887_s18 = scalar_lea.vmem [#allocation1], %s680_s7  ;;  %s891_s19 = scalar_lea.vmem [#allocation2], %s161_s16 }
  0x21   : > { %164 = vst [vmem:[%s887_s18] sm:$0xff] %v163_v2  ;;  %s152_s9 = scalar_lea.vmem [#allocation3], %s884_s8  ;;  %s895_s15 = smov 0  }
  0x22   : > { %684 = vst [vmem:[%s887_s18 + $0x8] sm:$0xff] %v683_v3 }
  0x23   : > { %169 = vst [vmem:[%s891_s19] sm:$0x1] %v811_v4 }
  0x24 LB: >> { %v177_v5 = vlaneseq  ;;  %v905_v8 = vstv %s809_s15  ;;  %s219_s20 = scalar_lea.vmem %s887_s18, %s809_s15 [#allocation1]  ;;  %s378_s21 = scalar_lea.vmem [#allocation4], %s809_s15  ;;  %s809_s15 = sphi %s895_s15, %s175_s15  }
  0x25   : >> { %s395_s23 = smov [#allocation4] }
  0x26   : >> { %v902_v7 = vshrl.u32 %v177_v5, 7 }
  0x28   : >> { %v176_v6 = vld [vmem:[%s887_s18] sm:$0xff]  ;;  %vm181_vm0 = vcmp.gt.s32.totalorder %v902_v7, %v905_v8  ;;  %v188_v10 = vadd.s32 8, %v902_v7  ;;  %v315_v7 = vmov %v902_v7 }
  0x29   : >> { %v685_v9 = vld [vmem:[%s887_s18 + $0x8] sm:$0xff]  ;;  %v182_v11 = vsel %vm181_vm0, %v176_v6, 0.0  ;;  %v918_v26 = vld [vmem:[%s219_s20] ss:$0 sm:$0xff]  ;;  %s312_s18 = smov %s887_s18 }
  0x2a   : >> { %v183_v12 = vmul.f32 %v182_v11, %v182_v11  ;;  %vm190_vm1 = vcmp.gt.s32.totalorder %v188_v10, %v905_v8  ;;  %v221_v29 = vand.u32 2147483647, %v918_v26  ;;  %vm290_vm11 = vcmp.lt.f32.partialorder %v918_v26, 0.0 }
  0x2b   : >> { %v193_v13 = vsel %vm190_vm1, %v685_v9, 0.0  ;;  %v347_v11 = vadd.s32 8, %v315_v7 }
  0x2c   : >> { %v194_v14 = vmul.f32 %v193_v13, %v193_v13  ;;  %v222_v33 = vmax.f32 %v221_v29, 0.0 }
  0x2d   : >> { %vm349_vm15 = vcmp.gt.s32.totalorder %v347_v11, %v905_v8 }
  0x2e   : >> { %v195_v15 = vadd.f32 %v194_v14, %v183_v12 }
  0x30   : >> { %v196_v16 = vrot.slane %v195_v15, 4 }
  0x32   : >> { %v197_v17 = vadd.f32 %v196_v16, %v195_v15 }
  0x34   : >> { %v198_v18 = vrot.slane %v197_v17, 2 }
  0x36   : >> { %v199_v19 = vadd.f32 %v198_v18, %v197_v17 }
  0x38   : >> { %v200_v20 = vrot.slane %v199_v19, 1 }
  0x3a   : >> { %v912_v21 = vadd.f32 %v200_v20, %v199_v19 }
  0x3c   : >> { %753 = vrsqrt.f32 %v912_v21  ;;  %vm209_vm2 = vcmp.eq.f32.partialorder %v912_v21, inf  ;;  %v212_v30 = vand.u32 2147483648, %v912_v21  ;;  %vm211_vm3 = vcmp.eq.f32.partialorder %v912_v21, 0.0 }
  0x42   : >> { %v754_v22 = vpop.eup %753 }
  0x43   : >> { %v203_v23 = vmul.f32 %v754_v22, %v912_v21 }
  0x45   : >> { %v204_v24 = vmul.f32 %v754_v22, %v203_v23 }
  0x47   : >> { %v205_v25 = vmul.f32 0.5, %v204_v24 }
  0x49   : >> { %v206_v27 = vsub.f32 1.5, %v205_v25 }
  0x4b   : >> { %v207_v28 = vmul.f32 %v754_v22, %v206_v27 }
  0x4d   : >> { %v208_v31 = vmul.f32 %v207_v28, %v912_v21  ;;  %v316_v28 = vld [vmem:[%s312_s18] sm:$0xff] }
  0x4f   : >> { %v210_v32 = vsel %vm209_vm2, %v912_v21, %v208_v31  ;;  %vm350_vm2 = vcmp.lt.s32.totalorder %v347_v11, 16  ;;  %v947_v31 = vand.u32 127, %v177_v5 }
  0x50   : >> { %v213_v34 = vsel %vm211_vm3, %v212_v30, %v210_v32 }
  0x51   : >> { %v223_v35 = vand.u32 2147483647, %v213_v34  ;;  %v687_v34 = vld [vmem:[%s312_s18 + $0x8] sm:$0xff]  ;;  %s394_s18 = smov %s887_s18 }
  0x53   : >> { %v224_v36 = vmax.f32 %v222_v33, %v223_v35 }
  0x55   : >> { %755 = vrcp.f32 %v224_v36  ;;  %v236_v39 = vand.u32 2147483648, %v224_v36  ;;  %vm230_vm4 = vweird.f32 %v224_v36  ;;  %v234_v41 = vand.u32 2147483647, %v224_v36 }
  0x56   : >> { %vm275_vm10 = vcmp.eq.f32.partialorder %v224_v36, 0.0 }
  0x57   : >> { %v237_v43 = vor.u32 1.1754944e-38, %v236_v39  ;;  %vm235_vm7 = vcmp.eq.f32.partialorder %v234_v41, 8.507059e+37 }
  0x5b   : >> { %v756_v37 = vpop.eup %755 }
  0x5c   : >> { %v226_v38 = vmul.f32 %v756_v37, %v224_v36  ;;  %vm231_vm5 = vweird.f32 %v756_v37 }
  0x5d   : >> { %vm232_vm6 = vmor %vm230_vm4, %vm231_vm5  ;;  %vm319_vm5 = vcmp.gt.s32.totalorder %v315_v7, %v905_v8  ;;  %v398_v7 = vmov %v902_v7 }
  0x5e   : >> { %v227_v40 = vsub.f32 1.0, %v226_v38  ;;  %v403_v21 = vadd.s32 8, %v398_v7  ;;  %v422_v7 = vmov %v902_v7 }
  0x60   : >> { %v228_v42 = vmul.f32 %v756_v37, %v227_v40 }
  0x62   : >> { %v229_v44 = vadd.f32 %v756_v37, %v228_v42 }
  0x64   : >> { %v233_v45 = vsel %vm232_vm6, %v756_v37, %v229_v44 }
  0x65   : >> { %v238_v46 = vsel %vm235_vm7, %v237_v43, %v233_v45 }
  0x66   : >> { %v239_v47 = vmul.f32 %v238_v46, %v221_v29  ;;  %v255_v48 = vmul.f32 0.0, %v238_v46  ;;  %v272_v49 = vmul.f32 %v238_v46, %v223_v35  ;;  %v320_v35 = vsel %vm319_vm5, %v316_v28, 0.0 }
  0x68   : >> { %v240_v50 = vmul.f32 %v239_v47, %v239_v47  ;;  %v256_v51 = vmul.f32 %v255_v48, %v255_v48  ;;  %v273_v52 = vmul.f32 %v272_v49, %v272_v49  ;;  %v391_v48 = vld [vmem:[%s891_s19] ss:$0 sm:$0xff] }
  0x6a   : >> { %v257_v53 = vadd.f32 %v256_v51, %v240_v50 }
  0x6c   : >> { %v274_v54 = vadd.f32 %v273_v52, %v257_v53  ;;  %v812_v53 = vmov 1.0  }
  0x6e   : >> { %757 = vrsqrt.f32 %v274_v54  ;;  %vm283_vm8 = vcmp.eq.f32.partialorder %v274_v54, inf  ;;  %v286_v61 = vand.u32 2147483648, %v274_v54  ;;  %vm285_vm9 = vcmp.eq.f32.partialorder %v274_v54, 0.0 }
  0x74   : >> { %v758_v55 = vpop.eup %757 }
  0x75   : >> { %v277_v56 = vmul.f32 %v758_v55, %v274_v54 }
  0x77   : >> { %v278_v57 = vmul.f32 %v758_v55, %v277_v56 }
  0x79   : >> { %v279_v58 = vmul.f32 0.5, %v278_v57 }
  0x7b   : >> { %v280_v59 = vsub.f32 1.5, %v279_v58 }
  0x7d   : >> { %v281_v60 = vmul.f32 %v758_v55, %v280_v59  ;;  %v689_v55 = vld [vmem:[%s394_s18 + $0x8] sm:$0xff] }
  0x7f   : >> { %v282_v62 = vmul.f32 %v281_v60, %v274_v54 }
  0x81   : >> { %v284_v63 = vsel %vm283_vm8, %v274_v54, %v282_v62  ;;  %vm351_vm8 = vmand %vm349_vm15, %vm350_vm2  ;;  %v401_v54 = vld [vmem:[%s394_s18] sm:$0xff]  ;;  %s418_s18 = smov %s394_s18 }
  0x82   : >> { %v287_v0 = vsel %vm285_vm9, %v286_v61, %v284_v63  ;;  %vm955_vm9 = vcmp.eq.s32.totalorder %v947_v31, %v905_v8  ;;  %v352_v39 = vsel %vm351_vm8, %v687_v34, 0.0  ;;  %s464_s24 = scalar_lea.vmem %s418_s18, %s809_s15  ;;  %s175_s15 = sadd.s32 1, %s809_s15  }
  0x83   : >> { %v288_v1 = vmul.f32 %v287_v0, %v224_v36  ;;  %p172_p9 = scmp.ge.s32.totalorder %s175_s15, 8  }
  0x84   : > { %s702_s26 = sshll.u32 (%p172_p9), %s797_s11, 4 }
  0x85   : >> { %v289_v2 = vsel %vm275_vm10, 0.0, %v288_v1  ;;  %vm439_vm10 = vcmp.ge.s32.totalorder %v422_v7, %v905_v8  ;;  %s491_s29 = scalar_lea.vmem (%p172_p9), %s1028_s1, %s702_s26 }
  0x86   : >> { %v291_v3 = vxor.u32 2147483648, %v289_v2 }
  0x88   : >> { %v292_v4 = vsel %vm290_vm11, %v289_v2, %v291_v3  ;;  %v443_v3 = vadd.s32 8, %v422_v7 }
  0x89   : >> { %v932_v6 = vsel %vm211_vm3, %v918_v26, %v292_v4  ;;  %759 = vrcp.f32 %v292_v4  ;;  %v305_v13 = vand.u32 2147483648, %v292_v4  ;;  %vm299_vm12 = vweird.f32 %v292_v4 }
  0x8a   : >> { %v311_v9 = vsub.f32 %v918_v26, %v932_v6  ;;  %v303_v16 = vand.u32 2147483647, %v292_v4  ;;  %v293_v25 = vsub.f32 %v292_v4, %v918_v26  ;;  %vm460_vm11 = vcmp.ge.s32.totalorder %v443_v3, %v905_v8 }
  0x8b   : >> { %v306_v24 = vor.u32 1.1754944e-38, %v305_v13  ;;  %v691_v13 = vld [vmem:[%s418_s18 + $0x8] sm:$0xff] }
  0x8c   : >> { %761 = vrcp.f32 %v311_v9  ;;  %vm326_vm14 = vweird.f32 %v311_v9  ;;  %v332_v18 = vand.u32 2147483648, %v311_v9  ;;  %v330_v22 = vand.u32 2147483647, %v311_v9 }
  0x8d   : >> { %vm304_vm4 = vcmp.eq.f32.partialorder %v303_v16, 8.507059e+37 }
  0x8e   : >> { %v333_v30 = vor.u32 1.1754944e-38, %v332_v18  ;;  %vm331_vm7 = vcmp.eq.f32.partialorder %v330_v22, 8.507059e+37 }
  0x8f   : >> { %v760_v10 = vpop.eup %759 }
  0x90   : >> { %v295_v12 = vmul.f32 %v760_v10, %v292_v4  ;;  %vm300_vm13 = vweird.f32 %v760_v10 }
  0x91   : >> { %vm939_vm1 = vmor %vm299_vm12, %vm300_vm13  ;;  %vm431_vm12 = vcmp.gt.s32.totalorder %v947_v31, %v905_v8 }
  0x92   : >> { %v762_v14 = vpop.eup %761  ;;  %v296_v15 = vsub.f32 1.0, %v295_v12  ;;  %vm440_vm13 = vmand %vm955_vm9, %vm439_vm10 }
  0x93   : >> { %v322_v17 = vmul.f32 %v762_v14, %v311_v9  ;;  %vm327_vm0 = vweird.f32 %v762_v14  ;;  %v429_v9 = vld [vmem:[%s418_s18] sm:$0xff] }
  0x94   : >> { %v297_v19 = vmul.f32 %v760_v10, %v296_v15  ;;  %vm328_vm6 = vmor %vm326_vm14, %vm327_vm0 }
  0x95   : >> { %v323_v20 = vsub.f32 1.0, %v322_v17  ;;  %vm461_vm14 = vmand %vm955_vm9, %vm460_vm11 }
  0x96   : >> { %v298_v27 = vadd.f32 %v760_v10, %v297_v19 }
  0x97   : >> { %v324_v29 = vmul.f32 %v762_v14, %v323_v20 }
  0x98   : >> { %v302_v32 = vsel %vm939_vm1, %v760_v10, %v298_v27 }
  0x99   : >> { %v325_v33 = vadd.f32 %v762_v14, %v324_v29  ;;  %v307_v26 = vsel %vm304_vm4, %v306_v24, %v302_v32 }
  0x9a   : >> { %v308_v36 = vmul.f32 %v307_v26, %v293_v25 }
  0x9b   : >> { %v329_v37 = vsel %vm328_vm6, %v762_v14, %v325_v33 }
  0x9c   : >> { %v334_v38 = vsel %vm331_vm7, %v333_v30, %v329_v37  ;;  %v310_v40 = vsel %vm211_vm3, 0.0, %v308_v36 }
  0x9d   : >> { %v335_v41 = vmul.f32 %v334_v38, %v320_v35  ;;  %v384_v42 = vsel %vm955_vm9, %v310_v40, 0.0  ;;  %v367_v44 = vmul.f32 %v352_v39, %v334_v38 }
  0x9e   : >> { %385 = vadd.xlane.f32.xlu1 %v384_v42 }
  0x9f   : >> { %v336_v43 = vsel %vm211_vm3, 0.0, %v335_v41  ;;  %v368_v46 = vsel %vm211_vm3, 0.0, %v367_v44  ;;  %vm409_vm3 = vcmp.lt.s32.totalorder %v403_v21, 16 }
  0xa0   : >> { %v341_v45 = vsel %vm955_vm9, %v336_v43, 0.0  ;;  %v373_v47 = vsel %vm955_vm9, %v368_v46, 0.0 }
  0xa1   : >> { %342 = vadd.xlane.f32.xlu0 %v341_v45 }
  0xa9   : >> { %374 = vadd.xlane.f32.xlu0 %v373_v47 }
 0x111   : >> { %v386_v50 = vpop.xlane.xlu1 %385 }
 0x112   : >> { %v392_v51 = vsel %vm955_vm9, %v386_v50, %v391_v48 }
 0x113   : >> { %393 = vst [vmem:[%s891_s19] sm:$0x1] %v392_v51 }
 0x114   : >> { %v343_v49 = vpop.xlane.xlu0 %342 }
 0x115   : >> { %344 = vst [vmem:[#allocation4] sm:$0xff] %v343_v49 }
 0x11a   : > { %v474_v23 = vld [vmem:[#allocation2] sm:$0x3] (%p172_p9) }
 0x11b   : > { %477 = vst [vmem:[%s152_s9] sm:$0x3] (%p172_p9), %v474_v23 }
 0x11c   : >> { %v375_v52 = vpop.xlane.xlu0 %374 }
 0x11d   : >> { %377 = vst [vmem:[#allocation4 + $0x8] sm:$0xff] %v375_v52 }
 0x11e   : >> { %379 = vst [vmem:[%s378_s21] sm:$0x1] %v812_v53 }
 0x125   : >> { %v400_v56 = vld [vmem:[%s395_s23] sm:$0xff]  ;;  %v688_v57 = vld [vmem:[%s395_s23 + $0x8] sm:$0xff]  ;;  %s419_s23 = smov %s395_s23 }
 0x126   : >> { %v402_v58 = vmul.f32 %v401_v54, %v400_v56  ;;  %v408_v59 = vmul.f32 %v689_v55, %v688_v57  ;;  %v427_v11 = vld [vmem:[%s419_s23] sm:$0xff]  ;;  %v690_v12 = vld [vmem:[%s419_s23 + $0x8] sm:$0xff] }
 0x128   : >> { %v410_v60 = vsel %vm409_vm3, %v408_v59, 0.0 }
 0x129   : >> { %v411_v61 = vadd.f32 %v410_v60, %v402_v58 }
 0x12b   : >> { %v412_v62 = vrot.slane %v411_v61, 4 }
 0x12d   : >> { %v413_v63 = vadd.f32 %v412_v62, %v411_v61 }
 0x12f   : >> { %v414_v0 = vrot.slane %v413_v63, 2 }
 0x131   : >> { %v415_v1 = vadd.f32 %v414_v0, %v413_v63 }
 0x133   : >> { %v416_v2 = vrot.slane %v415_v1, 1 }
 0x135   : >> { %v417_v4 = vadd.f32 %v416_v2, %v415_v1 }
 0x137   : >> { %v423_v10 = vmul.f32 %v417_v4, %v386_v50 }
 0x139   : >> { %v428_v14 = vmul.f32 %v427_v11, %v423_v10  ;;  %v448_v15 = vmul.f32 %v690_v12, %v423_v10 }
 0x13b   : >> { %v432_v16 = vsub.f32 %v429_v9, %v428_v14  ;;  %v453_v7 = vsub.f32 %v691_v13, %v448_v15 }
 0x13d   : >> { %v433_v17 = vsel %vm431_vm12, %v432_v16, %v429_v9  ;;  %v454_v18 = vsel %vm431_vm12, %v453_v7, %v691_v13 }
 0x13e   : >> { %v441_v19 = vsel %vm440_vm13, %v427_v11, %v433_v17  ;;  %v462_v20 = vsel %vm461_vm14, %v690_v12, %v454_v18 }
 0x13f   : >> { %442 = vst [vmem:[%s418_s18] sm:$0xff] %v441_v19 }
 0x140   : >> { %692 = vst [vmem:[%s418_s18 + $0x8] sm:$0xff] %v462_v20 }
 0x145   : > { %174 = sbr.rel (!%p172_p9) target bundleno = 36 (0x24), region = 184 }
 0x147   : >> { %v465_v22 = vld [vmem:[%s464_s24] ss:$0 sm:$0xff] }
 0x148   : >> { %v470_v8 = vsel %vm955_vm9, %v932_v6, %v465_v22 }
 0x149   : >> { %471 = vst [vmem:[%s464_s24] sm:$0x1] %v470_v8 }
 0x14a   : > { %p532_p10 = scmp.lt.s32.totalorder (%p865_p3), %s797_s11, 0  ;;  %s533_s30 = ssub.s32 (%p865_p3), 0, %s797_s11  ;;  %v556_v6 = vld [vmem:[%s152_s9] sm:$0x3] (%p865_p3) }
 0x14b   : > { %s697_s3 = smin.u32 (%p865_p3), %s797_s11, %s533_s30 }
 0x14c   : > { %s535_s4 = sshrl.u32 (%p865_p3), %s697_s3, 3 }
 0x14d   : > { %s536_s5 = ssub.s32 (%p865_p3), 0, %s535_s4 }
 0x14e   : > { %531 = sbr.rel (!%p865_p3) target bundleno = 343 (0x157), region = 99 }
 0x150   : > { %v522_v24 = vld [vmem:[%s887_s18] sm:$0xff]  ;;  %v524_v25 = vld [vmem:[%s887_s18 + $0x8] sm:$0xff] }
 0x151   : > { %523 = vst [vmem:[%s491_s29] sm:$0xff] %v522_v24 }
 0x152   : > { %525 = vst [vmem:[%s491_s29 + $0x8] sm:$0xff] %v524_v25 }
 0x153   : > { %s1042_s5 = smov (!%p532_p10, %s536_s5), %s535_s4 }
 0x154   : > { %s698_s6 = sshll.u32 %s1042_s5, 1 }
 0x155   : > { %s539_s17 = scalar_lea.vmem %s1029_s2, %s698_s6 }
 0x156   : > { %557 = vst [vmem:[%s539_s17] sm:$0x3] %v556_v6 }
 0x157 PF: > { %s9_s13 = sadd.s32 1, %s805_s13   ;;  %s1035_s9 = smov %s793_s10 }
 0x158   : > { %p6_p11 = scmp.ge.s32.totalorder %s9_s13, 4   ;;  %s1036_s10 = smov %s871_s25 }
 0x159   : > { %s1037_s11 = smov %s801_s12  ;;  %s1038_s12 = smov %s1040_s14 }
 0x15a   :  { %8 = sbr.rel (!%p6_p11) target bundleno = 3 (0x3), region = 195 }

// kernel: custom-call.49
= control target key start
LH: loop header
LB: loop body
LE: loop exit
PB: predicated region body
PF: predicated region fallthrough
CT: control target
= control target key end

     0   :  { %s292_s6 = smov 0   ;;  %s333_s0 = inlined_call_operand.vmem [shape: f32[2,8,8], index: 0, kind: input, shape index: {}]   ;;  %s334_s1 = inlined_call_operand.vmem [shape: f32[2,8,8], index: 1, kind: output, shape index: {}]  }
   0x1 LB: > { %s247_s7 = sadd.s32 4294967295, %s280_s6   ;;  %p249_p0 = scmp.ge.s32.totalorder %s280_s6, 2  ;;  %s280_s6 = sphi %s292_s6, %s7_s6  }
   0x2   : > { %s23_s8 = sand.u32 (!%p249_p0), 1, %s280_s6   ;;  %s251_s9 = sshll.u32 (!%p249_p0), %s280_s6, 3 }
   0x3   : > { %21 = sbr.rel (%p249_p0) target bundleno = 10 (0xa), region = 16  ;;  %s250_s10 = sshll.u32 (!%p249_p0), %s23_s8, 3 }
   0x4   : > { %s27_s13 = scalar_lea.vmem (!%p249_p0), %s333_s0, %s251_s9  ;;  %s25_s14 = scalar_lea.vmem (!%p249_p0), [#allocation0], %s250_s10 }
   0x8   : > { %v56_v0 = vld [vmem:[%s27_s13] sm:$0xff] }
   0x9   : > { %57 = vst [vmem:[%s25_s14] sm:$0xff] %v56_v0 }
   0xa PF: > { %p252_p1 = scmp.ge.s32.totalorder %s280_s6, 1  ;;  %p62_p2 = scmp.lt.s32.totalorder %s280_s6, 3 }
   0xc   : > { %p63_p3 = pnand %p252_p1, %p62_p2 }
   0xd   : > { %s69_s15 = sand.u32 (!%p63_p3), 1, %s247_s7   ;;  %s263_s18 = sshll.u32 (!%p63_p3), %s247_s7, 3 }
   0xe   : > { %66 = sbr.rel (%p63_p3) target bundleno = 860 (0x35c), region = 54  ;;  %s253_s16 = sshll.u32 (!%p63_p3), %s69_s15, 3 }
   0xf   : > { %s308_s17 = scalar_lea.vmem (!%p63_p3), [#allocation0], %s253_s16  ;;  %s175_s21 = scalar_lea.vmem (!%p63_p3), %s334_s1, %s263_s18 }
  0x13   : > { %v80_v1 = vlaneseq  ;;  %vm94_vm0 = vcmask 64512   ;;  %v86_v4 = vld [vmem:[%s308_s17] sm:$0xff] }
  0x14   : > { %v255_v5 = vld [vmem:[%s308_s17 + $0x1] ss:$0 sm:$0xff]  ;;  %v256_v10 = vld [vmem:[%s308_s17 + $0x2] ss:$0 sm:$0xff]  ;;  %v257_v15 = vld [vmem:[%s308_s17 + $0x3] ss:$0 sm:$0xff] }
  0x15   : > { %v81_v2 = vand.u32 127, %v80_v1  ;;  %v83_v3 = vshrl.u32 %v80_v1, 7  ;;  %v95_v6 = vsel %vm94_vm0, %v255_v5, 0.0  ;;  %v106_v11 = vsel %vm94_vm0, %v256_v10, 0.0  ;;  %v258_v20 = vld [vmem:[%s308_s17 + $0x4] ss:$0 sm:$0xff] }
  0x16   : > { %v117_v16 = vsel %vm94_vm0, %v257_v15, 0.0  ;;  %v128_v21 = vsel %vm94_vm0, %v258_v20, 0.0  ;;  %v259_v25 = vld [vmem:[%s308_s17 + $0x5] ss:$0 sm:$0xff]  ;;  %v260_v30 = vld [vmem:[%s308_s17 + $0x6] ss:$0 sm:$0xff] }
  0x17   : > { %vm85_vm1 = vcmp.eq.s32.totalorder %v81_v2, %v83_v3  ;;  %vm89_vm2 = vcmp.eq.s32.totalorder %v81_v2, 0  ;;  %vm98_vm3 = vcmp.eq.s32.totalorder %v81_v2, 1  ;;  %vm109_vm4 = vcmp.eq.s32.totalorder %v81_v2, 2  ;;  %v261_v35 = vld [vmem:[%s308_s17 + $0x7] ss:$0 sm:$0xff] }
  0x18   : > { %v90_v7 = vsel %vm89_vm2, %v86_v4, 1.0  ;;  %vm120_vm5 = vcmp.eq.s32.totalorder %v81_v2, 3  ;;  %vm131_vm6 = vcmp.eq.s32.totalorder %v81_v2, 4  ;;  %v139_v26 = vsel %vm94_vm0, %v259_v25, 0.0 }
  0x19   : > { %v91_v8 = vsel %vm85_vm1, %v90_v7, 0.0  ;;  %vm142_vm7 = vcmp.eq.s32.totalorder %v81_v2, 5  ;;  %v150_v31 = vsel %vm94_vm0, %v260_v30, 0.0  ;;  %vm153_vm8 = vcmp.eq.s32.totalorder %v81_v2, 6 }
  0x1a   : > { %v99_v9 = vmul.f32 %v95_v6, %v91_v8  ;;  %v161_v36 = vsel %vm94_vm0, %v261_v35, 0.0  ;;  %vm164_vm9 = vcmp.eq.s32.totalorder %v81_v2, 7 }
  0x1c   : > { %100 = vadd.xlane.f32.xlu0 %v99_v9 }
  0x8f   : > { %v101_v12 = vpop.xlane.xlu0 %100 }
  0x90   : > { %v102_v13 = vsel %vm98_vm3, %v101_v12, %v91_v8 }
  0x91   : > { %v110_v14 = vmul.f32 %v106_v11, %v102_v13 }
  0x93   : > { %111 = vadd.xlane.f32.xlu0 %v110_v14 }
 0x106   : > { %v112_v17 = vpop.xlane.xlu0 %111 }
 0x107   : > { %v113_v18 = vsel %vm109_vm4, %v112_v17, %v102_v13 }
 0x108   : > { %v121_v19 = vmul.f32 %v117_v16, %v113_v18 }
 0x10a   : > { %122 = vadd.xlane.f32.xlu1 %v121_v19 }
 0x17d   : > { %v123_v22 = vpop.xlane.xlu1 %122 }
 0x17e   : > { %v124_v23 = vsel %vm120_vm5, %v123_v22, %v113_v18 }
 0x17f   : > { %v132_v24 = vmul.f32 %v128_v21, %v124_v23 }
 0x181   : > { %133 = vadd.xlane.f32.xlu1 %v132_v24 }
 0x1f4   : > { %v134_v27 = vpop.xlane.xlu1 %133 }
 0x1f5   : > { %v135_v28 = vsel %vm131_vm6, %v134_v27, %v124_v23 }
 0x1f6   : > { %v143_v29 = vmul.f32 %v139_v26, %v135_v28 }
 0x1f8   : > { %144 = vadd.xlane.f32.xlu2 %v143_v29 }
 0x26b   : > { %v145_v32 = vpop.xlane.xlu2 %144 }
 0x26c   : > { %v146_v33 = vsel %vm142_vm7, %v145_v32, %v135_v28 }
 0x26d   : > { %v154_v34 = vmul.f32 %v150_v31, %v146_v33 }
 0x26f   : > { %155 = vadd.xlane.f32.xlu2 %v154_v34 }
 0x2e2   : > { %v156_v37 = vpop.xlane.xlu2 %155 }
 0x2e3   : > { %v157_v38 = vsel %vm153_vm8, %v156_v37, %v146_v33 }
 0x2e4   : > { %v165_v39 = vmul.f32 %v161_v36, %v157_v38 }
 0x2e6   : > { %166 = vadd.xlane.f32.xlu0 %v165_v39 }
 0x359   : > { %v167_v40 = vpop.xlane.xlu0 %166 }
 0x35a   : > { %v168_v41 = vsel %vm164_vm9, %v167_v40, %v157_v38 }
 0x35b   : > { %205 = vst [vmem:[%s175_s21] sm:$0xff] %v168_v41 }
 0x35c PF: > { %s7_s6 = sadd.s32 1, %s280_s6  }
 0x35d   : > { %p4_p4 = scmp.ge.s32.totalorder %s7_s6, 4  }
 0x35f   :  { %6 = sbr.rel (!%p4_p4) target bundleno = 1 (0x1), region = 125 }

// kernel: custom-call.41
= control target key start
LH: loop header
LB: loop body
LE: loop exit
PB: predicated region body
PF: predicated region fallthrough
CT: control target
= control target key end

     0   :  { %s6_s0 = inlined_call_operand.hbm [shape: pred[2], index: 0, kind: output, shape index: {}]  }

// kernel: custom-call.46
= control target key start
LH: loop header
LB: loop body
LE: loop exit
PB: predicated region body
PF: predicated region fallthrough
CT: control target
= control target key end

     0   :  { %s543_s6 = smov 0   ;;  %s545_s7 = smov 0   ;;  %s623_s0 = inlined_call_operand.vmem [shape: f32[2,8,8], index: 0, kind: input, shape index: {}]   ;;  %s624_s1 = inlined_call_operand.vmem [shape: f32[2,8,8], index: 1, kind: output, shape index: {}]  }
   0x1   :  { %s547_s8 = smov 0  }
   0x2 LB: > { %s441_s9 = sadd.s32 4294967295, %s530_s8   ;;  %s26_s10 = sadd.s32 1, %s526_s7  ;;  %s530_s8 = sphi %s547_s8, %s7_s8   ;;  %s526_s7 = sphi %s545_s7, %s626_s7   ;;  %s522_s6 = sphi %s543_s6, %s625_s6  }
   0x3   : > { %p28_p0 = scmp.ge.s32.totalorder %s26_s10, 2  ;;  %p443_p1 = scmp.ge.s32.totalorder %s530_s8, 2 }
   0x4   : > { %s42_s11 = sand.u32 (!%p443_p1), 1, %s530_s8   ;;  %s445_s12 = sshll.u32 (!%p443_p1), %s526_s7, 3 }
   0x5   : > { %s628_s10 = smov (%p28_p0, %s26_s10), 0  ;;  %40 = sbr.rel (%p443_p1) target bundleno = 12 (0xc), region = 16 }
   0x6   : > { %s444_s13 = sshll.u32 (!%p443_p1), %s42_s11, 3  ;;  %s48_s16 = scalar_lea.vmem (!%p443_p1), %s623_s0, %s445_s12 }
   0x7   : > { %s44_s17 = scalar_lea.vmem (!%p443_p1), [#allocation0], %s444_s13 }
   0xa   : > { %v77_v0 = vld [vmem:[%s48_s16] sm:$0xff] }
   0xb   : > { %78 = vst [vmem:[%s44_s17] sm:$0xff] %v77_v0 }
   0xc PF: > { %p446_p2 = scmp.ge.s32.totalorder %s530_s8, 1  ;;  %p83_p3 = scmp.lt.s32.totalorder %s530_s8, 3 }
   0xe   : > { %p84_p4 = pnand %p446_p2, %p83_p3 }
   0xf   : > { %s90_s18 = sand.u32 (!%p84_p4), 1, %s441_s9   ;;  %s464_s22 = sshll.u32 (!%p84_p4), %s522_s6, 3 }
  0x10   : > { %87 = sbr.rel (%p84_p4) target bundleno = 1230 (0x4ce), region = 54  ;;  %s447_s19 = sshll.u32 (!%p84_p4), %s90_s18, 3 }
  0x11   : > { %s570_s20 = scalar_lea.vmem (!%p84_p4), [#allocation1], %s447_s19  ;;  %s574_s21 = scalar_lea.vmem (!%p84_p4), [#allocation0], %s447_s19 }
  0x12   : > { %s353_s25 = scalar_lea.vmem (!%p84_p4), %s624_s1, %s464_s22 }
  0x15   : > { %v532_v1 = vmov 0.0   ;;  %v104_v5 = vld [vmem:[%s574_s21] ss:$0 sm:$0xff]  ;;  %vm102_vm3 = vcmask 7168   ;;  %v450_v23 = vld [vmem:[%s574_s21 + $0x1] ss:$0 sm:$0xff] }
  0x16   : > { %101 = vst [vmem:[%s570_s20] sm:$0xff] %v532_v1  ;;  %v578_v13 = vld [vmem:[%s574_s21] sm:$0xff]  ;;  %vm129_vm5 = vcmask 15368   ;;  %vm155_vm6 = vcmask 1047553   ;;  %vm160_vm11 = vcmask 23568   ;;  %vm186_vm12 = vcmask 1047554  }
  0x17   : > { %vm156_vm9 = vmand %vm129_vm5, %vm155_vm6  ;;  %v452_v41 = vld [vmem:[%s574_s21 + $0x2] ss:$0 sm:$0xff]  ;;  %v454_v59 = vld [vmem:[%s574_s21 + $0x3] ss:$0 sm:$0xff] }
  0x18   : > { %vm187_vm15 = vmand %vm160_vm11, %vm186_vm12 }
  0x1d   : > { %v103_v2 = vld [vmem:[%s570_s20] ss:$0 sm:$0xff] }
  0x1e   : > { %v105_v3 = vmul.f32 %v103_v2, %v103_v2  ;;  %v121_v4 = vmul.f32 0.0, %v103_v2 }
  0x20   : > { %106 = vadd.xlane.f32.xlu0 %v105_v3 }
  0x28   : > { %122 = vadd.xlane.f32.xlu0 %v121_v4 }
  0x93   : > { %v107_v6 = vpop.xlane.xlu0 %106 }
  0x94   : > { %v108_v7 = vsub.f32 %v104_v5, %v107_v6 }
  0x96   : > { %492 = vrsqrt.f32 %v108_v7  ;;  %vm115_vm1 = vweird.f32 %v108_v7 }
  0x9b   : > { %v123_v12 = vpop.xlane.xlu0 %122 }
  0x9c   : > { %v493_v8 = vpop.eup %492  ;;  %v124_v15 = vsub.f32 %v578_v13, %v123_v12 }
  0x9d   : > { %v110_v9 = vmul.f32 %v493_v8, %v108_v7  ;;  %vm116_vm0 = vweird.f32 %v493_v8 }
  0x9e   : > { %vm117_vm2 = vmor %vm115_vm1, %vm116_vm0  ;;  %vm191_vm1 = vcmask 31768  }
  0x9f   : > { %v111_v10 = vmul.f32 %v493_v8, %v110_v9 }
  0xa1   : > { %v112_v11 = vmul.f32 0.5, %v111_v10 }
  0xa3   : > { %v113_v14 = vsub.f32 1.5, %v112_v11 }
  0xa5   : > { %v114_v16 = vmul.f32 %v493_v8, %v113_v14  ;;  %v456_v14 = vld [vmem:[%s574_s21 + $0x4] ss:$0 sm:$0xff] }
  0xa7   : > { %v118_v17 = vsel %vm117_vm2, %v493_v8, %v114_v16  ;;  %vm217_vm2 = vcmask 1047555  }
  0xa8   : > { %v125_v18 = vmul.f32 %v124_v15, %v118_v17  ;;  %vm218_vm5 = vmand %vm191_vm1, %vm217_vm2 }
  0xaa   : > { %v126_v19 = vsel %vm102_vm3, %v125_v18, 0.0 }
  0xab   : > { %128 = vst [vmem:[%s570_s20] sm:$0xff] %v126_v19 }
  0xb2   : > { %v449_v20 = vld [vmem:[%s570_s20 + $0x1] ss:$0 sm:$0xff] }
  0xb3   : > { %v134_v21 = vmul.f32 %v449_v20, %v449_v20  ;;  %v150_v22 = vmul.f32 %v449_v20, %v126_v19 }
  0xb5   : > { %135 = vadd.xlane.f32.xlu1 %v134_v21 }
  0xbd   : > { %151 = vadd.xlane.f32.xlu1 %v150_v22 }
 0x128   : > { %v136_v24 = vpop.xlane.xlu1 %135 }
 0x129   : > { %v137_v25 = vsub.f32 %v450_v23, %v136_v24 }
 0x12b   : > { %494 = vrsqrt.f32 %v137_v25  ;;  %vm144_vm7 = vweird.f32 %v137_v25 }
 0x130   : > { %v152_v31 = vpop.xlane.xlu1 %151 }
 0x131   : > { %v495_v26 = vpop.eup %494  ;;  %v153_v33 = vsub.f32 %v578_v13, %v152_v31 }
 0x132   : > { %v139_v27 = vmul.f32 %v495_v26, %v137_v25  ;;  %vm145_vm4 = vweird.f32 %v495_v26 }
 0x133   : > { %vm146_vm8 = vmor %vm144_vm7, %vm145_vm4  ;;  %vm222_vm7 = vcmask 39968  }
 0x134   : > { %v140_v28 = vmul.f32 %v495_v26, %v139_v27 }
 0x136   : > { %v141_v29 = vmul.f32 0.5, %v140_v28 }
 0x138   : > { %v142_v30 = vsub.f32 1.5, %v141_v29 }
 0x13a   : > { %v143_v32 = vmul.f32 %v495_v26, %v142_v30 }
 0x13c   : > { %v147_v34 = vsel %vm146_vm8, %v495_v26, %v143_v32  ;;  %vm248_vm8 = vcmask 1047556   ;;  %v458_v32 = vld [vmem:[%s574_s21 + $0x5] ss:$0 sm:$0xff] }
 0x13d   : > { %v154_v35 = vmul.f32 %v153_v33, %v147_v34  ;;  %vm249_vm11 = vmand %vm222_vm7, %vm248_vm8 }
 0x13f   : > { %v157_v36 = vsel %vm156_vm9, %v154_v35, 0.0 }
 0x140   : > { %v158_v37 = vadd.f32 %v157_v36, %v126_v19 }
 0x142   : > { %159 = vst [vmem:[%s570_s20] sm:$0xff] %v158_v37 }
 0x149   : > { %v451_v38 = vld [vmem:[%s570_s20 + $0x2] ss:$0 sm:$0xff] }
 0x14a   : > { %v165_v39 = vmul.f32 %v451_v38, %v451_v38  ;;  %v181_v40 = vmul.f32 %v451_v38, %v158_v37 }
 0x14c   : > { %166 = vadd.xlane.f32.xlu2 %v165_v39 }
 0x154   : > { %182 = vadd.xlane.f32.xlu2 %v181_v40 }
 0x1bf   : > { %v167_v42 = vpop.xlane.xlu2 %166 }
 0x1c0   : > { %v168_v43 = vsub.f32 %v452_v41, %v167_v42 }
 0x1c2   : > { %496 = vrsqrt.f32 %v168_v43  ;;  %vm175_vm13 = vweird.f32 %v168_v43 }
 0x1c7   : > { %v183_v49 = vpop.xlane.xlu2 %182 }
 0x1c8   : > { %v497_v44 = vpop.eup %496  ;;  %v184_v51 = vsub.f32 %v578_v13, %v183_v49 }
 0x1c9   : > { %v170_v45 = vmul.f32 %v497_v44, %v168_v43  ;;  %vm176_vm10 = vweird.f32 %v497_v44 }
 0x1ca   : > { %vm177_vm14 = vmor %vm175_vm13, %vm176_vm10  ;;  %vm253_vm13 = vcmask 48168  }
 0x1cb   : > { %v171_v46 = vmul.f32 %v497_v44, %v170_v45 }
 0x1cd   : > { %v172_v47 = vmul.f32 0.5, %v171_v46 }
 0x1cf   : > { %v173_v48 = vsub.f32 1.5, %v172_v47 }
 0x1d1   : > { %v174_v50 = vmul.f32 %v497_v44, %v173_v48 }
 0x1d3   : > { %v178_v52 = vsel %vm177_vm14, %v497_v44, %v174_v50  ;;  %vm279_vm14 = vcmask 1047557   ;;  %v460_v50 = vld [vmem:[%s574_s21 + $0x6] ss:$0 sm:$0xff] }
 0x1d4   : > { %v185_v53 = vmul.f32 %v184_v51, %v178_v52  ;;  %vm280_vm1 = vmand %vm253_vm13, %vm279_vm14 }
 0x1d6   : > { %v188_v54 = vsel %vm187_vm15, %v185_v53, 0.0 }
 0x1d7   : > { %v189_v55 = vadd.f32 %v188_v54, %v158_v37 }
 0x1d9   : > { %190 = vst [vmem:[%s570_s20] sm:$0xff] %v189_v55 }
 0x1e0   : > { %v453_v56 = vld [vmem:[%s570_s20 + $0x3] ss:$0 sm:$0xff] }
 0x1e1   : > { %v212_v57 = vmul.f32 %v453_v56, %v189_v55  ;;  %v196_v58 = vmul.f32 %v453_v56, %v453_v56 }
 0x1e3   : > { %213 = vadd.xlane.f32.xlu1 %v212_v57  ;;  %197 = vadd.xlane.f32.xlu0 %v196_v58 }
 0x256   : > { %v198_v60 = vpop.xlane.xlu0 %197  ;;  %v214_v2 = vpop.xlane.xlu1 %213 }
 0x257   : > { %v199_v61 = vsub.f32 %v454_v59, %v198_v60  ;;  %v215_v5 = vsub.f32 %v578_v13, %v214_v2 }
 0x259   : > { %498 = vrsqrt.f32 %v199_v61  ;;  %vm206_vm3 = vweird.f32 %v199_v61 }
 0x25f   : > { %v499_v62 = vpop.eup %498 }
 0x260   : > { %v201_v63 = vmul.f32 %v499_v62, %v199_v61  ;;  %vm207_vm0 = vweird.f32 %v499_v62 }
 0x261   : > { %vm208_vm4 = vmor %vm206_vm3, %vm207_vm0  ;;  %vm284_vm3 = vcmask 56368  }
 0x262   : > { %v202_v0 = vmul.f32 %v499_v62, %v201_v63 }
 0x264   : > { %v203_v1 = vmul.f32 0.5, %v202_v0 }
 0x266   : > { %v204_v3 = vsub.f32 1.5, %v203_v1 }
 0x268   : > { %v205_v4 = vmul.f32 %v499_v62, %v204_v3 }
 0x26a   : > { %v209_v6 = vsel %vm208_vm4, %v499_v62, %v205_v4  ;;  %vm310_vm4 = vcmask 1047558   ;;  %v462_v4 = vld [vmem:[%s574_s21 + $0x7] ss:$0 sm:$0xff] }
 0x26b   : > { %v216_v7 = vmul.f32 %v215_v5, %v209_v6  ;;  %vm311_vm7 = vmand %vm284_vm3, %vm310_vm4 }
 0x26d   : > { %v219_v8 = vsel %vm218_vm5, %v216_v7, 0.0 }
 0x26e   : > { %v220_v9 = vadd.f32 %v219_v8, %v189_v55 }
 0x270   : > { %221 = vst [vmem:[%s570_s20] sm:$0xff] %v220_v9 }
 0x277   : > { %v455_v10 = vld [vmem:[%s570_s20 + $0x4] ss:$0 sm:$0xff] }
 0x278   : > { %v243_v11 = vmul.f32 %v455_v10, %v220_v9  ;;  %v227_v12 = vmul.f32 %v455_v10, %v455_v10 }
 0x27a   : > { %244 = vadd.xlane.f32.xlu0 %v243_v11  ;;  %228 = vadd.xlane.f32.xlu2 %v227_v12 }
 0x2ed   : > { %v229_v15 = vpop.xlane.xlu2 %228  ;;  %v245_v21 = vpop.xlane.xlu0 %244 }
 0x2ee   : > { %v230_v16 = vsub.f32 %v456_v14, %v229_v15  ;;  %v246_v24 = vsub.f32 %v578_v13, %v245_v21 }
 0x2f0   : > { %500 = vrsqrt.f32 %v230_v16  ;;  %vm237_vm9 = vweird.f32 %v230_v16 }
 0x2f6   : > { %v501_v17 = vpop.eup %500 }
 0x2f7   : > { %v232_v18 = vmul.f32 %v501_v17, %v230_v16  ;;  %vm238_vm6 = vweird.f32 %v501_v17 }
 0x2f8   : > { %vm239_vm10 = vmor %vm237_vm9, %vm238_vm6  ;;  %vm315_vm9 = vcmask 64568  }
 0x2f9   : > { %v233_v19 = vmul.f32 %v501_v17, %v232_v18 }
 0x2fb   : > { %v234_v20 = vmul.f32 0.5, %v233_v19 }
 0x2fd   : > { %v235_v22 = vsub.f32 1.5, %v234_v20 }
 0x2ff   : > { %v236_v23 = vmul.f32 %v501_v17, %v235_v22 }
 0x301   : > { %v240_v25 = vsel %vm239_vm10, %v501_v17, %v236_v23  ;;  %vm341_vm10 = vcmask 1047559  }
 0x302   : > { %v247_v26 = vmul.f32 %v246_v24, %v240_v25  ;;  %vm342_vm13 = vmand %vm315_vm9, %vm341_vm10 }
 0x304   : > { %v250_v27 = vsel %vm249_vm11, %v247_v26, 0.0 }
 0x305   : > { %v251_v28 = vadd.f32 %v250_v27, %v220_v9 }
 0x307   : > { %252 = vst [vmem:[%s570_s20] sm:$0xff] %v251_v28 }
 0x30e   : > { %v457_v29 = vld [vmem:[%s570_s20 + $0x5] ss:$0 sm:$0xff] }
 0x30f   : > { %v274_v30 = vmul.f32 %v457_v29, %v251_v28  ;;  %v258_v31 = vmul.f32 %v457_v29, %v457_v29 }
 0x311   : > { %275 = vadd.xlane.f32.xlu2 %v274_v30  ;;  %259 = vadd.xlane.f32.xlu1 %v258_v31 }
 0x384   : > { %v260_v33 = vpop.xlane.xlu1 %259  ;;  %v276_v39 = vpop.xlane.xlu2 %275 }
 0x385   : > { %v261_v34 = vsub.f32 %v458_v32, %v260_v33  ;;  %v277_v42 = vsub.f32 %v578_v13, %v276_v39 }
 0x387   : > { %502 = vrsqrt.f32 %v261_v34  ;;  %vm268_vm15 = vweird.f32 %v261_v34 }
 0x38d   : > { %v503_v35 = vpop.eup %502 }
 0x38e   : > { %v263_v36 = vmul.f32 %v503_v35, %v261_v34  ;;  %vm269_vm12 = vweird.f32 %v503_v35 }
 0x38f   : > { %vm270_vm0 = vmor %vm268_vm15, %vm269_vm12 }
 0x390   : > { %v264_v37 = vmul.f32 %v503_v35, %v263_v36 }
 0x392   : > { %v265_v38 = vmul.f32 0.5, %v264_v37 }
 0x394   : > { %v266_v40 = vsub.f32 1.5, %v265_v38 }
 0x396   : > { %v267_v41 = vmul.f32 %v503_v35, %v266_v40 }
 0x398   : > { %v271_v43 = vsel %vm270_vm0, %v503_v35, %v267_v41 }
 0x399   : > { %v278_v44 = vmul.f32 %v277_v42, %v271_v43 }
 0x39b   : > { %v281_v45 = vsel %vm280_vm1, %v278_v44, 0.0 }
 0x39c   : > { %v282_v46 = vadd.f32 %v281_v45, %v251_v28 }
 0x39e   : > { %283 = vst [vmem:[%s570_s20] sm:$0xff] %v282_v46 }
 0x3a5   : > { %v459_v47 = vld [vmem:[%s570_s20 + $0x6] ss:$0 sm:$0xff] }
 0x3a6   : > { %v305_v48 = vmul.f32 %v459_v47, %v282_v46  ;;  %v289_v49 = vmul.f32 %v459_v47, %v459_v47 }
 0x3a8   : > { %306 = vadd.xlane.f32.xlu1 %v305_v48  ;;  %290 = vadd.xlane.f32.xlu0 %v289_v49 }
 0x41b   : > { %v291_v51 = vpop.xlane.xlu0 %290  ;;  %v307_v57 = vpop.xlane.xlu1 %306 }
 0x41c   : > { %v292_v52 = vsub.f32 %v460_v50, %v291_v51  ;;  %v308_v60 = vsub.f32 %v578_v13, %v307_v57 }
 0x41e   : > { %504 = vrsqrt.f32 %v292_v52  ;;  %vm299_vm5 = vweird.f32 %v292_v52 }
 0x424   : > { %v505_v53 = vpop.eup %504 }
 0x425   : > { %v294_v54 = vmul.f32 %v505_v53, %v292_v52  ;;  %vm300_vm2 = vweird.f32 %v505_v53 }
 0x426   : > { %vm301_vm6 = vmor %vm299_vm5, %vm300_vm2 }
 0x427   : > { %v295_v55 = vmul.f32 %v505_v53, %v294_v54 }
 0x429   : > { %v296_v56 = vmul.f32 0.5, %v295_v55 }
 0x42b   : > { %v297_v58 = vsub.f32 1.5, %v296_v56 }
 0x42d   : > { %v298_v59 = vmul.f32 %v505_v53, %v297_v58 }
 0x42f   : > { %v302_v61 = vsel %vm301_vm6, %v505_v53, %v298_v59 }
 0x430   : > { %v309_v62 = vmul.f32 %v308_v60, %v302_v61 }
 0x432   : > { %v312_v63 = vsel %vm311_vm7, %v309_v62, 0.0 }
 0x433   : > { %v313_v0 = vadd.f32 %v312_v63, %v282_v46 }
 0x435   : > { %314 = vst [vmem:[%s570_s20] sm:$0xff] %v313_v0 }
 0x43c   : > { %v461_v1 = vld [vmem:[%s570_s20 + $0x7] ss:$0 sm:$0xff] }
 0x43d   : > { %v336_v2 = vmul.f32 %v461_v1, %v313_v0  ;;  %v320_v3 = vmul.f32 %v461_v1, %v461_v1 }
 0x43f   : > { %337 = vadd.xlane.f32.xlu0 %v336_v2  ;;  %321 = vadd.xlane.f32.xlu2 %v320_v3 }
 0x4b2   : > { %v322_v5 = vpop.xlane.xlu2 %321  ;;  %v338_v11 = vpop.xlane.xlu0 %337 }
 0x4b3   : > { %v323_v6 = vsub.f32 %v462_v4, %v322_v5  ;;  %v339_v15 = vsub.f32 %v578_v13, %v338_v11 }
 0x4b5   : > { %506 = vrsqrt.f32 %v323_v6  ;;  %vm330_vm11 = vweird.f32 %v323_v6 }
 0x4bb   : > { %v507_v7 = vpop.eup %506 }
 0x4bc   : > { %v325_v8 = vmul.f32 %v507_v7, %v323_v6  ;;  %vm331_vm8 = vweird.f32 %v507_v7 }
 0x4bd   : > { %vm332_vm12 = vmor %vm330_vm11, %vm331_vm8 }
 0x4be   : > { %v326_v9 = vmul.f32 %v507_v7, %v325_v8 }
 0x4c0   : > { %v327_v10 = vmul.f32 0.5, %v326_v9 }
 0x4c2   : > { %v328_v12 = vsub.f32 1.5, %v327_v10 }
 0x4c4   : > { %v329_v14 = vmul.f32 %v507_v7, %v328_v12 }
 0x4c6   : > { %v333_v16 = vsel %vm332_vm12, %v507_v7, %v329_v14 }
 0x4c7   : > { %v340_v17 = vmul.f32 %v339_v15, %v333_v16 }
 0x4c9   : > { %v343_v18 = vsel %vm342_vm13, %v340_v17, 0.0 }
 0x4ca   : > { %v344_v19 = vadd.f32 %v343_v18, %v313_v0 }
 0x4cc   : > { %345 = vst [vmem:[%s570_s20] sm:$0xff] %v344_v19 }
 0x4cd   : > { %383 = vst [vmem:[%s353_s25] sm:$0xff] %v344_v19 }
 0x4ce PF: > { %s7_s8 = sadd.s32 1, %s530_s8   ;;  %s625_s6 = smov %s526_s7 }
 0x4cf   : > { %p4_p5 = scmp.ge.s32.totalorder %s7_s8, 4   ;;  %s626_s7 = smov %s628_s10 }
 0x4d1   :  { %6 = sbr.rel (!%p4_p5) target bundleno = 2 (0x2), region = 132 }

// kernel: custom-call.47
= control target key start
LH: loop header
LB: loop body
LE: loop exit
PB: predicated region body
PF: predicated region fallthrough
CT: control target
= control target key end

     0   :  { %s413_s6 = smov 0   ;;  %s415_s7 = smov 0   ;;  %s478_s0 = inlined_call_operand.vmem [shape: f32[2,1,8,8], index: 0, kind: input, shape index: {}]   ;;  %s479_s1 = inlined_call_operand.vmem [shape: f32[2,1,8,8], index: 1, kind: output, shape index: {}]  }
   0x1   :  { %s417_s8 = smov 0  }
   0x2 LB: > { %s339_s9 = sadd.s32 4294967295, %s400_s8   ;;  %s33_s10 = sadd.s32 1, %s396_s7  ;;  %s400_s8 = sphi %s417_s8, %s7_s8   ;;  %s396_s7 = sphi %s415_s7, %s481_s7   ;;  %s392_s6 = sphi %s413_s6, %s480_s6  }
   0x3   : > { %p35_p0 = scmp.ge.s32.totalorder %s33_s10, 2  ;;  %p341_p1 = scmp.ge.s32.totalorder %s400_s8, 2 }
   0x4   : > { %s49_s11 = sand.u32 (!%p341_p1), 1, %s400_s8   ;;  %s343_s12 = sshll.u32 (!%p341_p1), %s396_s7, 3 }
   0x5   : > { %s483_s10 = smov (%p35_p0, %s33_s10), 0  ;;  %47 = sbr.rel (%p341_p1) target bundleno = 12 (0xc), region = 16 }
   0x6   : > { %s342_s13 = sshll.u32 (!%p341_p1), %s49_s11, 3  ;;  %s56_s16 = scalar_lea.vmem (!%p341_p1), %s478_s0, %s343_s12 }
   0x7   : > { %s51_s17 = scalar_lea.vmem (!%p341_p1), [#allocation0], %s342_s13 }
   0xa   : > { %v85_v0 = vld [vmem:[%s56_s16] sm:$0xff] }
   0xb   : > { %86 = vst [vmem:[%s51_s17] sm:$0xff] %v85_v0 }
   0xc PF: > { %p344_p2 = scmp.ge.s32.totalorder %s400_s8, 1  ;;  %p91_p3 = scmp.lt.s32.totalorder %s400_s8, 3 }
   0xe   : > { %p92_p4 = pnand %p344_p2, %p91_p3 }
  0x10   : > { %95 = sbr.rel (%p92_p4) target bundleno = 1009 (0x3f1), region = 54 }
  0x15   : > { %s98_s18 = sand.u32 1, %s339_s9   ;;  %v109_v1 = vlaneseq  ;;  %v402_v19 = vmov -1.0   ;;  %s348_s21 = sshll.u32 %s392_s6, 3 }
  0x16   : > { %s345_s19 = sshll.u32 %s98_s18, 3  ;;  %s246_s24 = scalar_lea.vmem %s479_s1, %s348_s21 }
  0x17   : > { %v440_v2 = vand.u32 127, %v109_v1  ;;  %v113_v3 = vshrl.u32 %v109_v1, 7  ;;  %s100_s20 = scalar_lea.vmem [#allocation0], %s345_s19 }
  0x18   : > { %v116_v4 = vld [vmem:[%s100_s20] sm:$0xff] }
  0x19   : > { %vm115_vm0 = vcmp.eq.s32.totalorder %v113_v3, %v440_v2  ;;  %vm111_vm1 = vcmp.lt.s32.totalorder %v440_v2, 8  ;;  %vm120_vm2 = vcmp.ge.s32.totalorder %v113_v3, %v440_v2  ;;  %vm147_vm8 = vcmp.eq.s32.totalorder %v440_v2, 0 }
  0x1a   : > { %v117_v5 = vsel %vm115_vm0, %v116_v4, 0.0  ;;  %vm121_vm3 = vmand %vm120_vm2, %vm111_vm1  ;;  %vm144_vm9 = vcmp.eq.s32.totalorder %v440_v2, %v113_v3  ;;  %v148_v20 = vsel %vm147_vm8, 1.0, %v402_v19  ;;  %vm155_vm10 = vcmp.eq.s32.totalorder %v440_v2, 1 }
  0x1b   : > { %118 = vadd.xlane.f32.xlu0 %v117_v5  ;;  %v122_v14 = vsel %vm121_vm3, %v116_v4, 0.0  ;;  %v149_v21 = vsel %vm144_vm9, %v148_v20, 0.0  ;;  %vm165_vm11 = vcmp.eq.s32.totalorder %v440_v2, 2  ;;  %vm175_vm12 = vcmp.eq.s32.totalorder %v440_v2, 3 }
  0x1c   : > { %vm185_vm13 = vcmp.eq.s32.totalorder %v440_v2, 4  ;;  %vm195_vm14 = vcmp.eq.s32.totalorder %v440_v2, 5  ;;  %vm205_vm15 = vcmp.eq.s32.totalorder %v440_v2, 6  ;;  %vm215_vm0 = vcmp.eq.s32.totalorder %v440_v2, 7 }
  0x8e   : > { %v443_v6 = vpop.xlane.xlu0 %118 }
  0x8f   : > { %376 = vrcp.f32 %v443_v6  ;;  %v134_v10 = vand.u32 2147483648, %v443_v6  ;;  %v132_v12 = vand.u32 2147483647, %v443_v6  ;;  %vm128_vm5 = vweird.f32 %v443_v6 }
  0x91   : > { %v135_v15 = vor.u32 1.1754944e-38, %v134_v10  ;;  %vm133_vm7 = vcmp.eq.f32.partialorder %v132_v12, 8.507059e+37 }
  0x95   : > { %v377_v7 = vpop.eup %376 }
  0x96   : > { %v124_v8 = vmul.f32 %v377_v7, %v443_v6  ;;  %vm129_vm4 = vweird.f32 %v377_v7 }
  0x97   : > { %vm130_vm6 = vmor %vm128_vm5, %vm129_vm4 }
  0x98   : > { %v125_v9 = vsub.f32 1.0, %v124_v8 }
  0x9a   : > { %v126_v11 = vmul.f32 %v377_v7, %v125_v9 }
  0x9c   : > { %v127_v13 = vadd.f32 %v377_v7, %v126_v11 }
  0x9e   : > { %v131_v16 = vsel %vm130_vm6, %v377_v7, %v127_v13 }
  0x9f   : > { %v136_v17 = vsel %vm133_vm7, %v135_v15, %v131_v16 }
  0xa0   : > { %v137_v18 = vmul.f32 %v136_v17, %v122_v14 }
  0xa2   : > { %138 = vst [vmem:[#allocation2] sm:$0xff] %v137_v18 }
  0xa9   : > { %v151_v22 = vld [vmem:[#allocation2 + $0x1] ss:$0 sm:$0xff]  ;;  %v161_v25 = vld [vmem:[#allocation2 + $0x2] ss:$0 sm:$0xff]  ;;  %v171_v30 = vld [vmem:[#allocation2 + $0x3] ss:$0 sm:$0xff] }
  0xaa   : > { %v152_v23 = vxor.u32 2147483648, %v151_v22  ;;  %v162_v27 = vxor.u32 2147483648, %v161_v25  ;;  %v172_v32 = vxor.u32 2147483648, %v171_v30  ;;  %v181_v35 = vld [vmem:[#allocation2 + $0x4] ss:$0 sm:$0xff] }
  0xab   : > { %v182_v37 = vxor.u32 2147483648, %v181_v35  ;;  %v191_v40 = vld [vmem:[#allocation2 + $0x5] ss:$0 sm:$0xff]  ;;  %v201_v45 = vld [vmem:[#allocation2 + $0x6] ss:$0 sm:$0xff] }
  0xac   : > { %v156_v24 = vmul.f32 %v152_v23, %v149_v21  ;;  %v192_v42 = vxor.u32 2147483648, %v191_v40  ;;  %v202_v47 = vxor.u32 2147483648, %v201_v45  ;;  %v211_v50 = vld [vmem:[#allocation2 + $0x7] ss:$0 sm:$0xff] }
  0xad   : > { %v212_v52 = vxor.u32 2147483648, %v211_v50 }
  0xae   : > { %157 = vadd.xlane.f32.xlu0 %v156_v24 }
 0x121   : > { %v158_v26 = vpop.xlane.xlu0 %157 }
 0x122   : > { %v159_v28 = vsel %vm155_vm10, %v158_v26, %v149_v21 }
 0x123   : > { %v166_v29 = vmul.f32 %v162_v27, %v159_v28 }
 0x125   : > { %167 = vadd.xlane.f32.xlu1 %v166_v29 }
 0x198   : > { %v168_v31 = vpop.xlane.xlu1 %167 }
 0x199   : > { %v169_v33 = vsel %vm165_vm11, %v168_v31, %v159_v28 }
 0x19a   : > { %v176_v34 = vmul.f32 %v172_v32, %v169_v33 }
 0x19c   : > { %177 = vadd.xlane.f32.xlu1 %v176_v34 }
 0x20f   : > { %v178_v36 = vpop.xlane.xlu1 %177 }
 0x210   : > { %v179_v38 = vsel %vm175_vm12, %v178_v36, %v169_v33 }
 0x211   : > { %v186_v39 = vmul.f32 %v182_v37, %v179_v38 }
 0x213   : > { %187 = vadd.xlane.f32.xlu2 %v186_v39 }
 0x286   : > { %v188_v41 = vpop.xlane.xlu2 %187 }
 0x287   : > { %v189_v43 = vsel %vm185_vm13, %v188_v41, %v179_v38 }
 0x288   : > { %v196_v44 = vmul.f32 %v192_v42, %v189_v43 }
 0x28a   : > { %197 = vadd.xlane.f32.xlu2 %v196_v44 }
 0x2fd   : > { %v198_v46 = vpop.xlane.xlu2 %197 }
 0x2fe   : > { %v199_v48 = vsel %vm195_vm14, %v198_v46, %v189_v43 }
 0x2ff   : > { %v206_v49 = vmul.f32 %v202_v47, %v199_v48 }
 0x301   : > { %207 = vadd.xlane.f32.xlu0 %v206_v49 }
 0x374   : > { %v208_v51 = vpop.xlane.xlu0 %207 }
 0x375   : > { %v209_v53 = vsel %vm205_vm15, %v208_v51, %v199_v48 }
 0x376   : > { %v216_v54 = vmul.f32 %v212_v52, %v209_v53 }
 0x378   : > { %217 = vadd.xlane.f32.xlu1 %v216_v54 }
 0x3eb   : > { %v218_v55 = vpop.xlane.xlu1 %217 }
 0x3ec   : > { %v219_v56 = vsel %vm215_vm0, %v218_v55, %v209_v53 }
 0x3ed   : > { %v234_v57 = vmul.f32 %v219_v56, %v136_v17 }
 0x3ef   : > { %v236_v58 = vsel %vm128_vm5, %v219_v56, %v234_v57 }
 0x3f0   : > { %276 = vst [vmem:[%s246_s24] sm:$0xff] %v236_v58 }
 0x3f1 PF: > { %s7_s8 = sadd.s32 1, %s400_s8   ;;  %s480_s6 = smov %s396_s7 }
 0x3f2   : > { %p4_p5 = scmp.ge.s32.totalorder %s7_s8, 4   ;;  %s481_s7 = smov %s483_s10 }
 0x3f4   :  { %6 = sbr.rel (!%p4_p5) target bundleno = 2 (0x2), region = 125 }

// kernel: reverse
= control target key start
LH: loop header
LB: loop body
LE: loop exit
PB: predicated region body
PF: predicated region fallthrough
CT: control target
= control target key end

     0   :  { %v2_v0 = vlaneseq  ;;  %s109_s0 = inlined_call_operand.vmem [shape: f32[2,8], index: 0, kind: input, shape index: {}]   ;;  %s110_s1 = inlined_call_operand.vmem [shape: f32[2,8], index: 1, kind: output, shape index: {}]  }
   0x2   :  { %v3_v1 = vsub.s32 7, %v2_v0 }
   0x4   :  { %4 = vset.pattern.permute.xlu0 %v3_v1 }
   0x5   :  { %v21_v2 = vld [vmem:[%s109_s0] sm:$0x3] }
   0x6   :  { %22 = vst [vmem:[#allocation1] sm:$0x3] %v21_v2 }
   0xd   :  { %v40_v3 = vld [vmem:[#allocation1] sm:$0x3] }
   0xe   :  { %41 = vst [vmem:[#allocation0] sm:$0x3] %v40_v3 }
  0x15   :  { %v42_v4 = vld [vmem:[#allocation0] sm:$0xff] }
  0x16   :  { %43 = vperm.xlu0 %4, %v42_v4  }
  0x88   :  { %v44_v5 = vpop.permute.xlu0 %43 }
  0x89   :  { %45 = vst [vmem:[#allocation2] sm:$0xff] %v44_v5 }
  0x90   :  { %v48_v6 = vld [vmem:[#allocation2] sm:$0x3] }
  0x91   :  { %51 = vst [vmem:[#allocation3] sm:$0x3] %v48_v6 }
  0x98   :  { %v68_v7 = vld [vmem:[#allocation3] sm:$0x3] }
  0x99   :  { %69 = vst [vmem:[%s110_s1] sm:$0x3] %v68_v7 }

// kernel: custom-call.17
= control target key start
LH: loop header
LB: loop body
LE: loop exit
PB: predicated region body
PF: predicated region fallthrough
CT: control target
= control target key end

     0   :  { %s2206_s0 = inlined_call_operand.vmem [shape: f32[2,4,4], index: 0, kind: input, shape index: {}]   ;;  %s2207_s1 = inlined_call_operand.vmem [shape: f32[2,4,4], index: 1, kind: input, shape index: {}]   ;;  %s2208_s2 = inlined_call_operand.vmem [shape: f32[2,4,4], index: 2, kind: input, shape index: {}]   ;;  %s2209_s3 = inlined_call_operand.vmem [shape: f32[2,4,4], index: 3, kind: input, shape index: {}]   ;;  %s2210_s4 = inlined_call_operand.vmem [shape: f32[2,4], index: 4, kind: output, shape index: {0}]   ;;  %s2211_s5 = inlined_call_operand.vmem [shape: f32[2,4], index: 5, kind: output, shape index: {1}]   ;;  %s2212_s6 = inlined_call_operand.hbm [shape: f32[2,4,4], index: 6, kind: output, shape index: {2}]   ;;  %s2213_s7 = inlined_call_operand.hbm [shape: f32[2,4,4], index: 7, kind: output, shape index: {3}]   ;;  %s2214_s8 = inlined_call_operand.hbm [shape: f32[2,4,4], index: 8, kind: output, shape index: {4}]   ;;  %s2215_s9 = inlined_call_operand.hbm [shape: f32[2,4,4], index: 9, kind: output, shape index: {5}]  }
   0x1   :  { %2216 = sst [smem:[#allocation40_spill]] %s2206_s0 }
   0x2   :  { %11 = vsyncpa [#allocation14], 0 }
   0x3   :  { %13 = vsyncpa [#allocation14 + $0x1], 0 }
   0x4   :  { %14 = vsyncpa [#allocation17], 0 }
   0x5   :  { %16 = vsyncpa [#allocation17 + $0x1], 0 }
   0x6   :  { %17 = vsyncpa [#allocation22], 0 }
   0x7   :  { %19 = vsyncpa [#allocation22 + $0x1], 0  ;;  %s1815_s30 = smov 0   ;;  %s1817_s10 = smov 0  }
   0x8   :  { %s1819_s11 = smov 0  }
   0x9 LB: > { %s1831_s12 = sadd.s32 4294967295, %s1752_s11   ;;  %s1835_s14 = sadd.s32 1, %s1752_s11   ;;  %s1752_s11 = sphi %s1819_s11, %s2241_s11   ;;  %s1748_s10 = sphi %s1817_s10, %s2240_s10   ;;  %s1744_s30 = sphi %s1815_s30, %s2239_s30  }
   0xa   : > { %s29_s15 = sshrl.u32 %s1752_s11, 3  ;;  %s30_s16 = sshrl.u32 %s1835_s14, 3 }
   0xb   : > { %s34_s17 = sadd.s32 1, %s1748_s10  ;;  %s31_s18 = ssub.s32 %s29_s15, %s30_s16 }
   0xc   : > { %p44_p0 = scmp.ne.s32.totalorder %s1748_s10, %s1744_s30  ;;  %p32_p1 = scmp.eq.s32.totalorder %s31_s18, 0 }
   0xd   : > { %p45_p2 = scmp.eq.s32.totalorder %s1831_s12, 1  ;;  %p1500_p4 = scmp.ge.s32.totalorder %s1752_s11, 2 }
   0xe   : > { %s1844_s19 = scalar_select %p32_p1, %s1748_s10, %s34_s17  }
   0xf   : > { %p1846_p3 = por %p45_p2, %p44_p0  ;;  %95 = sbr.rel (%p1500_p4) target bundleno = 28 (0x1c), region = 16 }
  0x10   : > { %2217 = sst [smem:[#allocation39_spill]] %s1844_s19  ;;  %s97_s21 = sand.u32 (!%p1500_p4), 1, %s1752_s11  }
  0x11   : > { %s1502_s22 = sshll.u32 (!%p1500_p4), %s1752_s11, 2  ;;  %s1501_s23 = sshll.u32 (!%p1500_p4), %s97_s21, 2 }
  0x12   : > { %s2219_s0 = sld [smem:[#allocation40_spill]] (!%p1500_p4)  ;;  %s99_s27 = scalar_lea.vmem (!%p1500_p4), [#allocation1], %s1501_s23 }
  0x13   : > { %s140_s15 = scalar_lea.vmem (!%p1500_p4), %s2207_s1, %s1502_s22  ;;  %s179_s18 = scalar_lea.vmem (!%p1500_p4), %s2208_s2, %s1502_s22 }
  0x14   : > { %v157_v1 = vld [vmem:[%s140_s15] sm:$0xf]  ;;  %s138_s13 = scalar_lea.vmem [#allocation3], %s1501_s23  ;;  %s218_s24 = scalar_lea.vmem %s2209_s3, %s1502_s22 }
  0x15   : > { %158 = vst [vmem:[%s138_s13] sm:$0xf] %v157_v1  ;;  %v196_v2 = vld [vmem:[%s179_s18] sm:$0xf]  ;;  %s177_s25 = scalar_lea.vmem [#allocation5], %s1501_s23 }
  0x16   : > { %197 = vst [vmem:[%s177_s25] sm:$0xf] %v196_v2  ;;  %v235_v3 = vld [vmem:[%s218_s24] sm:$0xf] }
  0x18   : > { %s101_s26 = scalar_lea.vmem %s2219_s0, %s1502_s22 }
  0x19   : > { %v118_v0 = vld [vmem:[%s101_s26] sm:$0xf]  ;;  %s216_s26 = scalar_lea.vmem [#allocation7], %s1501_s23 }
  0x1a   : > { %119 = vst [vmem:[%s99_s27] sm:$0xf] %v118_v0 }
  0x1b   : > { %236 = vst [vmem:[%s216_s26] sm:$0xf] %v235_v3 }
  0x1c PF: > { %p1509_p5 = scmp.ge.s32.totalorder %s1752_s11, 1  ;;  %p253_p6 = scmp.lt.s32.totalorder %s1752_s11, 3 }
  0x1e   : > { %p254_p7 = pnand %p1509_p5, %p253_p6 }
  0x20   : > { %257 = sbr.rel (%p254_p7) target bundleno = 1008 (0x3f0), region = 140 }
  0x25   : > { %s1870_s13 = sand.u32 1, %s1831_s12   ;;  %s294_s27 = sand.u32 1, %s1744_s30   ;;  %v358_v4 = vlaneseq  ;;  %v1762_v5 = vmov 0.0  }
  0x26   : > { %s1874_s19 = sshll.u32 %s1870_s13, 2  ;;  %s1876_s22 = sshll.u32 %s294_s27, 1  ;;  %353 = vst [vmem:[#allocation12] sm:$0xff] %v1762_v5 }
  0x27   : > { %354 = vst [vmem:[#allocation15] sm:$0xff] %v1762_v5  ;;  %v1878_v6 = vand.u32 127, %v358_v4  ;;  %v1880_v7 = vshrl.u32 %v358_v4, 7  ;;  %s278_s23 = scalar_lea.vmem [#allocation1], %s1874_s19  ;;  %s282_s28 = scalar_lea.vmem [#allocation3], %s1874_s19 }
  0x28   : > { %v325_v8 = vld [vmem:[%s278_s23] sm:$0xf]  ;;  %v329_v9 = vld [vmem:[%s282_s28] sm:$0xf]  ;;  %s286_s30 = scalar_lea.vmem [#allocation5], %s1874_s19  ;;  %s290_s29 = scalar_lea.vmem [#allocation7], %s1874_s19 }
  0x29   : > { %326 = vst [vmem:[#allocation0] sm:$0xf] %v325_v8  ;;  %v333_v10 = vld [vmem:[%s286_s30] sm:$0xf]  ;;  %v337_v11 = vld [vmem:[%s290_s29] sm:$0xf]  ;;  %v360_v6 = vmov %v1878_v6  ;;  %v363_v7 = vmov %v1880_v7 }
  0x2a   : > { %330 = vst [vmem:[#allocation2] sm:$0xf] %v329_v9  ;;  %s341_s15 = smov [#allocation23]  ;;  %s357_s16 = smov [#allocation12]  ;;  %vm367_vm0 = vcmp.eq.s32.totalorder %v363_v7, %v360_v6  ;;  %v373_v6 = vmov %v1878_v6  ;;  %v376_v7 = vmov %v1880_v7  ;;  %vm1389_vm2 = vcmp.lt.s32.totalorder %v1878_v6, 4 }
  0x2b   : > { %334 = vst [vmem:[#allocation4] sm:$0xf] %v333_v10  ;;  %s344_s17 = smov [#allocation24]  ;;  %s347_s18 = smov [#allocation25]  ;;  %vm380_vm1 = vcmp.eq.s32.totalorder %v376_v7, %v373_v6  ;;  %v1381_v6 = vmov %v1878_v6  ;;  %v1384_v7 = vmov %v1880_v7 }
  0x2c   : > { %338 = vst [vmem:[#allocation6] sm:$0xf] %v337_v11  ;;  %s350_s21 = smov [#allocation26]  ;;  %s370_s24 = smov [#allocation20]  ;;  %v1398_v6 = vmov %v1878_v6  ;;  %v1401_v7 = vmov %v1880_v7  ;;  %vm1394_vm3 = vcmp.eq.s32.totalorder %v1384_v7, %v1381_v6 }
  0x2d   : > { %355 = vst [vmem:[#allocation18] sm:$0xff] %v1762_v5  ;;  %v364_v12 = vld [vmem:[%s357_s16] sm:$0xf]  ;;  %s1385_s29 = smov [#allocation23]  ;;  %v1415_v6 = vmov %v1878_v6  ;;  %v1418_v7 = vmov %v1880_v7 }
  0x2e   : > { %356 = vst [vmem:[#allocation20] sm:$0xff] %v1762_v5  ;;  %v368_v16 = vsel %vm367_vm0, 1.0, %v364_v12  ;;  %v1432_v6 = vmov %v1878_v6  ;;  %v1435_v7 = vmov %v1880_v7 }
  0x2f   : > { %369 = vst [vmem:[%s357_s16] sm:$0xf] %v368_v16  ;;  %s1419_s16 = smov [#allocation25]  ;;  %vm1445_vm4 = vcmp.eq.s32.totalorder %v1435_v7, %v1432_v6 }
  0x30   : > { %v342_v13 = vld [vmem:[#allocation0] sm:$0xff] }
  0x31   : > { %343 = vst [vmem:[%s341_s15] sm:$0xff] %v342_v13  ;;  %v345_v14 = vld [vmem:[#allocation2] sm:$0xff]  ;;  %s1402_s15 = smov [#allocation24] }
  0x32   : > { %346 = vst [vmem:[%s344_s17] sm:$0xff] %v345_v14  ;;  %v348_v15 = vld [vmem:[#allocation4] sm:$0xff]  ;;  %s1436_s17 = smov [#allocation26] }
  0x33   : > { %349 = vst [vmem:[%s347_s18] sm:$0xff] %v348_v15  ;;  %v351_v17 = vld [vmem:[#allocation6] sm:$0xff] }
  0x34   : > { %352 = vst [vmem:[%s350_s21] sm:$0xff] %v351_v17 }
  0x35   : > { %v377_v18 = vld [vmem:[%s370_s24] sm:$0xf] }
  0x36   : > { %v381_v19 = vsel %vm380_vm1, 1.0, %v377_v18 }
  0x37   : > { %382 = vst [vmem:[%s370_s24] sm:$0xf] %v381_v19 }
  0x38   : > { %v1391_v20 = vld [vmem:[%s1385_s29] sm:$0xf] }
  0x39   : > { %v1408_v21 = vld [vmem:[%s1402_s15] sm:$0xf]  ;;  %v1392_v22 = vsel %vm1389_vm2, %v1391_v20, 0.0 }
  0x3a   : > { %v1409_v23 = vsel %vm1389_vm2, %v1408_v21, 0.0  ;;  %v1425_v24 = vld [vmem:[%s1419_s16] sm:$0xf]  ;;  %v1393_v26 = vmul.f32 %v1392_v22, %v1392_v22 }
  0x3b   : > { %v1442_v25 = vld [vmem:[%s1436_s17] sm:$0xf]  ;;  %v1410_v27 = vmul.f32 %v1409_v23, %v1409_v23  ;;  %v1426_v28 = vsel %vm1389_vm2, %v1425_v24, 0.0 }
  0x3c   : > { %v1443_v29 = vsel %vm1389_vm2, %v1442_v25, 0.0  ;;  %v1427_v30 = vmul.f32 %v1426_v28, %v1426_v28  ;;  %v1395_v33 = vsel %vm1394_vm3, 0.0, %v1393_v26 }
  0x3d   : > { %v1412_v31 = vadd.f32 %v1410_v27, %v1393_v26  ;;  %v1444_v32 = vmul.f32 %v1443_v29, %v1443_v29  ;;  %v1411_v35 = vadd.f32 %v1410_v27, %v1395_v33 }
  0x3f   : > { %v1429_v34 = vadd.f32 %v1427_v30, %v1412_v31  ;;  %v1428_v37 = vadd.f32 %v1427_v30, %v1411_v35  ;;  %v1446_v38 = vsel %vm1445_vm4, 0.0, %v1444_v32 }
  0x41   : > { %v1448_v36 = vadd.f32 %v1444_v32, %v1429_v34  ;;  %v1447_v39 = vadd.f32 %v1446_v38, %v1428_v37 }
  0x43   : > { %1449 = vadd.xlane.f32.xlu0 %v1448_v36 }
  0x4b   : > { %1457 = vadd.xlane.f32.xlu0 %v1447_v39 }
  0xb6   : > { %v1450_v40 = vpop.xlane.xlu0 %1449 }
  0xb7   : > { %v1451_v41 = vrot.slane %v1450_v40, 4 }
  0xb9   : > { %v1452_v42 = vadd.f32 %v1451_v41, %v1450_v40 }
  0xbb   : > { %v1453_v43 = vrot.slane %v1452_v42, 2 }
  0xbd   : > { %v1454_v47 = vadd.f32 %v1453_v43, %v1452_v42 }
  0xbe   : > { %v1458_v44 = vpop.xlane.xlu0 %1457 }
  0xbf   : > { %v1459_v45 = vrot.slane %v1458_v44, 4  ;;  %v1455_v50 = vrot.slane %v1454_v47, 1 }
  0xc1   : > { %v1460_v46 = vadd.f32 %v1459_v45, %v1458_v44  ;;  %v1456_v53 = vadd.f32 %v1455_v50, %v1454_v47 }
  0xc3   : > { %v1461_v48 = vrot.slane %v1460_v46, 2 }
  0xc5   : > { %v1462_v49 = vadd.f32 %v1461_v48, %v1460_v46 }
  0xc7   : > { %v1463_v51 = vrot.slane %v1462_v49, 1 }
  0xc9   : > { %v1464_v52 = vadd.f32 %v1463_v51, %v1462_v49 }
  0xcb   : > { %1550 = vpush %v1464_v52 }
  0xcc   : > { %1552 = vpush %v1456_v53 }
  0xfc   : > { %s1551_s18 = spop %1550 }
  0xfd   : > { %s1553_s21 = spop %1552 }
  0xfe   : > { %s1467_s24 = smul.f32 1e-10, %s1553_s21 }
 0x100   : > { %p1468_p8 = scmp.le.f32.partialorder %s1551_s18, %s1467_s24 }
 0x101   : > { %s1913_s29 = smov (!%p1468_p8), 0  }
 0x102   : > { %1471 = sbr.rel (%p1468_p8) target bundleno = 916 (0x394), region = 349 }
 0x107 LB: >> { %s1918_s15 = smov 0   ;;  %s1756_s29 = sphi %s1913_s29, %s2220_s29  }
 0x108 LB: >>> { %s487_s16 = smov [#allocation23]  ;;  %v491_v6 = vmov %v1878_v6  ;;  %v494_v7 = vmov %v1880_v7  ;;  %s507_s17 = smov [#allocation24]  ;;  %s1760_s15 = sphi %s1918_s15, %s486_s15  }
 0x109   : >>> { %v511_v6 = vmov %v1878_v6  ;;  %v514_v7 = vmov %v1880_v7  ;;  %v495_v54 = vld [vmem:[%s487_s16] sm:$0xf]  ;;  %vm498_vm5 = vcmp.eq.s32.totalorder %v494_v7, %v491_v6  ;;  %s527_s18 = smov [#allocation26]  ;;  %s488_s21 = smov [#allocation27] }
 0x10a   : >>> { %vm518_vm6 = vcmp.eq.s32.totalorder %v514_v7, %v511_v6  ;;  %v531_v6 = vmov %v1878_v6  ;;  %v534_v7 = vmov %v1880_v7  ;;  %v499_v55 = vsel %vm498_vm5, %v495_v54, 0.0  ;;  %v515_v56 = vld [vmem:[%s507_s17] sm:$0xf]  ;;  %s508_s24 = smov [#allocation28]  ;;  %s528_s16 = smov [#allocation29] }
 0x10b   : >>> { %vm538_vm7 = vcmp.eq.s32.totalorder %v534_v7, %v531_v6  ;;  %v500_v57 = vrot.slane %v499_v55, 4  ;;  %v519_v58 = vsel %vm518_vm6, %v515_v56, 0.0  ;;  %v535_v59 = vld [vmem:[%s527_s18] sm:$0xf]  ;;  %s551_s17 = smov [#allocation28]  ;;  %s549_s18 = smov [#allocation27]  ;;  %v640_v6 = vmov %v1878_v6 }
 0x10c   : >>> { %v520_v60 = vrot.slane %v519_v58, 4  ;;  %v539_v61 = vsel %vm538_vm7, %v535_v59, 0.0  ;;  %s553_s26 = smov [#allocation29]  ;;  %v643_v7 = vmov %v1880_v7  ;;  %s1942_s25 = smov [#allocation25] }
 0x10d   : >>> { %v501_v62 = vadd.f32 %v500_v57, %v499_v55  ;;  %v540_v63 = vrot.slane %v539_v61, 4  ;;  %s1944_s30 = smov [#allocation12]  ;;  %s1946_s28 = smov [#allocation15] }
 0x10e   : >>> { %v521_v0 = vadd.f32 %v520_v60, %v519_v58  ;;  %s1951_s23 = smov [#allocation18]  ;;  %s892_s27 = smov [#allocation35] }
 0x10f   : >>> { %v502_v1 = vrot.slane %v501_v62, 2  ;;  %v541_v2 = vadd.f32 %v540_v63, %v539_v61  ;;  %s1954_s0 = smov [#allocation20]  ;;  %s486_s15 = sadd.s32 1, %s1760_s15  }
 0x110   : >>> { %v522_v3 = vrot.slane %v521_v0, 2  ;;  %p483_p9 = scmp.ge.s32.totalorder %s486_s15, 7  }
 0x111   : >>> { %v503_v4 = vadd.f32 %v502_v1, %v501_v62  ;;  %v542_v5 = vrot.slane %v541_v2, 2 }
 0x112   : >>> { %v523_v8 = vadd.f32 %v522_v3, %v521_v0 }
 0x113   : >>> { %v504_v9 = vrot.slane %v503_v4, 1  ;;  %v543_v10 = vadd.f32 %v542_v5, %v541_v2 }
 0x114   : >>> { %v524_v11 = vrot.slane %v523_v8, 1 }
 0x115   : >>> { %v505_v12 = vadd.f32 %v504_v9, %v503_v4  ;;  %v544_v13 = vrot.slane %v543_v10, 1 }
 0x116   : >>> { %v525_v14 = vadd.f32 %v524_v11, %v523_v8 }
 0x117   : >>> { %506 = vst [vmem:[%s488_s21] sm:$0x1] %v505_v12  ;;  %v545_v15 = vadd.f32 %v544_v13, %v543_v10  ;;  %s630_s21 = smov [#allocation31] }
 0x118   : >>> { %526 = vst [vmem:[%s508_s24] sm:$0x1] %v525_v14  ;;  %s547_s24 = smov [#allocation32] }
 0x119   : >>> { %546 = vst [vmem:[%s528_s16] sm:$0x1] %v545_v15  ;;  %s548_s16 = smov [#allocation33]  ;;  %s632_s24 = smov %s547_s24 }
 0x11a   : >>> { %s634_s16 = smov %s548_s16 }
 0x11e   : >>> { %v550_v23 = vld [vmem:[%s549_s18] sm:$0xff]  ;;  %s651_s18 = smov [#allocation33] }
 0x11f   : >>> { %v1929_v16 = vld [vmem:[%s551_s17] sm:$0xff]  ;;  %v604_v47 = vand.u32 2147483647, %v550_v23  ;;  %s636_s17 = smov [#allocation32] }
 0x120   : >>> { %v556_v17 = vmul.f32 2.0, %v1929_v16  ;;  %v554_v24 = vld [vmem:[%s553_s26] sm:$0xff]  ;;  %v605_v55 = vand.u32 2147483647, %v1929_v16  ;;  %s628_s26 = smov [#allocation30] }
 0x121   : >>> { %v555_v27 = vsub.f32 %v554_v24, %v550_v23  ;;  %v606_v48 = vand.u32 2147483647, %v554_v24 }
 0x122   : >>> { %1606 = vrcp.f32 %v556_v17  ;;  %v568_v20 = vand.u32 2147483648, %v556_v17  ;;  %vm562_vm8 = vweird.f32 %v556_v17  ;;  %v566_v22 = vand.u32 2147483647, %v556_v17 }
 0x123   : >>> { %v607_v50 = vmin.f32 %v604_v47, %v606_v48 }
 0x124   : >>> { %v569_v26 = vor.u32 1.1754944e-38, %v568_v20  ;;  %vm567_vm11 = vcmp.eq.f32.partialorder %v566_v22, 8.507059e+37 }
 0x125   : >>> { %v608_v56 = vmul.f32 1.1920929e-08, %v607_v50 }
 0x127   : >>> { %vm609_vm4 = vcmp.le.f32.partialorder %v605_v55, %v608_v56 }
 0x128   : >>> { %v1607_v18 = vpop.eup %1606 }
 0x129   : >>> { %v558_v19 = vmul.f32 %v1607_v18, %v556_v17  ;;  %vm563_vm9 = vweird.f32 %v1607_v18 }
 0x12a   : >>> { %vm564_vm10 = vmor %vm562_vm8, %vm563_vm9  ;;  %vm645_vm8 = vcmp.eq.s32.totalorder %v643_v7, %v640_v6  ;;  %v655_v6 = vmov %v1878_v6  ;;  %v658_v7 = vmov %v1880_v7 }
 0x12b   : >>> { %v559_v21 = vsub.f32 1.0, %v558_v19  ;;  %vm660_vm9 = vcmp.eq.s32.totalorder %v658_v7, %v655_v6  ;;  %v726_v6 = vmov %v1878_v6 }
 0x12c   : >>> { %v767_v6 = vmov %v1878_v6 }
 0x12d   : >>> { %v560_v25 = vmul.f32 %v1607_v18, %v559_v21  ;;  %v676_v21 = vld [vmem:[%s1942_s25] sm:$0xf]  ;;  %v753_v6 = vmov %v1878_v6 }
 0x12f   : >>> { %v561_v28 = vadd.f32 %v1607_v18, %v560_v25 }
 0x131   : >>> { %v565_v29 = vsel %vm564_vm10, %v1607_v18, %v561_v28  ;;  %v900_v28 = vld [vmem:[%s1951_s23] sm:$0xf]  ;;  %vm850_vm10 = vcmp.eq.s32.totalorder %v1880_v7, 0 }
 0x132   : >>> { %v570_v30 = vsel %vm567_vm11, %v569_v26, %v565_v29  ;;  %vm862_vm11 = vcmp.eq.s32.totalorder %v1880_v7, 3  ;;  %v729_v7 = vmov %v1880_v7 }
 0x133   : >>> { %v571_v31 = vmul.f32 %v570_v30, %v555_v27  ;;  %v770_v7 = vmov %v1880_v7 }
 0x134   : >>> { %v756_v7 = vmov %v1880_v7 }
 0x135   : >>> { %v573_v32 = vmul.f32 %v571_v31, %v571_v31  ;;  %vm572_vm14 = vcmp.ge.f32.partialorder %v571_v31, 0.0 }
 0x137   : >>> { %v574_v33 = vadd.f32 1.0, %v573_v32 }
 0x139   : >>> { %1608 = vrsqrt.f32 %v574_v33  ;;  %vm582_vm12 = vcmp.eq.f32.partialorder %v574_v33, inf  ;;  %v585_v40 = vand.u32 2147483648, %v574_v33  ;;  %vm584_vm13 = vcmp.eq.f32.partialorder %v574_v33, 0.0 }
 0x13f   : >>> { %v1609_v34 = vpop.eup %1608 }
 0x140   : >>> { %v576_v35 = vmul.f32 %v1609_v34, %v574_v33 }
 0x142   : >>> { %v577_v36 = vmul.f32 %v1609_v34, %v576_v35 }
 0x144   : >>> { %v578_v37 = vmul.f32 0.5, %v577_v36 }
 0x146   : >>> { %v579_v38 = vsub.f32 1.5, %v578_v37 }
 0x148   : >>> { %v580_v39 = vmul.f32 %v1609_v34, %v579_v38 }
 0x14a   : >>> { %v581_v41 = vmul.f32 %v580_v39, %v574_v33 }
 0x14c   : >>> { %v583_v42 = vsel %vm582_vm12, %v574_v33, %v581_v41  ;;  %v901_v33 = vld [vmem:[%s1954_s0] sm:$0xf]  ;;  %vm734_vm12 = vcmp.eq.s32.totalorder %v729_v7, %v726_v6  ;;  %v740_v6 = vmov %v1878_v6  ;;  %v743_v7 = vmov %v1880_v7 }
 0x14d   : >>> { %v586_v43 = vsel %vm584_vm13, %v585_v40, %v583_v42  ;;  %vm775_vm13 = vcmp.eq.s32.totalorder %v770_v7, %v767_v6 }
 0x14e   : >>> { %v587_v44 = vxor.u32 2147483648, %v586_v43 }
 0x150   : >>> { %v588_v45 = vsel %vm572_vm14, %v586_v43, %v587_v44  ;;  %vm760_vm14 = vcmp.eq.s32.totalorder %v756_v7, %v753_v6 }
 0x151   : >>> { %v589_v46 = vadd.f32 %v588_v45, %v571_v31 }
 0x153   : >>> { %1610 = vrcp.f32 %v589_v46  ;;  %v601_v52 = vand.u32 2147483648, %v589_v46  ;;  %vm595_vm15 = vweird.f32 %v589_v46  ;;  %v599_v54 = vand.u32 2147483647, %v589_v46 }
 0x155   : >>> { %v602_v58 = vor.u32 1.1754944e-38, %v601_v52  ;;  %vm600_vm3 = vcmp.eq.f32.partialorder %v599_v54, 8.507059e+37 }
 0x159   : >>> { %v1611_v49 = vpop.eup %1610 }
 0x15a   : >>> { %v591_v51 = vmul.f32 %v1611_v49, %v589_v46  ;;  %vm596_vm0 = vweird.f32 %v1611_v49 }
 0x15b   : >>> { %vm597_vm1 = vmor %vm595_vm15, %vm596_vm0  ;;  %vm747_vm15 = vcmp.eq.s32.totalorder %v743_v7, %v740_v6  ;;  %vm806_vm0 = vcmp.eq.s32.totalorder %v1878_v6, 3  ;;  %v390_v7 = vmov (%p483_p9), %v1880_v7 }
 0x15c   : >>> { %v592_v53 = vsub.f32 1.0, %v591_v51 }
 0x15e   : >>> { %v593_v57 = vmul.f32 %v1611_v49, %v592_v53 }
 0x160   : >>> { %v594_v59 = vadd.f32 %v1611_v49, %v593_v57 }
 0x162   : >>> { %v598_v60 = vsel %vm597_vm1, %v1611_v49, %v594_v59  ;;  %vm789_vm1 = vcmp.eq.s32.totalorder %v1878_v6, 0 }
 0x163   : >>> { %v603_v61 = vsel %vm600_vm3, %v602_v58, %v598_v60  ;;  %vm793_vm3 = vcmp.eq.s32.totalorder %v1878_v6, 1  ;;  %v387_v6 = vmov (%p483_p9), %v1878_v6 }
 0x164   : >>> { %v610_v62 = vsel %vm609_vm4, 0.0, %v603_v61  ;;  %vm402_vm4 = vcmp.eq.s32.totalorder (%p483_p9), %v390_v7, %v387_v6  ;;  %v406_v6 = vmov (%p483_p9), %v1878_v6  ;;  %v409_v7 = vmov (%p483_p9), %v1880_v7 }
 0x165   : >>> { %v611_v63 = vmul.f32 %v610_v62, %v610_v62  ;;  %v624_v0 = vmul.f32 %v610_v62, %v1929_v16  ;;  %v423_v6 = vmov (%p483_p9), %v1878_v6  ;;  %v426_v7 = vmov (%p483_p9), %v1880_v7 }
 0x166   : >> { %v440_v6 = vmov (%p483_p9), %v1878_v6  ;;  %v443_v7 = vmov (%p483_p9), %v1880_v7 }
 0x167   : >>> { %v612_v1 = vadd.f32 1.0, %v611_v63  ;;  %v625_v2 = vsub.f32 %v550_v23, %v624_v0  ;;  %v627_v3 = vadd.f32 %v624_v0, %v554_v24  ;;  %v898_v23 = vld [vmem:[%s1944_s30] sm:$0xf] }
 0x168   : >>> { %v899_v24 = vld [vmem:[%s1946_s28] sm:$0xf] }
 0x169   : >>> { %1612 = vrsqrt.f32 %v612_v1  ;;  %629 = vst [vmem:[%s628_s26] sm:$0xff] %v625_v2  ;;  %vm619_vm5 = vweird.f32 %v612_v1  ;;  %s649_s26 = smov [#allocation34] }
 0x16a   : >>> { %631 = vst [vmem:[%s630_s21] sm:$0xff] %v627_v3  ;;  %s664_s21 = smov [#allocation35] }
 0x16f   : >>> { %v1613_v4 = vpop.eup %1612 }
 0x170   : >>> { %v614_v5 = vmul.f32 %v1613_v4, %v612_v1  ;;  %vm620_vm6 = vweird.f32 %v1613_v4 }
 0x171   : >>> { %vm621_vm7 = vmor %vm619_vm5, %vm620_vm6  ;;  %vm455_vm5 = vcmp.eq.s32.totalorder (%p483_p9), %v443_v7, %v440_v6 }
 0x172   : >>> { %v615_v8 = vmul.f32 %v1613_v4, %v614_v5 }
 0x174   : >>> { %v616_v9 = vmul.f32 0.5, %v615_v8 }
 0x176   : >>> { %v617_v10 = vsub.f32 1.5, %v616_v9 }
 0x178   : >>> { %v618_v11 = vmul.f32 %v1613_v4, %v617_v10 }
 0x17a   : >>> { %v622_v12 = vsel %vm621_vm7, %v1613_v4, %v618_v11 }
 0x17b   : >>> { %633 = vst [vmem:[%s632_s24] sm:$0xff] %v622_v12  ;;  %v623_v13 = vmul.f32 %v622_v12, %v610_v62  ;;  %s666_s24 = smov [#allocation34] }
 0x17d   : >>> { %635 = vst [vmem:[%s634_s16] sm:$0xff] %v623_v13  ;;  %s1938_s16 = smov [#allocation23] }
 0x17e   : >>> { %v674_v26 = vld [vmem:[%s1938_s16] sm:$0xf] }
 0x182   : >>> { %v637_v14 = vld [vmem:[%s636_s17] ss:$0 sm:$0xff]  ;;  %s1940_s17 = smov [#allocation24] }
 0x183   : >>> { %v646_v15 = vsel %vm645_vm8, %v637_v14, 0.0  ;;  %v675_v20 = vld [vmem:[%s1940_s17] sm:$0xf] }
 0x184   : >>> { %647 = vadd.xlane.f32.xlu0 %v646_v15  ;;  %v652_v16 = vld [vmem:[%s651_s18] ss:$0 sm:$0xff]  ;;  %s890_s18 = smov [#allocation34] }
 0x185   : >>> { %v661_v17 = vsel %vm660_vm9, %v652_v16, 0.0 }
 0x18c   : >>> { %662 = vadd.xlane.f32.xlu0 %v661_v17 }
 0x1f7   : >>> { %v648_v18 = vpop.xlane.xlu0 %647 }
 0x1f8   : >>> { %650 = vst [vmem:[%s649_s26] sm:$0xff] %v648_v18  ;;  %s1948_s26 = smov [#allocation26] }
 0x1f9   : >>> { %v677_v27 = vld [vmem:[%s1948_s26] sm:$0xf] }
 0x1ff   : >>> { %v663_v19 = vpop.xlane.xlu0 %662  ;;  %v667_v22 = vld [vmem:[%s666_s24] sm:$0xff]  ;;  %s694_s24 = smov [#allocation32] }
 0x200   : >>> { %665 = vst [vmem:[%s664_s21] sm:$0xff] %v663_v19  ;;  %s668_s21 = smov [#allocation35]  ;;  %v891_v25 = vld [vmem:[%s890_s18] sm:$0xff]  ;;  %v681_v29 = vmul.f32 %v675_v20, %v667_v22  ;;  %v685_v30 = vmul.f32 %v676_v21, %v667_v22  ;;  %v678_v50 = vmul.f32 %v674_v26, %v667_v22  ;;  %v688_v52 = vmul.f32 %v677_v27, %v667_v22  ;;  %s696_s18 = smov [#allocation33] }
 0x201   : >>> { %v902_v34 = vmul.f32 %v898_v23, %v891_v25  ;;  %v905_v35 = vmul.f32 %v899_v24, %v891_v25  ;;  %v909_v42 = vmul.f32 %v900_v28, %v891_v25  ;;  %v912_v46 = vmul.f32 %v901_v33, %v891_v25  ;;  %v695_v56 = vld [vmem:[%s694_s24] ss:$0 sm:$0xff]  ;;  %s763_s24 = smov [#allocation26] }
 0x202   : >>> { %v697_v57 = vld [vmem:[%s696_s18] ss:$0 sm:$0xff]  ;;  %s750_s18 = smov [#allocation25] }
 0x207   : >>> { %v669_v31 = vld [vmem:[%s668_s21] sm:$0xff]  ;;  %s1970_s21 = smov [#allocation25] }
 0x208   : >>> { %v893_v32 = vld [vmem:[%s892_s27] sm:$0xff]  ;;  %v682_v36 = vmul.f32 %v677_v27, %v669_v31  ;;  %v684_v37 = vmul.f32 %v674_v26, %v669_v31  ;;  %v679_v43 = vmul.f32 %v676_v21, %v669_v31  ;;  %v687_v47 = vmul.f32 %v675_v20, %v669_v31  ;;  %s1965_s27 = smov [#allocation12] }
 0x209   : >>> { %v903_v38 = vmul.f32 %v900_v28, %v893_v32  ;;  %v906_v39 = vmul.f32 %v901_v33, %v893_v32  ;;  %v908_v40 = vmul.f32 %v898_v23, %v893_v32  ;;  %v911_v41 = vmul.f32 %v899_v24, %v893_v32 }
 0x20a   : >>> { %v683_v44 = vsub.f32 %v681_v29, %v682_v36  ;;  %v686_v45 = vadd.f32 %v685_v30, %v684_v37  ;;  %v680_v54 = vsub.f32 %v678_v50, %v679_v43  ;;  %v689_v55 = vadd.f32 %v688_v52, %v687_v47 }
 0x20b   : >>> { %v904_v48 = vsub.f32 %v902_v34, %v903_v38  ;;  %v907_v49 = vsub.f32 %v905_v35, %v906_v39  ;;  %v910_v51 = vadd.f32 %v909_v42, %v908_v40  ;;  %v913_v53 = vadd.f32 %v912_v46, %v911_v41 }
 0x20c   : >>> { %691 = vst [vmem:[%s1940_s17] sm:$0xf] %v683_v44  ;;  %s1972_s17 = smov [#allocation24] }
 0x20d   : >>> { %692 = vst [vmem:[%s1942_s25] sm:$0xf] %v686_v45  ;;  %s919_s25 = smov [#allocation18] }
 0x20e   : >>> { %914 = vst [vmem:[%s1944_s30] sm:$0xf] %v904_v48  ;;  %s1974_s30 = smov [#allocation15] }
 0x20f   : >>> { %915 = vst [vmem:[%s1946_s28] sm:$0xf] %v907_v49  ;;  %s701_s28 = smov [#allocation26] }
 0x210   : >>> { %916 = vst [vmem:[%s1951_s23] sm:$0xf] %v910_v51  ;;  %s1982_s23 = smov [#allocation23] }
 0x211   : >>> { %917 = vst [vmem:[%s1954_s0] sm:$0xf] %v913_v53  ;;  %s1979_s0 = smov [#allocation20] }
 0x212   : >>> { %690 = vst [vmem:[%s1938_s16] sm:$0xf] %v680_v54  ;;  %s723_s16 = smov [#allocation30] }
 0x213   : >>> { %693 = vst [vmem:[%s1948_s26] sm:$0xf] %v689_v55  ;;  %v703_v59 = vld [vmem:[%s1972_s17] sm:$0xf]  ;;  %s764_s26 = smov [#allocation31] }
 0x214   : >>> { %v704_v58 = vld [vmem:[%s1970_s21] sm:$0xf]  ;;  %v707_v10 = vmul.f32 %v703_v59, %v697_v57  ;;  %v710_v16 = vmul.f32 %v703_v59, %v695_v56 }
 0x215   : >>> { %v920_v60 = vld [vmem:[%s1965_s27] ss:$0 sm:$0xff]  ;;  %v1529_v62 = vld [vmem:[%s1965_s27 + $0x3] ss:$0 sm:$0xff]  ;;  %v715_v13 = vmul.f32 %v704_v58, %v697_v57  ;;  %v712_v14 = vmul.f32 %v704_v58, %v695_v56 }
 0x216   : >>> { %v1528_v61 = vld [vmem:[%s1965_s27 - $0x1] sm:$0xe]  ;;  %v1533_v2 = vld [vmem:[%s1974_s30 + $0x3] ss:$0 sm:$0xff] }
 0x217   : >>> { %v927_v63 = vsel %vm850_vm10, %v920_v60, %v1528_v61  ;;  %v944_v0 = vld [vmem:[%s1974_s30] ss:$0 sm:$0xff]  ;;  %v1531_v4 = vld [vmem:[%s919_s25 + $0x1] sm:$0x7] }
 0x218   : >>> { %v1532_v1 = vld [vmem:[%s1974_s30 - $0x1] sm:$0xe]  ;;  %930 = vst [vmem:[%s1965_s27] sm:$0xf] %v927_v63  ;;  %v939_v8 = vsel %vm862_vm11, %v1529_v62, %v1531_v4 }
 0x219   : >>> { %v931_v3 = vld [vmem:[%s919_s25] ss:$0 sm:$0xff]  ;;  %v951_v5 = vsel %vm850_vm10, %v944_v0, %v1532_v1  ;;  %v1535_v9 = vld [vmem:[%s1979_s0 + $0x1] sm:$0x7] }
 0x21a   : >>> { %1530 = vst [vmem:[%s1965_s27 + $0x1] sm:$0x1] %v931_v3  ;;  %v955_v11 = vld [vmem:[%s1979_s0] ss:$0 sm:$0xff]  ;;  %v963_v12 = vsel %vm862_vm11, %v1533_v2, %v1535_v9  ;;  %s722_s27 = smov [#allocation23] }
 0x21b   : >>> { %941 = vst [vmem:[%s919_s25] sm:$0xf] %v939_v8  ;;  %v702_v15 = vld [vmem:[%s1982_s23] sm:$0xf]  ;;  %s2021_s25 = smov [#allocation26] }
 0x21c   : >>> { %954 = vst [vmem:[%s1974_s30] sm:$0xf] %v951_v5  ;;  %v705_v17 = vld [vmem:[%s701_s28] sm:$0xf]  ;;  %v706_v18 = vmul.f32 %v702_v15, %v695_v56  ;;  %v709_v19 = vmul.f32 %v702_v15, %v697_v57 }
 0x21d   : >>> { %1534 = vst [vmem:[%s1974_s30 + $0x1] sm:$0x1] %v955_v11  ;;  %v716_v20 = vmul.f32 %v705_v17, %v695_v56  ;;  %v713_v21 = vmul.f32 %v705_v17, %v697_v57  ;;  %v730_v26 = vld [vmem:[%s723_s16] ss:$0 sm:$0xff]  ;;  %s2023_s30 = smov [#allocation25]  ;;  %s2033_s16 = smov [#allocation24] }
 0x21e   : >>> { %965 = vst [vmem:[%s1979_s0] sm:$0xf] %v963_v12  ;;  %v708_v22 = vsub.f32 %v706_v18, %v707_v10  ;;  %v711_v25 = vadd.f32 %v710_v16, %v709_v19  ;;  %v771_v27 = vld [vmem:[%s764_s26] ss:$0 sm:$0xff]  ;;  %s1763_s0 = smov 1   ;;  %s843_s26 = smov [#allocation25] }
 0x21f   : >>> { %v717_v23 = vadd.f32 %v716_v20, %v715_v13  ;;  %v714_v24 = vsub.f32 %v712_v14, %v713_v21 }
 0x220   : >>> { %718 = vst [vmem:[%s1982_s23] sm:$0xf] %v708_v22  ;;  %s779_s23 = smov [#allocation24] }
 0x221   : >>> { %721 = vst [vmem:[%s701_s28] sm:$0xf] %v717_v23  ;;  %s1764_s28 = smov 127  }
 0x222   : >>> { %720 = vst [vmem:[%s1970_s21] sm:$0xf] %v714_v24  ;;  %s737_s21 = smov [#allocation24] }
 0x223   : >>> { %719 = vst [vmem:[%s1972_s17] sm:$0xf] %v711_v25  ;;  %s2019_s17 = smov [#allocation23] }
 0x227   : >>> { %v731_v28 = vld [vmem:[%s722_s27] sm:$0xf] }
 0x228   : >>> { %v772_v29 = vld [vmem:[%s763_s24] sm:$0xf]  ;;  %v735_v30 = vsel %vm734_vm12, %v730_v26, %v731_v28 }
 0x229   : >>> { %v776_v31 = vsel %vm775_vm13, %v771_v27, %v772_v29  ;;  %v757_v32 = vld [vmem:[%s750_s18] sm:$0xf]  ;;  %736 = vst [vmem:[%s722_s27] sm:$0xf] %v735_v30  ;;  %s842_s27 = smov [#allocation23] }
 0x22a   : >>> { %777 = vst [vmem:[%s763_s24] sm:$0xf] %v776_v31  ;;  %v761_v33 = vsel %vm760_vm14, 0.0, %v757_v32  ;;  %v744_v34 = vld [vmem:[%s737_s21] sm:$0xf]  ;;  %s867_s24 = smov [#allocation26] }
 0x22b   : >>> { %762 = vst [vmem:[%s750_s18] sm:$0xf] %v761_v33  ;;  %v748_v35 = vsel %vm747_vm15, 0.0, %v744_v34  ;;  %s966_s18 = sadd.s32 (%p483_p9), 1, %s1756_s29  }
 0x22c   : >>> { %749 = vst [vmem:[%s737_s21] sm:$0xf] %v748_v35  ;;  %s391_s21 = smov (%p483_p9), [#allocation23]  ;;  %p479_p10 = scmp.ge.s32.totalorder (%p483_p9), %s966_s18, 15 }
 0x22d   : >> { %s2220_s29 = smov (%p483_p9), %s966_s18 }
 0x230   : >>> { %v784_v36 = vld [vmem:[%s2019_s17] sm:$0xf] }
 0x231   : >>> { %v812_v37 = vld [vmem:[%s2021_s25] sm:$0xf]  ;;  %785 = vrot.lane.b32.xlu1 %v784_v36, %s1763_s0 }
 0x232   : >>> { %813 = vrot.lane.b32.xlu0 %v812_v37, %s1763_s0  ;;  %v816_v38 = vld [vmem:[%s2023_s30] sm:$0xf] }
 0x233   : >>> { %817 = vrot.lane.b32.xlu2 %v816_v38, %s1763_s0  ;;  %v780_v39 = vld [vmem:[%s779_s23] sm:$0xf] }
 0x234   : >>> { %v801_v40 = vld [vmem:[%s779_s23] sm:$0xf] }
 0x235   : >>> { %v833_v41 = vld [vmem:[%s2021_s25] sm:$0xf] }
 0x236   : >>> { %v783_v44 = vld [vmem:[%s2019_s17] sm:$0xf] }
 0x237   : >>> { %v815_v55 = vld [vmem:[%s2023_s30] sm:$0xf] }
 0x239   : >>> { %781 = vrot.lane.b32.xlu1 %v780_v39, %s1763_s0 }
 0x23b   : >>> { %802 = vrot.lane.b32.xlu2 %v801_v40, %s1764_s28 }
 0x241   : >>> { %834 = vrot.lane.b32.xlu1 %v833_v41, %s1764_s28 }
 0x28d   : >>> { %v818_v42 = vpop.permute.xlu2 %817 }
 0x28e   : >>> { %v822_v51 = vsel %vm789_vm1, %v816_v38, %v818_v42 }
 0x295   : >>> { %v803_v43 = vpop.permute.xlu2 %802 }
 0x296   : >>> { %v807_v45 = vsel %vm806_vm0, %v783_v44, %v803_v43 }
 0x297   : >>> { %809 = vst [vmem:[%s779_s23] sm:$0xf] %v807_v45 }
 0x29e   : >>> { %v868_v46 = vld [vmem:[%s2033_s16] ss:$0 sm:$0xff]  ;;  %v1525_v48 = vld [vmem:[%s2033_s16 + $0x3] ss:$0 sm:$0xff] }
 0x29f   : >>> { %v1524_v47 = vld [vmem:[%s2033_s16 - $0x1] sm:$0xe] }
 0x2a0   : >>> { %v875_v49 = vsel %vm850_vm10, %v868_v46, %v1524_v47 }
 0x2a1   : >>> { %878 = vst [vmem:[%s2033_s16] sm:$0xf] %v875_v49 }
 0x2a3   : >>> { %v786_v50 = vpop.permute.xlu1 %785 }
 0x2a4   : >>> { %v814_v52 = vpop.permute.xlu0 %813  ;;  %v790_v56 = vsel %vm789_vm1, %v784_v36, %v786_v50 }
 0x2a5   : >>> { %v826_v53 = vsel %vm793_vm3, %v814_v52, %v822_v51 }
 0x2a6   : >>> { %v832_v54 = vsel %vm1389_vm2, %v826_v53, 0.0 }
 0x2a7   : >>> { %840 = vst [vmem:[%s2023_s30] sm:$0xf] %v832_v54  ;;  %s444_s30 = smov (%p483_p9), [#allocation26] }
 0x2ab   : >>> { %v782_v57 = vpop.permute.xlu1 %781 }
 0x2ac   : >>> { %v794_v58 = vsel %vm793_vm3, %v782_v57, %v790_v56 }
 0x2ad   : >>> { %v800_v59 = vsel %vm1389_vm2, %v794_v58, 0.0 }
 0x2ae   : >>> { %808 = vst [vmem:[%s2019_s17] sm:$0xf] %v800_v59  ;;  %v1523_v61 = vld [vmem:[%s843_s26 + $0x1] sm:$0x7]  ;;  %v855_v4 = vld [vmem:[%s843_s26] ss:$0 sm:$0xff]  ;;  %s410_s17 = smov (%p483_p9), [#allocation24] }
 0x2b3   : >>> { %v835_v60 = vpop.permute.xlu1 %834 }
 0x2b4   : >>> { %v839_v62 = vsel %vm806_vm0, %v815_v55, %v835_v60 }
 0x2b5   : >>> { %v844_v63 = vld [vmem:[%s842_s27] ss:$0 sm:$0xff]  ;;  %v1521_v1 = vld [vmem:[%s842_s27 + $0x3] ss:$0 sm:$0xff]  ;;  %841 = vst [vmem:[%s2021_s25] sm:$0xf] %v839_v62  ;;  %s427_s25 = smov (%p483_p9), [#allocation25] }
 0x2b6   : >>> { %v1520_v0 = vld [vmem:[%s842_s27 - $0x1] sm:$0xe]  ;;  %v863_v3 = vsel %vm862_vm11, %v1521_v1, %v1523_v61 }
 0x2b7   : >>> { %v851_v2 = vsel %vm850_vm10, %v844_v63, %v1520_v0  ;;  %865 = vst [vmem:[%s843_s26] sm:$0xf] %v863_v3 }
 0x2b8   : >>> { %854 = vst [vmem:[%s842_s27] sm:$0xf] %v851_v2 }
 0x2b9   : >>> { %1522 = vst [vmem:[%s842_s27 + $0x1] sm:$0x1] %v855_v4 }
 0x2bc   : >>> { %v879_v5 = vld [vmem:[%s867_s24] ss:$0 sm:$0xff]  ;;  %v1527_v8 = vld [vmem:[%s867_s24 + $0x1] sm:$0x7] }
 0x2bd   : >>> { %1526 = vst [vmem:[%s2033_s16 + $0x1] sm:$0x1] %v879_v5  ;;  %v887_v9 = vsel %vm862_vm11, %v1525_v48, %v1527_v8  ;;  %485 = sbr.rel (!%p483_p9) target bundleno = 264 (0x108), region = 344 }
 0x2be   : >>> { %889 = vst [vmem:[%s867_s24] sm:$0xf] %v887_v9  ;;  %v433_v14 = vld [vmem:[%s427_s25] sm:$0xf] (%p483_p9) }
 0x2bf   : >> { %v434_v18 = vsel (%p483_p9), %vm1389_vm2, %v433_v14, 0.0 }
 0x2c0   : >> { %v397_v10 = vld [vmem:[%s391_s21] sm:$0xf] (%p483_p9)  ;;  %v435_v20 = vmul.f32 (%p483_p9), %v434_v18, %v434_v18 }
 0x2c1   : >> { %v398_v12 = vsel (%p483_p9), %vm1389_vm2, %v397_v10, 0.0 }
 0x2c2   : >> { %v399_v16 = vmul.f32 %v398_v12, %v398_v12 }
 0x2c4   : >> { %v416_v11 = vld [vmem:[%s410_s17] sm:$0xf]  ;;  %v403_v23 = vsel %vm402_vm4, 0.0, %v399_v16 }
 0x2c5   : >> { %v417_v13 = vsel %vm1389_vm2, %v416_v11, 0.0  ;;  %v450_v15 = vld [vmem:[%s444_s30] sm:$0xf] }
 0x2c6   : >> { %v418_v17 = vmul.f32 %v417_v13, %v417_v13  ;;  %v451_v19 = vsel %vm1389_vm2, %v450_v15, 0.0 }
 0x2c7   : >> { %v452_v22 = vmul.f32 %v451_v19, %v451_v19 }
 0x2c8   : >> { %v420_v21 = vadd.f32 %v418_v17, %v399_v16  ;;  %v419_v25 = vadd.f32 %v418_v17, %v403_v23 }
 0x2c9   : >> { %v456_v28 = vsel %vm455_vm5, 0.0, %v452_v22 }
 0x2ca   : >> { %v437_v24 = vadd.f32 %v435_v20, %v420_v21  ;;  %v436_v27 = vadd.f32 %v435_v20, %v419_v25 }
 0x2cc   : >> { %v458_v26 = vadd.f32 %v452_v22, %v437_v24  ;;  %v457_v29 = vadd.f32 %v456_v28, %v436_v27 }
 0x2ce   : >> { %459 = vadd.xlane.f32.xlu0 %v458_v26 }
 0x2d6   : >> { %467 = vadd.xlane.f32.xlu0 %v457_v29 }
 0x341   : >> { %v460_v30 = vpop.xlane.xlu0 %459 }
 0x342   : >> { %v461_v31 = vrot.slane %v460_v30, 4 }
 0x344   : >> { %v462_v32 = vadd.f32 %v461_v31, %v460_v30 }
 0x346   : >> { %v463_v33 = vrot.slane %v462_v32, 2 }
 0x348   : >> { %v464_v37 = vadd.f32 %v463_v33, %v462_v32 }
 0x349   : >> { %v468_v34 = vpop.xlane.xlu0 %467 }
 0x34a   : >> { %v469_v35 = vrot.slane %v468_v34, 4  ;;  %v465_v40 = vrot.slane %v464_v37, 1 }
 0x34c   : >> { %v470_v36 = vadd.f32 %v469_v35, %v468_v34  ;;  %v466_v43 = vadd.f32 %v465_v40, %v464_v37 }
 0x34e   : >> { %v471_v38 = vrot.slane %v470_v36, 2 }
 0x350   : >> { %v472_v39 = vadd.f32 %v471_v38, %v470_v36 }
 0x352   : >> { %v473_v41 = vrot.slane %v472_v39, 1 }
 0x354   : >> { %v474_v42 = vadd.f32 %v473_v41, %v472_v39 }
 0x356   : >> { %1554 = vpush %v474_v42 }
 0x357   : >> { %1556 = vpush %v466_v43 }
 0x387   : >> { %s1555_s15 = spop %1554 }
 0x388   : >> { %s1557_s0 = spop %1556 }
 0x389   : >> { %s477_s23 = smul.f32 1e-10, %s1557_s0 }
 0x38b   : >> { %p478_p11 = scmp.le.f32.partialorder %s1555_s15, %s477_s23 }
 0x38d   : >> { %p480_p12 = por %p479_p10, %p478_p11 }
 0x38f   : > { %968 = sbr.rel (!%p480_p12) target bundleno = 263 (0x107), region = 355 }
 0x394 PF: > { %s973_s28 = smov [#allocation23]  ;;  %v977_v6 = vmov %v1878_v6  ;;  %v980_v7 = vmov %v1880_v7  ;;  %v1027_v44 = vld [vmem:[#allocation12] sm:$0xf]  ;;  %v1033_v45 = vld [vmem:[#allocation15] sm:$0xf]  ;;  %s2221_s29 = scalar_lea.vmem [#allocation13], %s1874_s19 }
 0x395   : > { %v997_v6 = vmov %v1878_v6  ;;  %v1000_v7 = vmov %v1880_v7  ;;  %v981_v46 = vld [vmem:[%s973_s28] sm:$0xf]  ;;  %vm984_vm6 = vcmp.eq.s32.totalorder %v980_v7, %v977_v6  ;;  %1030 = vst [vmem:[%s2221_s29] sm:$0xf] %v1027_v44  ;;  %s993_s16 = smov [#allocation26]  ;;  %s2222_s26 = scalar_lea.vmem [#allocation16], %s1874_s19 }
 0x396   : > { %vm1004_vm7 = vcmp.eq.s32.totalorder %v1000_v7, %v997_v6  ;;  %v985_v47 = vsel %vm984_vm6, %v981_v46, 0.0  ;;  %1036 = vst [vmem:[%s2222_s26] sm:$0xf] %v1033_v45  ;;  %v1039_v48 = vld [vmem:[#allocation18] sm:$0xf]  ;;  %v1001_v50 = vld [vmem:[%s993_s16] sm:$0xf] }
 0x397   : > { %v986_v49 = vrot.slane %v985_v47, 4  ;;  %s2223_s27 = scalar_lea.vmem [#allocation19], %s1874_s19  ;;  %v1045_v51 = vld [vmem:[#allocation20] sm:$0xf]  ;;  %v1005_v52 = vsel %vm1004_vm7, %v1001_v50, 0.0  ;;  %s2224_s24 = scalar_lea.vmem [#allocation21], %s1874_s19 }
 0x398   : > { %1042 = vst [vmem:[%s2223_s27] sm:$0xf] %v1039_v48  ;;  %v1006_v54 = vrot.slane %v1005_v52, 4  ;;  %s969_s18 = sand.u32 7, %s1831_s12   ;;  %s2225_s25 = scalar_lea.vmem [#allocation9], %s1876_s22 }
 0x399   : > { %1048 = vst [vmem:[%s2224_s24] sm:$0xf] %v1045_v51  ;;  %v987_v53 = vadd.f32 %v986_v49, %v985_v47  ;;  %s970_s21 = scalar_lea.vmem [#allocation8], %s969_s18  ;;  %s972_s17 = scalar_lea.vmem [#allocation10], %s969_s18 }
 0x39a   : > { %v1007_v6 = vadd.f32 %v1006_v54, %v1005_v52  ;;  %s974_s21 = smov %s970_s21  ;;  %s994_s17 = smov %s972_s17 }
 0x39b   : > { %v988_v55 = vrot.slane %v987_v53, 2  ;;  %s2226_s30 = scalar_lea.vmem [#allocation11], %s1876_s22  ;;  %s1080_s28 = sshrl.u32 (%p1846_p3), %s1831_s12, 3 }
 0x39c   : > { %v1008_v56 = vrot.slane %v1007_v6, 2  ;;  %s2227_s29 = scalar_lea.vmem (%p1846_p3), [#allocation9], %s1876_s22  ;;  %s1542_s16 = sshll.u32 (%p1846_p3), %s1080_s28, 1 }
 0x39d   : > { %v989_v7 = vadd.f32 %v988_v55, %v987_v53  ;;  %s1082_s24 = scalar_lea.vmem (%p1846_p3), %s2210_s4, %s1542_s16 }
 0x39e   : > { %v1009_v58 = vadd.f32 %v1008_v56, %v1007_v6 }
 0x39f   : > { %v990_v57 = vrot.slane %v989_v7, 1 }
 0x3a0   : > { %v1010_v60 = vrot.slane %v1009_v58, 1 }
 0x3a1   : > { %v991_v59 = vadd.f32 %v990_v57, %v989_v7 }
 0x3a2   : > { %v1011_v61 = vadd.f32 %v1010_v60, %v1009_v58 }
 0x3a3   : > { %992 = vst [vmem:[%s974_s21] sm:$0x1] %v991_v59 }
 0x3a4   : > { %1012 = vst [vmem:[%s994_s17] sm:$0x1] %v1011_v61 }
 0x3a8   : > { %1079 = sbr.rel (!%p1846_p3) target bundleno = 948 (0x3b4), region = 158 }
 0x3aa   : > { %v1015_v62 = vld [vmem:[#allocation8] sm:$0x3] }
 0x3ab   : > { %1018 = vst [vmem:[%s2225_s25] sm:$0x3] %v1015_v62  ;;  %v1021_v63 = vld [vmem:[#allocation10] sm:$0x3] }
 0x3ac   : > { %1024 = vst [vmem:[%s2226_s30] sm:$0x3] %v1021_v63 }
 0x3b2   : > { %v1099_v0 = vld [vmem:[%s2227_s29] sm:$0x3] }
 0x3b3   : > { %1100 = vst [vmem:[%s1082_s24] sm:$0x3] %v1099_v0 }
 0x3b4 PF: > { %1118 = sbr.rel (!%p1846_p3) target bundleno = 956 (0x3bc), region = 192  ;;  %s1119_s18 = sshrl.u32 (%p1846_p3), %s1831_s12, 3 }
 0x3b5   : > { %s2228_s21 = scalar_lea.vmem (%p1846_p3), [#allocation11], %s1876_s22  ;;  %s1543_s17 = sshll.u32 (%p1846_p3), %s1119_s18, 1 }
 0x3b6   : > { %s1121_s29 = scalar_lea.vmem (%p1846_p3), %s2211_s5, %s1543_s17 }
 0x3ba   : > { %v1138_v1 = vld [vmem:[%s2228_s21] sm:$0x3] }
 0x3bb   : > { %1139 = vst [vmem:[%s1121_s29] sm:$0x3] %v1138_v1 }
 0x3bc PF: > { %s2124_s28 = sshll.u32 %s1831_s12, 2  ;;  %s2229_s16 = scalar_lea.vmem [#allocation16], %s1874_s19 }
 0x3bd   : > { %s1171_s20 = sshll.u32 %s2229_s16, 4  ;;  %s1169_s22 = scalar_lea.hbm %s2213_s7, %s2124_s28  ;;  %s1172_s20 = int_to_ptr.vmem [resolvable:$true] %s1171_s20 }
 0x3be   : > { %s1173_s24 = sshll.u32 %s1169_s22, 4  ;;  %s1158_s17 = scalar_lea.hbm %s2212_s6, %s2124_s28  ;;  %s1174_s24 = int_to_ptr.hbm [resolvable:$true] %s1173_s24 }
 0x3bf   : > { %s2230_s25 = scalar_lea.vmem [#allocation13], %s1874_s19  ;;  %s1626_s29 = sshra.s32 %s1174_s24, 4  ;;  %s1627_s29 = int_to_ptr.hbm [resolvable:$true] %s1626_s29 }
 0x3c0   : > { %s1160_s30 = sshll.u32 %s2230_s25, 4  ;;  %s1628_s12 = scalar_lea.hbm %s1627_s29, 4  ;;  %s1161_s30 = int_to_ptr.vmem [resolvable:$true] %s1160_s30 }
 0x3c1   : > { %p1629_p13 = scmp.ne.s32.totalorder %s1627_s29, %s1628_s12  ;;  %s1630_s16 = scalar_lea.hbm %s2213_s7, 8 }
 0x3c2   : > { %p1631_p0 = scmp.lt.s32.totalorder %s1627_s29, %s2213_s7  ;;  %p1632_p1 = scmp.lt.s32.totalorder %s1630_s16, %s1628_s12 }
 0x3c4   : > { %p1633_p2 = por %p1632_p1, %p1631_p0 }
 0x3c6   : > { %p1634_p3 = pnand %p1633_p2, %p1629_p13 }
 0x3c8   : > { %1637 = shalt.err (!%p1634_p3)
}
 0x3c9   : > { %s2231_s27 = scalar_lea.sflag [#allocation17], %s1870_s13  ;;  %s1162_s22 = sshll.u32 %s1158_s17, 4  ;;  %s1163_s22 = int_to_ptr.hbm [resolvable:$true] %s1162_s22 }
 0x3ca   : > { %1176 = dma.vmem_to_hbm [thread:$0]  %s1172_s20, 64, %s1174_s24, %s2231_s27  }
 0x3cb   : > { %s1180_s15 = scalar_lea.hbm %s2214_s8, %s2124_s28  ;;  %s1650_s23 = sshra.s32 %s1163_s22, 4  ;;  %s1651_s23 = int_to_ptr.hbm [resolvable:$true] %s1650_s23 }
 0x3cc   : > { %s1652_s25 = scalar_lea.hbm %s1651_s23, 4  ;;  %s1654_s12 = scalar_lea.hbm %s2212_s6, 8 }
 0x3cd   : > { %p1653_p5 = scmp.ne.s32.totalorder %s1651_s23, %s1652_s25  ;;  %p1655_p6 = scmp.lt.s32.totalorder %s1651_s23, %s2212_s6 }
 0x3ce   : > { %p1656_p7 = scmp.lt.s32.totalorder %s1654_s12, %s1652_s25 }
 0x3d0   : > { %p1657_p8 = por %p1656_p7, %p1655_p6 }
 0x3d2   : > { %p1658_p9 = pnand %p1657_p8, %p1653_p5 }
 0x3d4   : > { %1661 = shalt.err (!%p1658_p9)
}
 0x3d5   : > { %s2232_s20 = scalar_lea.sflag [#allocation14], %s1870_s13  ;;  %s2233_s24 = scalar_lea.vmem [#allocation19], %s1874_s19 }
 0x3d6   : > { %1165 = dma.vmem_to_hbm [thread:$0]  %s1161_s30, 64, %s1163_s22, %s2232_s20  }
 0x3d7   : > { %s1182_s17 = sshll.u32 %s2233_s24, 4  ;;  %s1184_s27 = sshll.u32 %s1180_s15, 4  ;;  %s1183_s17 = int_to_ptr.vmem [resolvable:$true] %s1182_s17  ;;  %s1185_s27 = int_to_ptr.hbm [resolvable:$true] %s1184_s27 }
 0x3d8   : > { %s1674_s18 = sshra.s32 %s1185_s27, 4  ;;  %s1678_s23 = scalar_lea.hbm %s2214_s8, 8  ;;  %s1675_s18 = int_to_ptr.hbm [resolvable:$true] %s1674_s18 }
 0x3d9   : > { %s1676_s21 = scalar_lea.hbm %s1675_s18, 4  ;;  %p1679_p11 = scmp.lt.s32.totalorder %s1675_s18, %s2214_s8 }
 0x3da   : > { %p1677_p10 = scmp.ne.s32.totalorder %s1675_s18, %s1676_s21  ;;  %p1680_p12 = scmp.lt.s32.totalorder %s1678_s23, %s1676_s21 }
 0x3dc   : > { %p1681_p13 = por %p1680_p12, %p1679_p11 }
 0x3de   : > { %p1682_p0 = pnand %p1681_p13, %p1677_p10 }
 0x3e0   : > { %1685 = shalt.err (!%p1682_p0)
}
 0x3e1   : > { %s2234_s30 = scalar_lea.sflag [#allocation17], %s1870_s13  ;;  %s1191_s16 = scalar_lea.hbm %s2215_s9, %s2124_s28 }
 0x3e2   : > { %1187 = dma.vmem_to_hbm [thread:$0]  %s1183_s17, 64, %s1185_s27, %s2234_s30  }
 0x3e3   : > { %s2235_s26 = scalar_lea.vmem [#allocation21], %s1874_s19  ;;  %s1195_s24 = sshll.u32 %s1191_s16, 4  ;;  %s1196_s24 = int_to_ptr.hbm [resolvable:$true] %s1195_s24 }
 0x3e4   : > { %s1193_s20 = sshll.u32 %s2235_s26, 4  ;;  %s1698_s0 = sshra.s32 %s1196_s24, 4  ;;  %s1194_s20 = int_to_ptr.vmem [resolvable:$true] %s1193_s20  ;;  %s1699_s0 = int_to_ptr.hbm [resolvable:$true] %s1698_s0 }
 0x3e5   : > { %s1700_s18 = scalar_lea.hbm %s1699_s0, 4  ;;  %s1702_s23 = scalar_lea.hbm %s2215_s9, 8 }
 0x3e6   : > { %p1701_p1 = scmp.ne.s32.totalorder %s1699_s0, %s1700_s18  ;;  %p1703_p2 = scmp.lt.s32.totalorder %s1699_s0, %s2215_s9 }
 0x3e7   : > { %p1704_p3 = scmp.lt.s32.totalorder %s1702_s23, %s1700_s18 }
 0x3e9   : > { %p1705_p5 = por %p1704_p3, %p1703_p2 }
 0x3eb   : > { %p1706_p6 = pnand %p1705_p5, %p1701_p1 }
 0x3ed   : > { %1709 = shalt.err (!%p1706_p6)
}
 0x3ee   : > { %s2236_s19 = scalar_lea.sflag [#allocation22], %s1870_s13 }
 0x3ef   : > { %1198 = dma.vmem_to_hbm [thread:$0]  %s1194_s20, 64, %s1196_s24, %s2236_s19  }
 0x3f0 PF: > { %s2237_s28 = sadd.s32 4294967294, %s1752_s11  }
 0x3f1   : > { %s1218_s17 = sand.u32 1, %s2237_s28  }
 0x3f2   : > { %s1219_s27 = scalar_lea.sflag [#allocation14], %s1218_s17 }
 0x3f3   : > { %1731 = dma.done.wait (%p1500_p4), %s1219_s27, 64  }
 0x3f4   : > { %1733 = vsyncadd (%p1500_p4), %s1219_s27, 4294967232  ;;  %s1226_s30 = scalar_lea.sflag [#allocation17], %s1218_s17 }
 0x3f5   : > { %1735 = dma.done.wait (%p1500_p4), %s1226_s30, 128  }
 0x3f6   : > { %1737 = vsyncadd (%p1500_p4), %s1226_s30, 4294967168  ;;  %s1240_s13 = scalar_lea.sflag [#allocation22], %s1218_s17 }
 0x3f7   : > { %1739 = dma.done.wait (%p1500_p4), %s1240_s13, 64  }
 0x3f8   : > { %1741 = vsyncadd (%p1500_p4), %s1240_s13, 4294967232  ;;  %s2238_s22 = sld [smem:[#allocation39_spill]]  ;;  %p22_p7 = scmp.ge.s32.totalorder %s1835_s14, 4  }
 0x3f9   : > { %s2239_s30 = smov %s1748_s10  ;;  %s2241_s11 = smov %s1835_s14 }
 0x3fa   :  { %24 = sbr.rel (!%p22_p7) target bundleno = 9 (0x9), region = 366 }
 0x3fe   : > { %s2240_s10 = smov %s2238_s22 }
 0x3ff   :  { %1246 = vsyncpa [#allocation14], 1 }
 0x400   :  { %1248 = vsyncpa [#allocation14 + $0x1], 1 }
 0x401   :  { %1249 = vsyncpa [#allocation17], 1 }
 0x402   :  { %1251 = vsyncpa [#allocation17 + $0x1], 1 }
 0x403   :  { %1252 = vsyncpa [#allocation22], 1 }
 0x404   :  { %1254 = vsyncpa [#allocation22 + $0x1], 1 }

// kernel: forward.1
= control target key start
LH: loop header
LB: loop body
LE: loop exit
PB: predicated region body
PF: predicated region fallthrough
CT: control target
= control target key end

     0   :  { %s2046_s0 = inlined_call_operand.vmem [shape: f32[16,32], index: 0, kind: input, shape index: {}]   ;;  %s2047_s1 = inlined_call_operand.vmem [shape: f32[128,16], index: 1, kind: input, shape index: {}]   ;;  %s2048_s2 = inlined_call_operand.vmem [shape: f32[16,128], index: 2, kind: input, shape index: {}]   ;;  %s2049_s3 = inlined_call_operand.vmem [shape: f32[16,128], index: 3, kind: input, shape index: {}]   ;;  %s2050_s4 = inlined_call_operand.vmem [shape: f32[16,16], index: 4, kind: input, shape index: {}]   ;;  %s2051_s5 = inlined_call_operand.vmem [shape: f32[2,16], index: 5, kind: input, shape index: {}]   ;;  %s2052_s6 = inlined_call_operand.vmem [shape: f32[32,48], index: 6, kind: input, shape index: {}]   ;;  %s2053_s7 = inlined_call_operand.vmem [shape: f32[1,48], index: 7, kind: input, shape index: {}]   ;;  %s2054_s8 = inlined_call_operand.vmem [shape: f32[16,16], index: 8, kind: input, shape index: {}]   ;;  %s2055_s9 = inlined_call_operand.vmem [shape: f32[1,16], index: 9, kind: input, shape index: {}]   ;;  %s2056_s10 = inlined_call_operand.vmem [shape: f32[16,16], index: 10, kind: input, shape index: {}]   ;;  %s2057_s11 = inlined_call_operand.vmem [shape: f32[1,16], index: 11, kind: input, shape index: {}]   ;;  %s2058_s12 = inlined_call_operand.vmem [shape: f32[16,16], index: 12, kind: input, shape index: {}]   ;;  %s2059_s13 = inlined_call_operand.vmem [shape: f32[1,16], index: 13, kind: input, shape index: {}]   ;;  %s2060_s14 = inlined_call_operand.vmem [shape: f32[16,16], index: 14, kind: input, shape index: {}]   ;;  %s2061_s15 = inlined_call_operand.vmem [shape: f32[1,16], index: 15, kind: input, shape index: {}]   ;;  %s2062_s16 = inlined_call_operand.vmem [shape: f32[16,16], index: 16, kind: input, shape index: {}]   ;;  %s2063_s17 = inlined_call_operand.vmem [shape: f32[1,16], index: 17, kind: input, shape index: {}]   ;;  %s2064_s18 = inlined_call_operand.vmem [shape: f32[16,48], index: 18, kind: input, shape index: {}]   ;;  %s2065_s19 = inlined_call_operand.vmem [shape: f32[384,128], index: 19, kind: input, shape index: {}]   ;;  %s2066_s20 = inlined_call_operand.vmem [shape: f32[16,16], index: 20, kind: input, shape index: {}]   ;;  %s2067_s21 = inlined_call_operand.vmem [shape: f32[16,16], index: 21, kind: input, shape index: {}]   ;;  %s2068_s22 = inlined_call_operand.vmem [shape: f32[32,16], index: 22, kind: input, shape index: {}]   ;;  %s2069_s23 = inlined_call_operand.vmem [shape: f32[1,16], index: 23, kind: input, shape index: {}]   ;;  %s2070_s24 = inlined_call_operand.vmem [shape: f32[1,16], index: 24, kind: input, shape index: {}]   ;;  %s2071_s25 = inlined_call_operand.vmem [shape: f32[1,16], index: 25, kind: input, shape index: {}]   ;;  %s2072_s26 = inlined_call_operand.hbm [shape: f32[16,16], index: 26, kind: output, shape index: {0}]   ;;  %s2073_s27 = inlined_call_operand.vmem [shape: f32[16,128], index: 27, kind: output, shape index: {1}]  }
   0x1   :  { %2082 = sst [smem:[#allocation5_spill]] %s2046_s0 }
   0x2   :  { %2083 = sst [smem:[#allocation6_spill]] %s2047_s1 }
   0x3   :  { %2084 = sst [smem:[#allocation7_spill]] %s2048_s2 }
   0x4   :  { %2085 = sst [smem:[#allocation8_spill]] %s2049_s3 }
   0x5   :  { %2086 = sst [smem:[#allocation9_spill]] %s2050_s4 }
   0x6   :  { %2087 = sst [smem:[#allocation10_spill]] %s2051_s5 }
   0x7   :  { %2088 = sst [smem:[#allocation11_spill]] %s2052_s6 }
   0x8   :  { %2089 = sst [smem:[#allocation12_spill]] %s2053_s7 }
   0x9   :  { %2090 = sst [smem:[#allocation13_spill]] %s2054_s8 }
   0xa   :  { %2091 = sst [smem:[#allocation14_spill]] %s2055_s9 }
   0xb   :  { %2092 = sst [smem:[#allocation15_spill]] %s2056_s10 }
   0xc   :  { %2093 = sst [smem:[#allocation16_spill]] %s2057_s11 }
   0xd   :  { %s2094_s8 = sld [smem:[#allocation11_spill]]  ;;  %vm119_vm0 = vcmask 261120  }
   0xe   :  { %s2095_s6 = sld [smem:[#allocation5_spill]] }
  0x13   :  { %v114_v0 = vld [vmem:[%s2094_s8 + $0x18] sm:$0xff]  ;;  %v113_v1 = vld [vmem:[%s2094_s8 + $0x10] sm:$0xff]  ;;  %v112_v2 = vld [vmem:[%s2094_s8 + $0x8] sm:$0xff] }
  0x14   :  { %138 = vmatpush.msra.mxu0 %v114_v0  ;;  %v111_v3 = vld [vmem:[%s2094_s8] sm:$0xff] }
  0x15   :  { %v86_v4 = vld [vmem:[%s2095_s6] sm:$0xff] }
  0x16   :  { %139 = vmatpush.msra.mxu0 %v113_v1 }
  0x18   :  { %140 = vmatpush.msra.mxu0 %v112_v2 }
  0x19   :  { %33 = vsyncpa [#allocation3], 0  ;;  %v87_v5 = vld [vmem:[%s2095_s6 + $0x8] sm:$0xff]  ;;  %s2096_s4 = sld [smem:[#allocation12_spill]]  ;;  %s1309_s8 = smov 112   ;;  %v310_v48 = vld [vmem:[%s2058_s12] sm:$0xff] }
  0x1a   :  { %141 = vmatpush.msra.mxu0 %v111_v3  ;;  %s1310_s30 = smov 96   ;;  %s2097_s28 = sld [smem:[#allocation13_spill]]  ;;  %v311_v47 = vld [vmem:[%s2058_s12 + $0x8] sm:$0xff]  ;;  %vm163_vm1 = vcmask 130048  }
  0x1b   :  { %1191 = vmatmul.msk.f32.vlgmr.msra.gmra.mxu0 %vm119_vm0, %v86_v4  ;;  %s2098_s11 = sld [smem:[#allocation15_spill]]  ;;  %333 = vmatpush.msra.mxu3 %v311_v47 }
  0x1c   :  { %s2099_s10 = sld [smem:[#allocation10_spill]] }
  0x1d   :  { %334 = vmatpush.msra.mxu3 %v310_v48  ;;  %s2101_s2 = sld [smem:[#allocation14_spill]] }
  0x1e   :  { %s2103_s9 = sld [smem:[#allocation9_spill]] }
  0x1f   :  { %v1266_v6 = vld [vmem:[%s2096_s4] ss:$0 sm:$0xff]  ;;  %s2102_s4 = sld [smem:[#allocation16_spill]] }
  0x20   :  { %v152_v43 = vld [vmem:[%s2097_s28 + $0x8] sm:$0xff]  ;;  %v151_v44 = vld [vmem:[%s2097_s28] sm:$0xff]  ;;  %s1314_s28 = smov 8  }
  0x21   :  { %1258 = vmatpush.msra.mxu2 %v152_v43  ;;  %182 = vmatpush.msra.mxu1 %v152_v43  ;;  %v192_v45 = vld [vmem:[%s2098_s11 + $0x8] sm:$0xff]  ;;  %v191_v46 = vld [vmem:[%s2098_s11] sm:$0xff]  ;;  %s2100_s11 = sld [smem:[#allocation6_spill]] }
  0x22   :  { %v110_v49 = vld [vmem:[%s2099_s10] sm:$0x3] }
  0x23   :  { %1192 = vmatmul.msk.f32.gmra.mxu0 %vm119_vm0, %v87_v5  ;;  %1259 = vmatpush.msra.mxu2 %v151_v44 }
  0x24   :  { %183 = vmatpush.msra.mxu1 %v151_v44  ;;  %1211 = vmatmul.msk.f32.vlgmr.msra.gmra.mxu3 %vm163_vm1, %v110_v49 }
  0x25   :  { %259 = vmatpush.msrb.mxu2 %v192_v45 }
  0x27   :  { %260 = vmatpush.msrb.mxu2 %v191_v46  ;;  %v88_v51 = vld [vmem:[%s2100_s11] sm:$0xff]  ;;  %v89_v53 = vld [vmem:[%s2100_s11 + $0x8] sm:$0xff]  ;;  %v90_v55 = vld [vmem:[%s2100_s11 + $0x10] sm:$0xff] }
  0x28   :  { %v91_v57 = vld [vmem:[%s2100_s11 + $0x18] sm:$0xff]  ;;  %v92_v59 = vld [vmem:[%s2100_s11 + $0x20] sm:$0xff]  ;;  %v93_v61 = vld [vmem:[%s2100_s11 + $0x28] sm:$0xff] }
  0x29   :  { %v94_v62 = vld [vmem:[%s2100_s11 + $0x30] sm:$0xff]  ;;  %v95_v63 = vld [vmem:[%s2100_s11 + $0x38] sm:$0xff]  ;;  %v96_v0 = vld [vmem:[%s2100_s11 + $0x40] sm:$0xff] }
  0x2a   :  { %v97_v1 = vld [vmem:[%s2100_s11 + $0x48] sm:$0xff]  ;;  %v98_v2 = vld [vmem:[%s2100_s11 + $0x50] sm:$0xff]  ;;  %v99_v3 = vld [vmem:[%s2100_s11 + $0x58] sm:$0xff] }
  0x2b   :  { %v100_v4 = vld [vmem:[%s2100_s11 + $0x60] sm:$0xff]  ;;  %v101_v5 = vld [vmem:[%s2100_s11 + $0x68] sm:$0xff] }
  0x2c   :  { %v1656_v46 = vld [vmem:[%s2103_s9] sm:$0xff] }
  0x98   :  { %v143_v7 = vpop.f32.mrf.mxu0 }
  0x99   :  { %v1478_v8 = vadd.f32 %v1266_v6, %v143_v7  ;;  %v489_v7 = vld [vmem:[%s2060_s14] sm:$0xff] }
  0x9b   :  { %v359_v9 = vrot.slane %v1478_v8, 3  ;;  %v357_v10 = vrot.slane %v1478_v8, 1  ;;  %v360_v15 = vrot.slane %v1478_v8, 4  ;;  %v358_v16 = vrot.slane %v1478_v8, 2 }
  0x9c   :  { %v363_v20 = vrot.slane %v1478_v8, 7  ;;  %v362_v21 = vrot.slane %v1478_v8, 6  ;;  %v371_v22 = vperm.slane %v1478_v8, 0  ;;  %v361_v25 = vrot.slane %v1478_v8, 5 }
  0x9d   :  { %v374_v11 = vperm.slane %v359_v9, 0  ;;  %v372_v12 = vperm.slane %v357_v10, 0  ;;  %v375_v18 = vperm.slane %v360_v15, 0  ;;  %v373_v19 = vperm.slane %v358_v16, 0  ;;  %v102_v9 = vld [vmem:[%s2100_s11 + $0x70] sm:$0xff]  ;;  %v103_v10 = vld [vmem:[%s2100_s11 + $0x78] sm:$0xff] }
  0x9e   :  { %v378_v23 = vperm.slane %v363_v20, 0  ;;  %v377_v24 = vperm.slane %v362_v21, 0  ;;  %v376_v28 = vperm.slane %v361_v25, 0  ;;  %v149_v42 = vmax.f32 %v1478_v8, 0.0  ;;  %v1269_v15 = vld [vmem:[%s2059_s13] ss:$0 sm:$0xff] }
  0x9f   :  { %393 = vrot.lane.b32.xlu2 %v374_v11, %s1309_s8  ;;  %389 = vrot.lane.b32.xlu1 %v372_v12, %s1309_s8  ;;  %v1267_v11 = vld [vmem:[%s2101_s2] ss:$0 sm:$0xff] }
  0xa0   :  { %v146_v13 = vpop.f32.mrf.mxu0 }
  0xa1   :  { %v1484_v14 = vadd.f32 %v1266_v6, %v146_v13  ;;  %v490_v6 = vld [vmem:[%s2060_s14 + $0x8] sm:$0xff] }
  0xa2   :  { %557 = vmatpush.msrb.mxu3 %v490_v6 }
  0xa3   :  { %v150_v17 = vmax.f32 %v1484_v14, 0.0  ;;  %v365_v26 = vrot.slane %v1484_v14, 2  ;;  %v364_v27 = vrot.slane %v1484_v14, 1  ;;  %v368_v31 = vrot.slane %v1484_v14, 5 }
  0xa4   :  { %v367_v32 = vrot.slane %v1484_v14, 4  ;;  %v379_v33 = vperm.slane %v1484_v14, 0  ;;  %v366_v36 = vrot.slane %v1484_v14, 3  ;;  %v370_v37 = vrot.slane %v1484_v14, 7  ;;  %558 = vmatpush.msrb.mxu3 %v489_v7 }
  0xa5   :  { %161 = vrot.lane.b32.xlu0 %v150_v17, %s1310_s30  ;;  %v381_v29 = vperm.slane %v365_v26, 0  ;;  %v380_v30 = vperm.slane %v364_v27, 0  ;;  %v384_v34 = vperm.slane %v368_v31, 0  ;;  %v369_v38 = vrot.slane %v1484_v14, 6  ;;  %v1630_v17 = vld [vmem:[%s2102_s4] ss:$0 sm:$0xff] }
  0xa6   :  { %v383_v35 = vperm.slane %v367_v32, 0  ;;  %v382_v39 = vperm.slane %v366_v36, 0  ;;  %v386_v40 = vperm.slane %v370_v37, 0 }
  0xa7   :  { %395 = vrot.lane.b32.xlu2 %v375_v18, %s1309_s8  ;;  %391 = vrot.lane.b32.xlu1 %v373_v19, %s1309_s8  ;;  %v385_v41 = vperm.slane %v369_v38, 0  ;;  %v336_v16 = vpop.f32.mrf.mxu3 }
  0xa8   :  { %v1632_v18 = vadd.f32 %v1269_v15, %v336_v16 }
  0xad   :  { %387 = vrot.lane.b32.xlu0 %v371_v22, %s1309_s8  ;;  %v1637_v22 = vperm.slane %v1632_v18, 0 }
  0xaf   :  { %401 = vrot.lane.b32.xlu2 %v378_v23, %s1309_s8  ;;  %399 = vrot.lane.b32.xlu1 %v377_v24, %s1309_s8 }
  0xb5   :  { %397 = vrot.lane.b32.xlu0 %v376_v28, %s1309_s8 }
  0xb7   :  { %407 = vrot.lane.b32.xlu2 %v381_v29, %s1309_s8  ;;  %405 = vrot.lane.b32.xlu1 %v380_v30, %s1309_s8 }
  0xbd   :  { %403 = vrot.lane.b32.xlu0 %v379_v33, %s1309_s8 }
  0xbf   :  { %413 = vrot.lane.b32.xlu2 %v384_v34, %s1309_s8  ;;  %411 = vrot.lane.b32.xlu1 %v383_v35, %s1309_s8 }
  0xc5   :  { %409 = vrot.lane.b32.xlu0 %v382_v39, %s1309_s8 }
  0xc7   :  { %417 = vrot.lane.b32.xlu2 %v386_v40, %s1309_s8  ;;  %415 = vrot.lane.b32.xlu1 %v385_v41, %s1309_s8 }
  0xcd   :  { %159 = vrot.lane.b32.xlu0 %v149_v42, %s1310_s30 }
  0xf9   :  { %v394_v42 = vpop.permute.xlu2 %393 }
 0x111   :  { %v390_v28 = vpop.permute.xlu1 %389 }
 0x117   :  { %v162_v50 = vpop.permute.xlu0 %161 }
 0x118   :  { %1194 = vmatmul.msk.f32.vlgmr.msra.gmra.mxu2 %vm163_vm1, %v162_v50 }
 0x119   :  { %v392_v36 = vpop.permute.xlu1 %391 }
 0x11f   :  { %v388_v52 = vpop.permute.xlu0 %387 }
 0x120   :  { %1195 = vmatmul.msk.f32.vlgmr.msrb.gmra.mxu2 %vm163_vm1, %v88_v51 }
 0x121   :  { %v400_v6 = vpop.permute.xlu1 %399 }
 0x127   :  { %v1548_v54 = vpop.permute.xlu0 %397 }
 0x128   :  { %1196 = vmatmul.msk.f32.gmra.mxu2 %vm163_vm1, %v89_v53  ;;  %v1668_v53 = vld [vmem:[%s2103_s9 + $0x8] sm:$0xff] }
 0x12f   :  { %v1554_v56 = vpop.permute.xlu0 %403 }
 0x130   :  { %1197 = vmatmul.msk.f32.gmra.mxu2 %vm163_vm1, %v90_v55  ;;  %v396_v55 = vpop.permute.xlu2 %395 }
 0x137   :  { %v1560_v58 = vpop.permute.xlu0 %409 }
 0x138   :  { %1198 = vmatmul.msk.f32.gmra.mxu2 %vm163_vm1, %v91_v57  ;;  %v402_v15 = vpop.permute.xlu2 %401 }
 0x13f   :  { %v160_v60 = vpop.permute.xlu0 %159 }
 0x140   :  { %1193 = vmatmul.msk.f32.vlgmr.msra.gmra.mxu1 %vm163_vm1, %v160_v60  ;;  %1199 = vmatmul.msk.f32.gmra.mxu2 %vm163_vm1, %v92_v59 }
 0x148   :  { %1200 = vmatmul.msk.f32.gmra.mxu2 %vm163_vm1, %v93_v61 }
 0x150   :  { %1201 = vmatmul.msk.f32.gmra.mxu2 %vm163_vm1, %v94_v62 }
 0x158   :  { %1202 = vmatmul.msk.f32.gmra.mxu2 %vm163_vm1, %v95_v63 }
 0x160   :  { %1203 = vmatmul.msk.f32.gmra.mxu2 %vm163_vm1, %v96_v0 }
 0x168   :  { %1204 = vmatmul.msk.f32.gmra.mxu2 %vm163_vm1, %v97_v1 }
 0x170   :  { %1205 = vmatmul.msk.f32.gmra.mxu2 %vm163_vm1, %v98_v2 }
 0x178   :  { %1206 = vmatmul.msk.f32.gmra.mxu2 %vm163_vm1, %v99_v3 }
 0x180   :  { %1207 = vmatmul.msk.f32.gmra.mxu2 %vm163_vm1, %v100_v4 }
 0x188   :  { %1208 = vmatmul.msk.f32.gmra.mxu2 %vm163_vm1, %v101_v5 }
 0x190   :  { %1209 = vmatmul.msk.f32.gmra.mxu2 %vm163_vm1, %v102_v9 }
 0x198   :  { %1210 = vmatmul.msk.f32.gmra.mxu2 %vm163_vm1, %v103_v10 }
 0x19b   :  { %v188_v12 = vpop.f32.mrf.mxu2 }
 0x19c   :  { %v1621_v13 = vadd.f32 %v1267_v11, %v188_v12 }
 0x19e   :  { %793 = vmatpush.msrb.mxu0 %v1621_v13 }
 0x1a3   :  { %v262_v19 = vpop.f32.mrf.mxu2 }
 0x1a4   :  { %v263_v20 = vadd.f32 %v1630_v17, %v262_v19 }
 0x1a6   :  { %v339_v21 = vadd.f32 %v263_v20, %v1478_v8 }
 0x1a8   :  { %v435_v23 = vadd.f32 %v388_v52, %v339_v21  ;;  %v452_v21 = vrot.slane %v1632_v18, 1  ;;  %v406_v18 = vpop.permute.xlu1 %405 }
 0x1aa   :  { %v457_v24 = vadd.f32 %v1637_v22, %v435_v23 }
 0x1ab   :  { %v265_v25 = vpop.f32.mrf.mxu2 }
 0x1ac   :  { %v266_v26 = vadd.f32 %v1630_v17, %v265_v25  ;;  %v473_v27 = vmax.f32 %v457_v24, 0.0 }
 0x1ae   :  { %v340_v29 = vadd.f32 %v266_v26, %v1478_v8  ;;  %1212 = vmatmul.msk.f32.vlgmr.msrb.gmra.mxu3 %vm163_vm1, %v473_v27  ;;  %v454_v26 = vperm.slane %v452_v21, 0  ;;  %v1723_v21 = vld [vmem:[%s2061_s15] ss:$0 sm:$0xff] }
 0x1b0   :  { %v436_v30 = vadd.f32 %v390_v28, %v340_v29 }
 0x1b2   :  { %v458_v31 = vadd.f32 %v1637_v22, %v436_v30 }
 0x1b3   :  { %v268_v32 = vpop.f32.mrf.mxu2 }
 0x1b4   :  { %v269_v33 = vadd.f32 %v1630_v17, %v268_v32  ;;  %v474_v34 = vmax.f32 %v458_v31, 0.0 }
 0x1b6   :  { %v341_v35 = vadd.f32 %v269_v33, %v1478_v8  ;;  %1213 = vmatmul.msk.f32.gmra.mxu3 %vm163_vm1, %v474_v34 }
 0x1b8   :  { %v437_v37 = vadd.f32 %v392_v36, %v341_v35 }
 0x1ba   :  { %v459_v38 = vadd.f32 %v1637_v22, %v437_v37 }
 0x1bb   :  { %v271_v39 = vpop.f32.mrf.mxu2 }
 0x1bc   :  { %v272_v40 = vadd.f32 %v1630_v17, %v271_v39  ;;  %v475_v41 = vmax.f32 %v459_v38, 0.0 }
 0x1bd   :  { %v185_v43 = vpop.f32.mrf.mxu1 }
 0x1be   :  { %v342_v44 = vadd.f32 %v272_v40, %v1478_v8  ;;  %v1650_v45 = vadd.f32 %v1267_v11, %v185_v43  ;;  %1214 = vmatmul.msk.f32.gmra.mxu3 %vm163_vm1, %v475_v41 }
 0x1c0   :  { %v438_v47 = vadd.f32 %v394_v42, %v342_v44  ;;  %794 = vmatpush.msrb.mxu0 %v1650_v45 }
 0x1c1   :  { %1244 = vmatmul.msk.f32.vlgmr.msrb.gmra.mxu0 %vm163_vm1, %v1656_v46 }
 0x1c2   :  { %v460_v48 = vadd.f32 %v1637_v22, %v438_v47 }
 0x1c3   :  { %v274_v49 = vpop.f32.mrf.mxu2 }
 0x1c4   :  { %v275_v50 = vadd.f32 %v1630_v17, %v274_v49  ;;  %v476_v51 = vmax.f32 %v460_v48, 0.0 }
 0x1c6   :  { %v343_v52 = vadd.f32 %v275_v50, %v1478_v8  ;;  %1215 = vmatmul.msk.f32.gmra.mxu3 %vm163_vm1, %v476_v51  ;;  %v625_v51 = vld [vmem:[%s2062_s16 + $0x8] sm:$0xff] }
 0x1c7   :  { %692 = vmatpush.msrb.mxu1 %v625_v51 }
 0x1c8   :  { %v439_v57 = vadd.f32 %v396_v55, %v343_v52  ;;  %v412_v52 = vpop.permute.xlu1 %411 }
 0x1c9   :  { %1245 = vmatmul.msk.f32.gmra.mxu0 %vm163_vm1, %v1668_v53 }
 0x1ca   :  { %v461_v59 = vadd.f32 %v1637_v22, %v439_v57 }
 0x1cb   :  { %v277_v60 = vpop.f32.mrf.mxu2 }
 0x1cc   :  { %v278_v61 = vadd.f32 %v1630_v17, %v277_v60  ;;  %v477_v62 = vmax.f32 %v461_v59, 0.0 }
 0x1ce   :  { %v344_v63 = vadd.f32 %v278_v61, %v1478_v8  ;;  %1216 = vmatmul.msk.f32.gmra.mxu3 %vm163_vm1, %v477_v62 }
 0x1d0   :  { %v440_v0 = vadd.f32 %v1548_v54, %v344_v63 }
 0x1d2   :  { %v462_v1 = vadd.f32 %v1637_v22, %v440_v0 }
 0x1d3   :  { %v280_v2 = vpop.f32.mrf.mxu2 }
 0x1d4   :  { %v281_v3 = vadd.f32 %v1630_v17, %v280_v2  ;;  %v478_v4 = vmax.f32 %v462_v1, 0.0 }
 0x1d6   :  { %v345_v5 = vadd.f32 %v281_v3, %v1478_v8  ;;  %1217 = vmatmul.msk.f32.gmra.mxu3 %vm163_vm1, %v478_v4  ;;  %v624_v4 = vld [vmem:[%s2062_s16] sm:$0xff] }
 0x1d7   :  { %693 = vmatpush.msrb.mxu1 %v624_v4 }
 0x1d8   :  { %v441_v7 = vadd.f32 %v400_v6, %v345_v5  ;;  %v416_v6 = vpop.permute.xlu1 %415 }
 0x1da   :  { %v463_v9 = vadd.f32 %v1637_v22, %v441_v7 }
 0x1db   :  { %v283_v10 = vpop.f32.mrf.mxu2 }
 0x1dc   :  { %v284_v11 = vadd.f32 %v1630_v17, %v283_v10  ;;  %v479_v12 = vmax.f32 %v463_v9, 0.0 }
 0x1de   :  { %v346_v54 = vadd.f32 %v284_v11, %v1478_v8  ;;  %1218 = vmatmul.msk.f32.gmra.mxu3 %vm163_vm1, %v479_v12 }
 0x1e0   :  { %v442_v16 = vadd.f32 %v402_v15, %v346_v54 }
 0x1e2   :  { %v464_v19 = vadd.f32 %v1637_v22, %v442_v16 }
 0x1e3   :  { %v286_v20 = vpop.f32.mrf.mxu2 }
 0x1e4   :  { %v287_v23 = vadd.f32 %v1630_v17, %v286_v20  ;;  %v480_v24 = vmax.f32 %v464_v19, 0.0 }
 0x1e6   :  { %v347_v25 = vadd.f32 %v287_v23, %v1484_v14  ;;  %1219 = vmatmul.msk.f32.gmra.mxu3 %vm163_vm1, %v480_v24 }
 0x1e8   :  { %v443_v27 = vadd.f32 %v1554_v56, %v347_v25  ;;  %v408_v56 = vpop.permute.xlu2 %407 }
 0x1ea   :  { %v465_v8 = vadd.f32 %v454_v26, %v443_v27 }
 0x1eb   :  { %v289_v28 = vpop.f32.mrf.mxu2 }
 0x1ec   :  { %v290_v29 = vadd.f32 %v1630_v17, %v289_v28  ;;  %v481_v30 = vmax.f32 %v465_v8, 0.0 }
 0x1ee   :  { %v348_v22 = vadd.f32 %v290_v29, %v1484_v14  ;;  %1220 = vmatmul.msk.f32.gmra.mxu3 %vm163_vm1, %v481_v30 }
 0x1f0   :  { %v444_v31 = vadd.f32 %v406_v18, %v348_v22  ;;  %v414_v62 = vpop.permute.xlu2 %413 }
 0x1f2   :  { %v466_v32 = vadd.f32 %v454_v26, %v444_v31 }
 0x1f3   :  { %v292_v33 = vpop.f32.mrf.mxu2 }
 0x1f4   :  { %v293_v34 = vadd.f32 %v1630_v17, %v292_v33  ;;  %v482_v35 = vmax.f32 %v466_v32, 0.0 }
 0x1f6   :  { %v349_v36 = vadd.f32 %v293_v34, %v1484_v14  ;;  %1221 = vmatmul.msk.f32.gmra.mxu3 %vm163_vm1, %v482_v35 }
 0x1f8   :  { %v445_v37 = vadd.f32 %v408_v56, %v349_v36  ;;  %v418_v15 = vpop.permute.xlu2 %417 }
 0x1fa   :  { %v467_v38 = vadd.f32 %v454_v26, %v445_v37 }
 0x1fb   :  { %v295_v39 = vpop.f32.mrf.mxu2 }
 0x1fc   :  { %v296_v40 = vadd.f32 %v1630_v17, %v295_v39  ;;  %v483_v41 = vmax.f32 %v467_v38, 0.0 }
 0x1fe   :  { %v350_v42 = vadd.f32 %v296_v40, %v1484_v14  ;;  %1222 = vmatmul.msk.f32.gmra.mxu3 %vm163_vm1, %v483_v41 }
 0x200   :  { %v446_v43 = vadd.f32 %v1560_v58, %v350_v42 }
 0x202   :  { %v468_v44 = vadd.f32 %v454_v26, %v446_v43 }
 0x203   :  { %v298_v47 = vpop.f32.mrf.mxu2 }
 0x204   :  { %v299_v48 = vadd.f32 %v1630_v17, %v298_v47  ;;  %v484_v49 = vmax.f32 %v468_v44, 0.0 }
 0x206   :  { %v351_v50 = vadd.f32 %v299_v48, %v1484_v14  ;;  %1223 = vmatmul.msk.f32.gmra.mxu3 %vm163_vm1, %v484_v49 }
 0x208   :  { %v447_v55 = vadd.f32 %v412_v52, %v351_v50 }
 0x20a   :  { %v469_v57 = vadd.f32 %v454_v26, %v447_v55 }
 0x20b   :  { %v301_v59 = vpop.f32.mrf.mxu2 }
 0x20c   :  { %v302_v58 = vadd.f32 %v1630_v17, %v301_v59  ;;  %v485_v60 = vmax.f32 %v469_v57, 0.0 }
 0x20e   :  { %v352_v61 = vadd.f32 %v302_v58, %v1484_v14  ;;  %1224 = vmatmul.msk.f32.gmra.mxu3 %vm163_vm1, %v485_v60 }
 0x210   :  { %v448_v63 = vadd.f32 %v414_v62, %v352_v61 }
 0x212   :  { %v470_v0 = vadd.f32 %v454_v26, %v448_v63 }
 0x213   :  { %v304_v1 = vpop.f32.mrf.mxu2 }
 0x214   :  { %v305_v2 = vadd.f32 %v1630_v17, %v304_v1  ;;  %v486_v3 = vmax.f32 %v470_v0, 0.0 }
 0x216   :  { %v353_v5 = vadd.f32 %v305_v2, %v1484_v14  ;;  %1225 = vmatmul.msk.f32.gmra.mxu3 %vm163_vm1, %v486_v3 }
 0x218   :  { %v449_v7 = vadd.f32 %v416_v6, %v353_v5 }
 0x21a   :  { %v471_v9 = vadd.f32 %v454_v26, %v449_v7 }
 0x21b   :  { %v307_v10 = vpop.f32.mrf.mxu2 }
 0x21c   :  { %v308_v11 = vadd.f32 %v1630_v17, %v307_v10  ;;  %v487_v12 = vmax.f32 %v471_v9, 0.0 }
 0x21e   :  { %v354_v54 = vadd.f32 %v308_v11, %v1484_v14  ;;  %1226 = vmatmul.msk.f32.gmra.mxu3 %vm163_vm1, %v487_v12  ;;  %v830_v11 = vld [vmem:[%s2064_s18 + $0x8] sm:$0xff] }
 0x21f   :  { %v1014_v12 = vld [vmem:[%s2066_s20 + $0x8] sm:$0xff] }
 0x220   :  { %v450_v16 = vadd.f32 %v418_v15, %v354_v54  ;;  %v829_v54 = vld [vmem:[%s2064_s18] sm:$0xff]  ;;  %1060 = vmatpush.msra.mxu3 %v1014_v12 }
 0x221   :  { %v1013_v15 = vld [vmem:[%s2066_s20] sm:$0xff]  ;;  %s1313_s20 = smov 128  }
 0x222   :  { %v472_v19 = vadd.f32 %v454_v26, %v450_v16  ;;  %1061 = vmatpush.msra.mxu3 %v1013_v15  ;;  %v909_v15 = vld [vmem:[%s2065_s19 + $0x78] sm:$0xff] }
 0x224   :  { %v488_v20 = vmax.f32 %v472_v19, 0.0 }
 0x226   :  { %1227 = vmatmul.msk.f32.gmra.mxu3 %vm163_vm1, %v488_v20  ;;  %v1271_v20 = vld [vmem:[%s2063_s17] ss:$0 sm:$0xff]  ;;  %s2104_s17 = sld [smem:[#allocation7_spill]] }
 0x231   :  { %v560_v23 = vpop.f32.mrf.mxu3 }
 0x232   :  { %v561_v24 = vadd.f32 %v1723_v21, %v560_v23 }
 0x234   :  { %v608_v17 = vmax.f32 %v561_v24, 0.0 }
 0x236   :  { %1228 = vmatmul.msk.f32.vlgmr.msrb.gmra.mxu1 %vm163_vm1, %v608_v17 }
 0x239   :  { %v563_v14 = vpop.f32.mrf.mxu3 }
 0x23a   :  { %v564_v25 = vadd.f32 %v1723_v21, %v563_v14 }
 0x23c   :  { %v609_v27 = vmax.f32 %v564_v25, 0.0 }
 0x23e   :  { %1229 = vmatmul.msk.f32.gmra.mxu1 %vm163_vm1, %v609_v27  ;;  %v1729_v26 = vpop.f32.mrf.mxu0 }
 0x241   :  { %v566_v8 = vpop.f32.mrf.mxu3 }
 0x242   :  { %v567_v28 = vadd.f32 %v1723_v21, %v566_v8 }
 0x244   :  { %v610_v29 = vmax.f32 %v567_v28, 0.0 }
 0x246   :  { %1230 = vmatmul.msk.f32.gmra.mxu1 %vm163_vm1, %v610_v29  ;;  %v1733_v30 = vpop.f32.mrf.mxu0 }
 0x247   :  { %816 = vmatpush.msra.mxu0 %v1733_v30 }
 0x249   :  { %v569_v22 = vpop.f32.mrf.mxu3  ;;  %817 = vmatpush.msra.mxu0 %v1729_v26 }
 0x24a   :  { %v570_v18 = vadd.f32 %v1723_v21, %v569_v22  ;;  %1246 = vmatmul.msk.f32.vlgmr.msra.gmra.mxu0 %vm163_vm1, %v1656_v46 }
 0x24b   :  { %851 = vmatpush.msrb.mxu0 %v830_v11 }
 0x24c   :  { %v611_v31 = vmax.f32 %v570_v18, 0.0 }
 0x24d   :  { %852 = vmatpush.msrb.mxu0 %v829_v54 }
 0x24e   :  { %1231 = vmatmul.msk.f32.gmra.mxu1 %vm163_vm1, %v611_v31 }
 0x24f   :  { %942 = vmatpush.msra.mxu0 %v909_v15  ;;  %v931_v15 = vld [vmem:[%s2065_s19 + $0x128] sm:$0xff] }
 0x251   :  { %v572_v32 = vpop.f32.mrf.mxu3 }
 0x252   :  { %v573_v33 = vadd.f32 %v1723_v21, %v572_v32  ;;  %1247 = vmatmul.msk.f32.gmra.mxu0 %vm163_vm1, %v1668_v53 }
 0x254   :  { %v612_v34 = vmax.f32 %v573_v33, 0.0 }
 0x256   :  { %1232 = vmatmul.msk.f32.gmra.mxu1 %vm163_vm1, %v612_v34 }
 0x259   :  { %v575_v35 = vpop.f32.mrf.mxu3 }
 0x25a   :  { %v576_v36 = vadd.f32 %v1723_v21, %v575_v35 }
 0x25c   :  { %v613_v56 = vmax.f32 %v576_v36, 0.0 }
 0x25e   :  { %1233 = vmatmul.msk.f32.gmra.mxu1 %vm163_vm1, %v613_v56 }
 0x261   :  { %v578_v37 = vpop.f32.mrf.mxu3 }
 0x262   :  { %v579_v46 = vadd.f32 %v1723_v21, %v578_v37 }
 0x264   :  { %v614_v38 = vmax.f32 %v579_v46, 0.0 }
 0x266   :  { %1234 = vmatmul.msk.f32.gmra.mxu1 %vm163_vm1, %v614_v38 }
 0x269   :  { %v581_v39 = vpop.f32.mrf.mxu3 }
 0x26a   :  { %v582_v40 = vadd.f32 %v1723_v21, %v581_v39 }
 0x26c   :  { %v615_v41 = vmax.f32 %v582_v40, 0.0 }
 0x26e   :  { %1235 = vmatmul.msk.f32.gmra.mxu1 %vm163_vm1, %v615_v41 }
 0x271   :  { %v584_v53 = vpop.f32.mrf.mxu3 }
 0x272   :  { %v585_v42 = vadd.f32 %v1723_v21, %v584_v53 }
 0x274   :  { %v616_v43 = vmax.f32 %v585_v42, 0.0 }
 0x276   :  { %1236 = vmatmul.msk.f32.gmra.mxu1 %vm163_vm1, %v616_v43 }
 0x279   :  { %v587_v44 = vpop.f32.mrf.mxu3 }
 0x27a   :  { %v588_v47 = vadd.f32 %v1723_v21, %v587_v44 }
 0x27c   :  { %v617_v48 = vmax.f32 %v588_v47, 0.0 }
 0x27e   :  { %1237 = vmatmul.msk.f32.gmra.mxu1 %vm163_vm1, %v617_v48 }
 0x281   :  { %v590_v49 = vpop.f32.mrf.mxu3 }
 0x282   :  { %v591_v50 = vadd.f32 %v1723_v21, %v590_v49 }
 0x284   :  { %v618_v51 = vmax.f32 %v591_v50, 0.0 }
 0x286   :  { %1238 = vmatmul.msk.f32.gmra.mxu1 %vm163_vm1, %v618_v51 }
 0x289   :  { %v593_v52 = vpop.f32.mrf.mxu3 }
 0x28a   :  { %v594_v55 = vadd.f32 %v1723_v21, %v593_v52 }
 0x28c   :  { %v619_v57 = vmax.f32 %v594_v55, 0.0 }
 0x28e   :  { %1239 = vmatmul.msk.f32.gmra.mxu1 %vm163_vm1, %v619_v57 }
 0x291   :  { %v596_v59 = vpop.f32.mrf.mxu3 }
 0x292   :  { %v597_v58 = vadd.f32 %v1723_v21, %v596_v59 }
 0x294   :  { %v620_v60 = vmax.f32 %v597_v58, 0.0 }
 0x296   :  { %1240 = vmatmul.msk.f32.gmra.mxu1 %vm163_vm1, %v620_v60 }
 0x299   :  { %v599_v61 = vpop.f32.mrf.mxu3 }
 0x29a   :  { %v600_v62 = vadd.f32 %v1723_v21, %v599_v61 }
 0x29c   :  { %v621_v63 = vmax.f32 %v600_v62, 0.0 }
 0x29e   :  { %1241 = vmatmul.msk.f32.gmra.mxu1 %vm163_vm1, %v621_v63 }
 0x2a1   :  { %v602_v0 = vpop.f32.mrf.mxu3 }
 0x2a2   :  { %v603_v1 = vadd.f32 %v1723_v21, %v602_v0 }
 0x2a4   :  { %v622_v2 = vmax.f32 %v603_v1, 0.0 }
 0x2a6   :  { %1242 = vmatmul.msk.f32.gmra.mxu1 %vm163_vm1, %v622_v2 }
 0x2a9   :  { %v605_v3 = vpop.f32.mrf.mxu3 }
 0x2aa   :  { %v606_v4 = vadd.f32 %v1723_v21, %v605_v3 }
 0x2ac   :  { %v623_v5 = vmax.f32 %v606_v4, 0.0 }
 0x2ae   :  { %1243 = vmatmul.msk.f32.gmra.mxu1 %vm163_vm1, %v623_v5 }
 0x2b3   :  { %v695_v6 = vpop.f32.mrf.mxu1 }
 0x2b4   :  { %v696_v17 = vadd.f32 %v1271_v20, %v695_v6 }
 0x2b6   :  { %v743_v22 = vsel %vm163_vm1, %v696_v17, -inf  ;;  %v904_v17 = vld [vmem:[%s2065_s19 + $0x50] sm:$0xff] }
 0x2bb   :  { %v698_v7 = vpop.f32.mrf.mxu1 }
 0x2bc   :  { %v699_v14 = vadd.f32 %v1271_v20, %v698_v7 }
 0x2be   :  { %v744_v18 = vsel %vm163_vm1, %v699_v14, -inf  ;;  %v903_v14 = vld [vmem:[%s2065_s19 + $0x48] sm:$0xff] }
 0x2c3   :  { %v701_v9 = vpop.f32.mrf.mxu1 }
 0x2c4   :  { %v702_v23 = vadd.f32 %v1271_v20, %v701_v9 }
 0x2c6   :  { %v745_v8 = vsel %vm163_vm1, %v702_v23, -inf  ;;  %v905_v23 = vld [vmem:[%s2065_s19 + $0x58] sm:$0xff] }
 0x2c7   :  { %v746_v33 = vmax.f32 %v743_v22, %v745_v8  ;;  %v900_v8 = vld [vmem:[%s2065_s19 + $0x30] sm:$0xff]  ;;  %v899_v22 = vld [vmem:[%s2065_s19 + $0x28] sm:$0xff] }
 0x2cb   :  { %v704_v10 = vpop.f32.mrf.mxu1 }
 0x2cc   :  { %v705_v24 = vadd.f32 %v1271_v20, %v704_v10 }
 0x2ce   :  { %v747_v28 = vsel %vm163_vm1, %v705_v24, -inf  ;;  %v1820_v24 = vpop.f32.mrf.mxu0 }
 0x2cf   :  { %v748_v34 = vmax.f32 %v744_v18, %v747_v28  ;;  %v898_v18 = vld [vmem:[%s2065_s19 + $0x20] sm:$0xff] }
 0x2d3   :  { %v707_v16 = vpop.f32.mrf.mxu1 }
 0x2d4   :  { %v708_v25 = vadd.f32 %v1271_v20, %v707_v16  ;;  %v908_v16 = vld [vmem:[%s2065_s19 + $0x70] sm:$0xff] }
 0x2d5   :  { %943 = vmatpush.msra.mxu0 %v908_v16 }
 0x2d6   :  { %v749_v31 = vsel %vm163_vm1, %v708_v25, -inf  ;;  %v902_v25 = vld [vmem:[%s2065_s19 + $0x40] sm:$0xff]  ;;  %v1837_v28 = vpop.f32.mrf.mxu0 }
 0x2d7   :  { %v750_v37 = vmax.f32 %v746_v33, %v749_v31  ;;  %v897_v31 = vld [vmem:[%s2065_s19 + $0x18] sm:$0xff]  ;;  %v895_v33 = vld [vmem:[%s2065_s19 + $0x8] sm:$0xff] }
 0x2db   :  { %v710_v19 = vpop.f32.mrf.mxu1 }
 0x2dc   :  { %v711_v27 = vadd.f32 %v1271_v20, %v710_v19  ;;  %v1072_v19 = vld [vmem:[%s2068_s22 + $0x18] sm:$0xff] }
 0x2dd   :  { %1085 = vmatpush.msra.mxu1 %v1072_v19  ;;  %v930_v19 = vld [vmem:[%s2065_s19 + $0x120] sm:$0xff] }
 0x2de   :  { %v751_v32 = vsel %vm163_vm1, %v711_v27, -inf  ;;  %v901_v27 = vld [vmem:[%s2065_s19 + $0x38] sm:$0xff] }
 0x2df   :  { %v752_v46 = vmax.f32 %v748_v34, %v751_v32  ;;  %v896_v32 = vld [vmem:[%s2065_s19 + $0x10] sm:$0xff] }
 0x2e0   :  { %v1071_v34 = vld [vmem:[%s2068_s22 + $0x10] sm:$0xff] }
 0x2e1   :  { %1086 = vmatpush.msra.mxu1 %v1071_v34 }
 0x2e3   :  { %v713_v21 = vpop.f32.mrf.mxu1 }
 0x2e4   :  { %v714_v29 = vadd.f32 %v1271_v20, %v713_v21  ;;  %v906_v21 = vld [vmem:[%s2065_s19 + $0x60] sm:$0xff] }
 0x2e6   :  { %v753_v36 = vsel %vm163_vm1, %v714_v29, -inf }
 0x2e7   :  { %v754_v39 = vmax.f32 %v750_v37, %v753_v36  ;;  %v925_v36 = vld [vmem:[%s2065_s19 + $0xf8] sm:$0xff]  ;;  %v924_v37 = vld [vmem:[%s2065_s19 + $0xf0] sm:$0xff] }
 0x2eb   :  { %v716_v35 = vpop.f32.mrf.mxu1 }
 0x2ec   :  { %v717_v56 = vadd.f32 %v1271_v20, %v716_v35  ;;  %v894_v35 = vld [vmem:[%s2065_s19] sm:$0xff] }
 0x2ee   :  { %v755_v38 = vsel %vm163_vm1, %v717_v56, -inf  ;;  %v1872_v56 = vld [vmem:[%s2104_s17] sm:$0xff] }
 0x2ef   :  { %v756_v40 = vmax.f32 %v752_v46, %v755_v38  ;;  %v941_v46 = vld [vmem:[%s2065_s19 + $0x178] sm:$0xff]  ;;  %v940_v38 = vld [vmem:[%s2065_s19 + $0x170] sm:$0xff] }
 0x2f0   :  { %988 = vmatpush.msra.mxu2 %v941_v46 }
 0x2f1   :  { %v757_v41 = vmax.f32 %v754_v39, %v756_v40  ;;  %v923_v39 = vld [vmem:[%s2065_s19 + $0xe8] sm:$0xff] }
 0x2f2   :  { %v939_v40 = vld [vmem:[%s2065_s19 + $0x168] sm:$0xff]  ;;  %989 = vmatpush.msra.mxu2 %v940_v38 }
 0x2f3   :  { %v719_v53 = vpop.f32.mrf.mxu1  ;;  %1248 = vmatmul.msk.f32.vlgmr.msrb.gmra.mxu0 %vm163_vm1, %v757_v41  ;;  %1254 = vmatmul.msk.f32.vlgmr.msra.gmra.mxu3 %vm163_vm1, %v757_v41  ;;  %v922_v41 = vld [vmem:[%s2065_s19 + $0xe0] sm:$0xff] }
 0x2f4   :  { %v720_v52 = vadd.f32 %v1271_v20, %v719_v53  ;;  %v921_v53 = vld [vmem:[%s2065_s19 + $0xd8] sm:$0xff]  ;;  %990 = vmatpush.msra.mxu2 %v939_v40 }
 0x2f6   :  { %v758_v62 = vsel %vm163_vm1, %v720_v52, -inf  ;;  %v915_v52 = vld [vmem:[%s2065_s19 + $0xa8] sm:$0xff] }
 0x2fb   :  { %v722_v42 = vpop.f32.mrf.mxu1 }
 0x2fc   :  { %v723_v55 = vadd.f32 %v1271_v20, %v722_v42  ;;  %v1899_v42 = vld [vmem:[%s2104_s17 + $0x8] sm:$0xff] }
 0x2fe   :  { %v759_v63 = vsel %vm163_vm1, %v723_v55, -inf }
 0x303   :  { %v725_v43 = vpop.f32.mrf.mxu1 }
 0x304   :  { %v726_v50 = vadd.f32 %v1271_v20, %v725_v43  ;;  %v920_v43 = vld [vmem:[%s2065_s19 + $0xd0] sm:$0xff] }
 0x306   :  { %v760_v58 = vsel %vm163_vm1, %v726_v50, -inf  ;;  %v917_v50 = vld [vmem:[%s2065_s19 + $0xb8] sm:$0xff] }
 0x307   :  { %v761_v2 = vmax.f32 %v758_v62, %v760_v58  ;;  %v912_v58 = vld [vmem:[%s2065_s19 + $0x90] sm:$0xff] }
 0x30b   :  { %v728_v44 = vpop.f32.mrf.mxu1 }
 0x30c   :  { %v729_v51 = vadd.f32 %v1271_v20, %v728_v44  ;;  %v1070_v44 = vld [vmem:[%s2068_s22 + $0x8] sm:$0xff] }
 0x30d   :  { %1087 = vmatpush.msra.mxu1 %v1070_v44 }
 0x30e   :  { %v762_v60 = vsel %vm163_vm1, %v729_v51, -inf  ;;  %v916_v51 = vld [vmem:[%s2065_s19 + $0xb0] sm:$0xff] }
 0x30f   :  { %v763_v3 = vmax.f32 %v759_v63, %v762_v60  ;;  %v910_v63 = vld [vmem:[%s2065_s19 + $0x80] sm:$0xff] }
 0x313   :  { %v731_v47 = vpop.f32.mrf.mxu1 }
 0x314   :  { %v732_v57 = vadd.f32 %v1271_v20, %v731_v47  ;;  %v938_v47 = vld [vmem:[%s2065_s19 + $0x160] sm:$0xff] }
 0x315   :  { %991 = vmatpush.msra.mxu2 %v938_v47 }
 0x316   :  { %v764_v0 = vsel %vm163_vm1, %v732_v57, -inf  ;;  %v914_v57 = vld [vmem:[%s2065_s19 + $0xa0] sm:$0xff] }
 0x317   :  { %v765_v7 = vmax.f32 %v761_v2, %v764_v0  ;;  %v937_v2 = vld [vmem:[%s2065_s19 + $0x158] sm:$0xff] }
 0x318   :  { %992 = vmatpush.msra.mxu2 %v937_v2 }
 0x31b   :  { %v734_v48 = vpop.f32.mrf.mxu1 }
 0x31c   :  { %v735_v59 = vadd.f32 %v1271_v20, %v734_v48  ;;  %v919_v48 = vld [vmem:[%s2065_s19 + $0xc8] sm:$0xff] }
 0x31e   :  { %v766_v1 = vsel %vm163_vm1, %v735_v59, -inf  ;;  %v913_v59 = vld [vmem:[%s2065_s19 + $0x98] sm:$0xff] }
 0x31f   :  { %v767_v9 = vmax.f32 %v763_v3, %v766_v1  ;;  %v936_v3 = vld [vmem:[%s2065_s19 + $0x150] sm:$0xff] }
 0x320   :  { %993 = vmatpush.msra.mxu2 %v936_v3 }
 0x323   :  { %v737_v49 = vpop.f32.mrf.mxu1 }
 0x324   :  { %v738_v61 = vadd.f32 %v1271_v20, %v737_v49  ;;  %v918_v49 = vld [vmem:[%s2065_s19 + $0xc0] sm:$0xff] }
 0x326   :  { %v768_v5 = vsel %vm163_vm1, %v738_v61, -inf  ;;  %v911_v61 = vld [vmem:[%s2065_s19 + $0x88] sm:$0xff] }
 0x327   :  { %v769_v11 = vmax.f32 %v765_v7, %v768_v5  ;;  %v935_v5 = vld [vmem:[%s2065_s19 + $0x148] sm:$0xff]  ;;  %v1069_v7 = vld [vmem:[%s2068_s22] sm:$0xff]  ;;  %s1175_s22 = sshll.u32 %s2072_s26, 4  ;;  %s1176_s22 = int_to_ptr.hbm [resolvable:$true] %s1175_s22 }
 0x328   :  { %1088 = vmatpush.msra.mxu1 %v1069_v7  ;;  %994 = vmatpush.msra.mxu2 %v935_v5 }
 0x32b   :  { %v740_v4 = vpop.f32.mrf.mxu1 }
 0x32c   :  { %v741_v6 = vadd.f32 %v1271_v20, %v740_v4  ;;  %v907_v20 = vld [vmem:[%s2065_s19 + $0x68] sm:$0xff] }
 0x32d   :  { %944 = vmatpush.msra.mxu0 %v907_v20  ;;  %v1016_v4 = vld [vmem:[%s2067_s21 + $0x8] sm:$0xff] }
 0x32e   :  { %v770_v10 = vsel %vm163_vm1, %v741_v6, -inf  ;;  %v1015_v6 = vld [vmem:[%s2067_s21] sm:$0xff]  ;;  %v1282_v20 = vld [vmem:[%s2095_s6 + $0x8] sm:$0xff] }
 0x32f   :  { %v771_v12 = vmax.f32 %v767_v9, %v770_v10  ;;  %945 = vmatpush.msra.mxu0 %v906_v21  ;;  %v934_v9 = vld [vmem:[%s2065_s19 + $0x140] sm:$0xff]  ;;  %v929_v21 = vld [vmem:[%s2065_s19 + $0x118] sm:$0xff] }
 0x330   :  { %v1281_v10 = vld [vmem:[%s2095_s6] sm:$0xff]  ;;  %995 = vmatpush.msra.mxu2 %v934_v9 }
 0x331   :  { %v772_v54 = vmax.f32 %v769_v11, %v771_v12  ;;  %946 = vmatpush.msra.mxu0 %v905_v23  ;;  %1256 = vmatmul.msk.f32.vlgmr.msra.gmra.mxu1 %vm119_vm0, %v1281_v10  ;;  %v933_v11 = vld [vmem:[%s2065_s19 + $0x138] sm:$0xff] }
 0x332   :  { %996 = vmatpush.msra.mxu2 %v933_v11 }
 0x333   :  { %1249 = vmatmul.msk.f32.gmra.mxu0 %vm163_vm1, %v772_v54  ;;  %1255 = vmatmul.msk.f32.gmra.mxu3 %vm163_vm1, %v772_v54  ;;  %v932_v54 = vld [vmem:[%s2065_s19 + $0x130] sm:$0xff] }
 0x334   :  { %947 = vmatpush.msra.mxu0 %v904_v17  ;;  %997 = vmatpush.msra.mxu2 %v932_v54  ;;  %v928_v17 = vld [vmem:[%s2065_s19 + $0x110] sm:$0xff] }
 0x336   :  { %948 = vmatpush.msra.mxu0 %v903_v14  ;;  %998 = vmatpush.msra.mxu2 %v931_v15 }
 0x338   :  { %949 = vmatpush.msra.mxu0 %v902_v25  ;;  %999 = vmatpush.msra.mxu2 %v930_v19  ;;  %v927_v25 = vld [vmem:[%s2065_s19 + $0x108] sm:$0xff] }
 0x339   :  { %1257 = vmatmul.msk.f32.gmra.mxu1 %vm119_vm0, %v1282_v20 }
 0x33a   :  { %950 = vmatpush.msra.mxu0 %v901_v27  ;;  %1000 = vmatpush.msra.mxu2 %v929_v21 }
 0x33c   :  { %951 = vmatpush.msra.mxu0 %v900_v8  ;;  %1001 = vmatpush.msra.mxu2 %v928_v17  ;;  %v926_v8 = vld [vmem:[%s2065_s19 + $0x100] sm:$0xff] }
 0x33e   :  { %952 = vmatpush.msra.mxu0 %v899_v22  ;;  %1002 = vmatpush.msra.mxu2 %v927_v25 }
 0x340   :  { %953 = vmatpush.msra.mxu0 %v898_v18  ;;  %1003 = vmatpush.msra.mxu2 %v926_v8 }
 0x342   :  { %954 = vmatpush.msra.mxu0 %v897_v31  ;;  %v825_v31 = vmul.f32 2.0, %v1820_v24  ;;  %v826_v24 = vmul.f32 2.0, %v1837_v28 }
 0x344   :  { %955 = vmatpush.msra.mxu0 %v896_v32 }
 0x346   :  { %956 = vmatpush.msra.mxu0 %v895_v33 }
 0x348   :  { %957 = vmatpush.msra.mxu0 %v894_v35 }
 0x349   :  { %958 = vmatmul.f32.vlgmr.msra.gmra.mxu0 %v1872_v56 }
 0x34a   :  { %965 = vmatpush.msrb.mxu0 %v925_v36  ;;  %v827_v36 = vsub.f32 %v825_v31, %v1650_v45 }
 0x34c   :  { %966 = vmatpush.msrb.mxu0 %v924_v37 }
 0x34e   :  { %967 = vmatpush.msrb.mxu0 %v923_v39 }
 0x350   :  { %968 = vmatpush.msrb.mxu0 %v922_v41 }
 0x351   :  { %961 = vmatmul.f32.gmra.mxu0 %v1899_v42 }
 0x352   :  { %969 = vmatpush.msrb.mxu0 %v921_v53 }
 0x354   :  { %970 = vmatpush.msrb.mxu0 %v920_v43 }
 0x356   :  { %971 = vmatpush.msrb.mxu0 %v919_v48 }
 0x358   :  { %972 = vmatpush.msrb.mxu0 %v918_v49 }
 0x35a   :  { %973 = vmatpush.msrb.mxu0 %v917_v50 }
 0x35c   :  { %974 = vmatpush.msrb.mxu0 %v916_v51 }
 0x35e   :  { %975 = vmatpush.msrb.mxu0 %v915_v52 }
 0x360   :  { %976 = vmatpush.msrb.mxu0 %v914_v57  ;;  %v1272_v57 = vld [vmem:[%s2069_s23] ss:$0 sm:$0xff] }
 0x362   :  { %977 = vmatpush.msrb.mxu0 %v913_v59 }
 0x364   :  { %978 = vmatpush.msrb.mxu0 %v912_v58 }
 0x366   :  { %979 = vmatpush.msrb.mxu0 %v911_v61 }
 0x368   :  { %980 = vmatpush.msrb.mxu0 %v910_v63 }
 0x36a   :  { %1037 = vmatpush.msra.mxu0 %v1016_v4 }
 0x36c   :  { %1038 = vmatpush.msra.mxu0 %v1015_v6  ;;  %v1311_v6 = vmov 16.0  }
 0x36d   :  { %1275 = vrcp.f32 %v1311_v6 }
 0x370   :  { %v1839_v29 = vpop.f32.mrf.mxu0 }
 0x371   :  { %874 = vrot.lane.b32.xlu1 %v1839_v29, %s1310_s30  ;;  %864 = vrot.lane.b32.xlu0 %v1839_v29, %s1309_s8  ;;  %v860_v35 = vmul.f32 %v1839_v29, %v1650_v45  ;;  %v828_v29 = vsub.f32 %v826_v24, %v1621_v13 }
 0x373   :  { %v1276_v7 = vpop.eup %1275 }
 0x374   :  { %v1111_v9 = vmul.f32 16.0, %v1276_v7  ;;  %vm1115_vm2 = vweird.f32 %v1276_v7 }
 0x376   :  { %v1112_v10 = vsub.f32 1.0, %v1111_v9 }
 0x378   :  { %v1113_v11 = vmul.f32 %v1276_v7, %v1112_v10 }
 0x3ae   :  { %v1090_v52 = vpop.f32.mrf.mxu1 }
 0x3b0   :  { %v1926_v55 = vpop.f32.mrf.mxu0 }
 0x3b1   :  { %876 = vrot.lane.b32.xlu0 %v1926_v55, %s1310_s30  ;;  %866 = vrot.lane.b32.xlu2 %v1926_v55, %s1309_s8  ;;  %s2105_s30 = sld [smem:[#allocation8_spill]]  ;;  %v861_v41 = vmul.f32 %v1926_v55, %v1621_v13 }
 0x3b7   :  { %v106_v60 = vld [vmem:[%s2105_s30] sm:$0xff]  ;;  %v107_v0 = vld [vmem:[%s2105_s30 + $0x8] sm:$0xff] }
 0x3b8   :  { %v890_v62 = vmul.f32 %v106_v60, %v1872_v56  ;;  %v891_v1 = vmul.f32 %v107_v0, %v1899_v42  ;;  %v884_v12 = vmul.f32 2.0, %v106_v60  ;;  %v885_v14 = vmul.f32 2.0, %v107_v0 }
 0x3ba   :  { %981 = vmatmul.f32.vlgmr.msrb.gmra.mxu0 %v890_v62  ;;  %v886_v16 = vmul.f32 %v884_v12, %v106_v60  ;;  %v887_v22 = vmul.f32 %v885_v14, %v107_v0  ;;  %v1114_v12 = vadd.f32 %v1276_v7, %v1113_v11 }
 0x3bc   :  { %v1250_v23 = vadd.f32 -1.0, %v886_v16  ;;  %v1251_v18 = vadd.f32 -1.0, %v887_v22  ;;  %v1116_v54 = vsel %vm1115_vm2, %v1276_v7, %v1114_v12 }
 0x3be   :  { %v892_v27 = vmul.f32 %v1250_v23, %v1872_v56  ;;  %v893_v34 = vmul.f32 %v1251_v18, %v1899_v42 }
 0x3c0   :  { %1004 = vmatmul.f32.vlgmr.msra.gmra.mxu2 %v892_v27 }
 0x3c2   :  { %984 = vmatmul.f32.gmra.mxu0 %v891_v1  ;;  %v1093_v1 = vpop.f32.mrf.mxu1 }
 0x3c6   :  { %v959_v43 = vpop.f32.mrf.mxu0 }
 0x3c8   :  { %1007 = vmatmul.f32.gmra.mxu2 %v893_v34 }
 0x3ce   :  { %v962_v44 = vpop.f32.mrf.mxu0 }
 0x3e3   :  { %v875_v32 = vpop.permute.xlu1 %874  ;;  %v865_v33 = vpop.permute.xlu0 %864 }
 0x3e4   :  { %v870_v56 = vmul.f32 %v865_v33, %v1729_v26  ;;  %v880_v37 = vmul.f32 %v875_v32, %v827_v36 }
 0x3e6   :  { %v872_v46 = vadd.f32 %v870_v56, %v860_v35  ;;  %v1273_v56 = vld [vmem:[%s2070_s24] ss:$0 sm:$0xff]  ;;  %s1312_s24 = smov [#allocation2]  }
 0x3e8   :  { %v882_v38 = vadd.f32 %v880_v37, %v872_v46 }
 0x3ea   :  { %1252 = vmatmul.msk.f32.vlgmr.msra.gmra.mxu0 %vm163_vm1, %v882_v38  ;;  %v1274_v38 = vld [vmem:[%s2071_s25] ss:$0 sm:$0xff]  ;;  %s1173_s25 = sshll.u32 %s1312_s24, 4  ;;  %s1174_s25 = int_to_ptr.vmem [resolvable:$true] %s1173_s25 }
 0x40b   :  { %v867_v39 = vpop.permute.xlu2 %866 }
 0x40c   :  { %v871_v40 = vmul.f32 %v867_v39, %v1733_v30  ;;  %v1063_v30 = vpop.f32.mrf.mxu3 }
 0x40e   :  { %v873_v45 = vadd.f32 %v871_v40, %v861_v41 }
 0x414   :  { %v1066_v63 = vpop.f32.mrf.mxu3 }
 0x423   :  { %v877_v53 = vpop.permute.xlu0 %876 }
 0x424   :  { %v881_v42 = vmul.f32 %v877_v53, %v828_v29 }
 0x426   :  { %v883_v26 = vadd.f32 %v881_v42, %v873_v45 }
 0x428   :  { %1253 = vmatmul.msk.f32.gmra.mxu0 %vm163_vm1, %v883_v26 }
 0x437   :  { %v982_v47 = vpop.f32.mrf.mxu0 }
 0x438   :  { %v983_v49 = vadd.f32 %v982_v47, %v959_v43 }
 0x43f   :  { %v985_v48 = vpop.f32.mrf.mxu0 }
 0x440   :  { %v986_v51 = vadd.f32 %v985_v48, %v962_v44 }
 0x443   :  { %v1005_v50 = vpop.f32.mrf.mxu2 }
 0x444   :  { %v1006_v28 = vadd.f32 %v1005_v50, %v983_v49 }
 0x446   :  { %1011 = vst [vmem:[%s2073_s27] sm:$0xff] %v1006_v28 }
 0x44b   :  { %v1008_v58 = vpop.f32.mrf.mxu2 }
 0x44c   :  { %v1009_v60 = vadd.f32 %v1008_v58, %v986_v51 }
 0x44e   :  { %1012 = vst [vmem:[%s2073_s27 + $0x8] sm:$0xff] %v1009_v60 }
 0x467   :  { %v1040_v13 = vpop.f32.mrf.mxu0 }
 0x468   :  { %v1064_v55 = vadd.f32 %v1063_v30, %v1040_v13 }
 0x46a   :  { %v1096_v59 = vadd.f32 %v1090_v52, %v1064_v55 }
 0x46c   :  { %v1102_v61 = vadd.f32 %v1272_v57, %v1096_v59 }
 0x46e   :  { %v1104_v62 = vsel %vm163_vm1, %v1102_v61, 0.0 }
 0x46f   :  { %1105 = vadd.xlane.f32.xlu1 %v1104_v62 }
 0x4a5   :  { %v1043_v0 = vpop.f32.mrf.mxu0 }
 0x4a6   :  { %v1067_v2 = vadd.f32 %v1066_v63, %v1043_v0 }
 0x4a8   :  { %v1097_v3 = vadd.f32 %v1093_v1, %v1067_v2 }
 0x4aa   :  { %v1103_v4 = vadd.f32 %v1272_v57, %v1097_v3 }
 0x4ac   :  { %v1107_v5 = vsel %vm163_vm1, %v1103_v4, 0.0 }
 0x4ad   :  { %1108 = vadd.xlane.f32.xlu2 %v1107_v5 }
 0x4e2   :  { %v1106_v15 = vpop.xlane.xlu1 %1105 }
 0x4e3   :  { %v1117_v16 = vmul.f32 %v1116_v54, %v1106_v15 }
 0x4e5   :  { %v1119_v19 = vsub.f32 %v1102_v61, %v1117_v16 }
 0x4e7   :  { %v1121_v20 = vmul.f32 %v1119_v19, %v1119_v19 }
 0x4e9   :  { %v1123_v21 = vsel %vm163_vm1, %v1121_v20, 0.0 }
 0x4ea   :  { %1124 = vadd.xlane.f32.xlu0 %v1123_v21 }
 0x520   :  { %v1109_v23 = vpop.xlane.xlu2 %1108 }
 0x521   :  { %v1118_v17 = vmul.f32 %v1116_v54, %v1109_v23 }
 0x523   :  { %v1120_v14 = vsub.f32 %v1103_v4, %v1118_v17 }
 0x525   :  { %v1122_v25 = vmul.f32 %v1120_v14, %v1120_v14 }
 0x527   :  { %v1126_v27 = vsel %vm163_vm1, %v1122_v25, 0.0 }
 0x528   :  { %1127 = vadd.xlane.f32.xlu2 %v1126_v27 }
 0x55d   :  { %v1125_v8 = vpop.xlane.xlu0 %1124 }
 0x55e   :  { %v1129_v22 = vmul.f32 %v1125_v8, %v1116_v54 }
 0x560   :  { %v1131_v18 = vadd.f32 1e-05, %v1129_v22 }
 0x562   :  { %1277 = vrsqrt.f32 %v1131_v18  ;;  %vm1139_vm4 = vweird.f32 %v1131_v18 }
 0x568   :  { %v1278_v31 = vpop.eup %1277 }
 0x569   :  { %v1134_v32 = vmul.f32 %v1278_v31, %v1131_v18  ;;  %vm1140_vm3 = vweird.f32 %v1278_v31 }
 0x56a   :  { %vm1141_vm5 = vmor %vm1139_vm4, %vm1140_vm3 }
 0x56b   :  { %v1135_v33 = vmul.f32 %v1278_v31, %v1134_v32 }
 0x56d   :  { %v1136_v34 = vmul.f32 0.5, %v1135_v33 }
 0x56f   :  { %v1137_v35 = vsub.f32 1.5, %v1136_v34 }
 0x571   :  { %v1138_v36 = vmul.f32 %v1278_v31, %v1137_v35 }
 0x573   :  { %v1142_v37 = vsel %vm1141_vm5, %v1278_v31, %v1138_v36 }
 0x574   :  { %v1153_v46 = vmul.f32 %v1142_v37, %v1119_v19 }
 0x576   :  { %v1159_v39 = vmul.f32 %v1273_v56, %v1153_v46 }
 0x578   :  { %v1165_v24 = vadd.f32 %v1274_v38, %v1159_v39 }
 0x57a   :  { %1167 = vst.msk [vmem:[#allocation2] sm:$0xff] %vm163_vm1, %v1165_v24 }
 0x59b   :  { %v1128_v40 = vpop.xlane.xlu2 %1127 }
 0x59c   :  { %v1130_v41 = vmul.f32 %v1128_v40, %v1116_v54 }
 0x59e   :  { %v1132_v29 = vadd.f32 1e-05, %v1130_v41 }
 0x5a0   :  { %1279 = vrsqrt.f32 %v1132_v29  ;;  %vm1149_vm7 = vweird.f32 %v1132_v29 }
 0x5a6   :  { %v1280_v53 = vpop.eup %1279 }
 0x5a7   :  { %v1144_v45 = vmul.f32 %v1280_v53, %v1132_v29  ;;  %vm1150_vm6 = vweird.f32 %v1280_v53 }
 0x5a8   :  { %vm1151_vm8 = vmor %vm1149_vm7, %vm1150_vm6 }
 0x5a9   :  { %v1145_v42 = vmul.f32 %v1280_v53, %v1144_v45 }
 0x5ab   :  { %v1146_v26 = vmul.f32 0.5, %v1145_v42 }
 0x5ad   :  { %v1147_v43 = vsub.f32 1.5, %v1146_v26 }
 0x5af   :  { %v1148_v44 = vmul.f32 %v1280_v53, %v1147_v43 }
 0x5b1   :  { %v1152_v47 = vsel %vm1151_vm8, %v1280_v53, %v1148_v44 }
 0x5b2   :  { %v1154_v48 = vmul.f32 %v1152_v47, %v1120_v14 }
 0x5b4   :  { %v1160_v49 = vmul.f32 %v1273_v56, %v1154_v48 }
 0x5b6   :  { %v1166_v50 = vadd.f32 %v1274_v38, %v1160_v49 }
 0x5b8   :  { %1168 = vst.msk [vmem:[#allocation2 + $0x8] sm:$0xff] %vm163_vm1, %v1166_v50 }
 0x5b9   :  { %1181 = dma.vmem_to_hbm [thread:$0]  %s1174_s25, 256, %s1176_s22, [#allocation3], %s1313_s20, %s1313_s20, %s1314_s28  }
 0x5ba   :  { %1307 = dma.done.wait [#allocation3], 256  }
 0x5bb   :  { %1308 = vsyncadd [#allocation3], 4294967040 }
 0x5bc   :  { %1190 = vsyncpa [#allocation3], 1 }

</bundles_post_ra>
